<compile_context>
chip_gen: v7x
topology: tpu7x:2x2x1
jax: 0.10.0
libtpu: 0.0.40
codegen_flags: <defaults>
</compile_context>

<pallas_src>
import functools

import jax
import jax.numpy as jnp
from jax.experimental import pallas as pl
from jax.experimental.pallas import tpu as pltpu


def _round_up(v, m):
    return ((v + m - 1) // m) * m


# -----------------------------------------------------------------------------------
# In-kernel DGCN on one batch tile.  The batch is folded into the MXU row dimension.
#   xs3 : [TB, N, P]  packed input slab, lanes = [ state(H) | x(Din) | zero pad ]
#   ed3 : [TB, N, D]  dynamic node embeddings (node_embeddings[0])
#   w   : refs (w1, b1, w2t, b2, w3, b3, wa, wb, bias, es_exp), see _prep_dgcn
# returns [TB*N, O]   (O = n_splits * hidden, dense, no lane padding)
# -----------------------------------------------------------------------------------
def _dgcn(xs3, ed3, w):
    f32, bf16 = jnp.float32, jnp.bfloat16
    w1_r, b1_r, w2t_r, b2_r, w3_r, b3_r, wa_r, wb_r, bias_r, es_r = w
    tb, n, p = xs3.shape
    d = ed3.shape[-1]
    r = tb * n
    xs2 = xs3.reshape(r, p)
    xs_b = xs2.astype(bf16)                              # MXU operand (f32 accumulate)

    # ---- hyper-network filter -------------------------------------------------
    # fc1: one bf16 MXU matmul over the packed slab (K = P fits one weight tile).
    h1 = jax.nn.sigmoid(jnp.dot(xs_b, w1_r[...], preferred_element_type=f32)
                        + b1_r[...])                                      # [R, hyper]
    # fc2 + fc3: middle_dim is tiny (=2) -> VPU/XLU (weighted lane reduce + MACs),
    # keeps the MXU FIFO free for the big slab matmuls.
    w2t, b2, w3 = w2t_r[...], b2_r[...], w3_r[...]
    filt = jnp.broadcast_to(b3_r[...], (r, d))                            # [R, D]
    for j in range(w2t.shape[0]):
        pre = jnp.sum(h1 * w2t[j:j + 1, :], axis=-1, keepdims=True) + b2[:, j:j + 1]
        filt = filt + jax.nn.sigmoid(pre) * w3[j:j + 1, :]

    # ---- dynamic adjacency + normalized Laplacian (identity folded in) ----------
    nodevec = jnp.tanh(ed3 * filt.reshape(tb, n, d)).astype(bf16)         # [TB,N,D]
    adj = jnp.maximum(jnp.einsum('bnd,bmd->bnm', nodevec, nodevec,
                                 preferred_element_type=f32), 0.0)         # [TB,N,N]
    # A symmetric -> a single row-sum reduction gives the degree.
    dinv = jax.lax.rsqrt(jnp.sum(adj, axis=-1, keepdims=True) + 1.0)       # [TB,N,1]
    lx3 = (dinv * jnp.einsum('bnm,bmc->bnc', adj.astype(bf16),
                             (xs3 * dinv).astype(bf16),
                             preferred_element_type=f32)
           + (dinv * dinv) * xs3)                                          # [TB,N,P]
    lx_b = lx3.reshape(r, p).astype(bf16)

    # ---- graph convolution -------------------------------------------------------
    # One dense slab per cheb order: columns are D blocks of O lanes (no padding).
    t = (jnp.dot(xs_b, wa_r[...], preferred_element_type=f32)
         + jnp.dot(lx_b, wb_r[...], preferred_element_type=f32))           # [R, D*O]
    o_dim = bias_r.shape[-1]
    es_exp = jnp.broadcast_to(es_r[...][None], (tb, n, d * o_dim)).reshape(r, d * o_dim)
    tw = t * es_exp                                     # per-d weighting: pure VPU FMAs
    acc = jnp.broadcast_to(bias_r[...][None], (tb, n, o_dim)).reshape(r, o_dim)
    for dd in range(d):                                 # block-sum over the embedding dim
        acc = acc + tw[:, dd * o_dim:(dd + 1) * o_dim]
    return acc                                                             # [R, O]


# -----------------------------------------------------------------------------------
# Full DDGCRNCell: one TB-sized batch tile per grid step.
# -----------------------------------------------------------------------------------
def ddgcrn_cell_kernel(xs_ref, ed_ref, *rest, hidden):
    h_ref = rest[-1]
    gate_w, up_w = rest[:10], rest[10:20]
    f32 = jnp.float32

    xs3 = xs_ref[...].astype(f32)                       # [TB, N, P]  (state | x | 0)
    ed3 = ed_ref[...].astype(f32)                       # [TB, N, D]
    tb, n, p = xs3.shape
    r = tb * n
    xs2 = xs3.reshape(r, p)

    # gate DGCN -> z | r (dense 2*hidden lanes, z lane-aligned at 0)
    zr = jax.nn.sigmoid(_dgcn(xs3, ed3, gate_w))        # [R, 2H]
    z = zr[:, :hidden]

    # candidate slab: state lanes scaled by z, x lanes kept, pad lanes stay zero
    cand2 = jnp.concatenate([z * xs2[:, :hidden], xs2[:, hidden:]], axis=-1)
    hc = jnp.tanh(_dgcn(cand2.reshape(tb, n, p), ed3, up_w))               # [R, H]

    rg = zr[:, hidden:]
    h2d = rg * xs2[:, :hidden] + (1.0 - rg) * hc                           # [R, H]

    # lane-dense output store (pad lanes are sliced off in the wrapper)
    hp_out = h_ref.shape[-1]
    if hp_out > hidden:
        h2d = jnp.concatenate([h2d, jnp.zeros((r, hp_out - hidden), f32)], axis=-1)
    h_ref[...] = h2d.reshape(tb, n, hp_out).astype(h_ref.dtype)


# -----------------------------------------------------------------------------------
# Wrapper-side weight re-layout for the packed [state | x | 0] input slab.
# -----------------------------------------------------------------------------------
def _prep_dgcn(params, emb_stat, dim_in, hidden, p_in, n_splits):
    """Re-lay DGCN weights:
       - rows permuted / zero-padded to the packed lane order (width p_in),
       - graph-conv columns laid densely as D blocks of o_dim (no lane padding),
       - bias_pool folded with the static embeddings (weight-only product),
       - es expanded across lanes for the per-d weighted reduce,
       - MXU operands cast to bfloat16 (accumulation stays f32 in-kernel)."""
    f32, bf16 = jnp.float32, jnp.bfloat16
    d_emb, cheb_k, cin, o_dim = params["weights_pool"].shape
    assert cheb_k == 2 and o_dim == n_splits * hidden and cin == dim_in + hidden

    def pack_rows(w):                                    # [cin, C] -> [p_in, C]
        out = jnp.zeros((p_in,) + w.shape[1:], f32)
        out = out.at[:hidden].set(w[dim_in:])            # state rows -> lanes [0, H)
        out = out.at[hidden:hidden + dim_in].set(w[:dim_in])   # x rows -> [H, H+Din)
        return out

    wp = params["weights_pool"].astype(f32)              # [D, 2, cin, O]

    def slab(k):                                         # cheb order k -> [p_in, D*O]
        w = jnp.transpose(wp[:, k], (1, 0, 2)).reshape(cin, d_emb * o_dim)
        return pack_rows(w).astype(bf16)

    wa, wb = slab(0), slab(1)
    bias = jnp.dot(emb_stat, params["bias_pool"].astype(f32),
                   precision=jax.lax.Precision.HIGHEST)                   # [N, O]
    es_exp = jnp.repeat(emb_stat, o_dim, axis=1)                          # [N, D*O]

    w1 = pack_rows(params["w1"].astype(f32)).astype(bf16)                 # [p_in, hyper]
    b1 = params["b1"].astype(f32).reshape(1, -1)
    w2t = params["w2"].astype(f32).T                                      # [mid, hyper]
    b2 = params["b2"].astype(f32).reshape(1, -1)
    w3 = params["w3"].astype(f32)                                         # [mid, D]
    b3 = params["b3"].astype(f32).reshape(1, -1)
    return [w1, b1, w2t, b2, w3, b3, wa, wb, bias, es_exp]


def ddgcrn_cell(x, state, emb_dyn, emb_stat, gate_params, update_params, *, block_b=None):
    b, n, dim_in = x.shape
    h = state.shape[-1]
    d_emb = emb_stat.shape[-1]
    f32 = jnp.float32
    p_in = _round_up(h + dim_in, 128)       # packed input width (state | x | zero pad)
    hp_out = _round_up(h, 128)              # lane-dense output store width

    # scoped-VMEM budget: ~3/4 of the chip's per-core VMEM (128 MiB v5e/v6e, 64 MiB v7x)
    try:
        vmem_cap = int(pltpu.get_tpu_info().vmem_capacity_bytes)
    except Exception:
        vmem_cap = 64 * 1024 * 1024
    vmem_limit = min(vmem_cap * 3 // 4, 100 * 1024 * 1024)

    if block_b is None:
        block_b = max(1, 512 // n)                        # ~512 MXU rows per tile
        # rough per-batch-element f32 footprint of the dominant live tensors
        per_b = n * (2 * d_emb * h + n + 6 * p_in) * 4
        block_b = max(1, min(block_b, (vmem_limit // 3) // max(per_b, 1)))
        if b > 1:
            block_b = min(block_b, -(-b // 2))            # >=2 grid steps (v7x: 2 TCs)
    tb = max(1, min(int(block_b), b))
    b_pad = _round_up(b, tb)

    # pack [state | x | 0] into one lane-padded slab (single per-step input stream)
    xs = jnp.zeros((b_pad, n, p_in), f32)
    xs = xs.at[:b, :, :h].set(state.astype(f32))
    xs = xs.at[:b, :, h:h + dim_in].set(x.astype(f32))
    ed = jnp.zeros((b_pad, n, d_emb), f32).at[:b].set(emb_dyn.astype(f32))

    esf = emb_stat.astype(f32)
    gate_args = _prep_dgcn(gate_params, esf, dim_in, h, p_in, 2)
    up_args = _prep_dgcn(update_params, esf, dim_in, h, p_in, 1)
    weight_args = gate_args + up_args

    def bspec(c):
        return pl.BlockSpec((tb, n, c), lambda i: (i, 0, 0))

    def fspec(a):
        # grid-invariant operand: whole-array block, constant index map (DMA'd once)
        return pl.BlockSpec(a.shape, lambda i: (0,) * a.ndim)

    kernel = functools.partial(ddgcrn_cell_kernel, hidden=h)
    out = pl.pallas_call(
        kernel,
        out_shape=jax.ShapeDtypeStruct((b_pad, n, hp_out), x.dtype),
        grid_spec=pltpu.PrefetchScalarGridSpec(
            num_scalar_prefetch=0,
            grid=(b_pad // tb,),
            in_specs=[bspec(p_in), bspec(d_emb)] + [fspec(a) for a in weight_args],
            out_specs=pl.BlockSpec((tb, n, hp_out), lambda i: (i, 0, 0)),
        ),
        compiler_params=pltpu.CompilerParams(
            dimension_semantics=("parallel",),
            vmem_limit_bytes=int(vmem_limit),
        ),
    )(xs, ed, *weight_args)
    return out[:b, :, :h]


# -----------------------------------------------------------------------------------
# Pure-JAX reference (mirrors the PyTorch module) for self-validation
# -----------------------------------------------------------------------------------
def _dgcn_ref(x, emb_dyn, emb_stat, p):
    hp = jax.lax.Precision.HIGHEST
    h1 = jax.nn.sigmoid(jnp.dot(x, p["w1"], precision=hp) + p["b1"])
    h2 = jax.nn.sigmoid(jnp.dot(h1, p["w2"], precision=hp) + p["b2"])
    filt = jnp.dot(h2, p["w3"], precision=hp) + p["b3"]
    nodevec = jnp.tanh(emb_dyn * filt)                                    # [B,N,D]
    adj = jax.nn.relu(jnp.einsum("bnd,bmd->bnm", nodevec, nodevec, precision=hp))
    n = x.shape[1]
    a_hat = adj + jnp.eye(n, dtype=x.dtype)
    dinv = jnp.sum(a_hat, axis=-1) ** -0.5
    lap = dinv[:, :, None] * a_hat * dinv[:, None, :]
    xg = jnp.stack([x, jnp.einsum("bnm,bmc->bnc", lap, x, precision=hp)], axis=2)
    weights = jnp.einsum("nd,dkio->nkio", emb_stat, p["weights_pool"], precision=hp)
    bias = jnp.dot(emb_stat, p["bias_pool"], precision=hp)
    return jnp.einsum("bnki,nkio->bno", xg, weights, precision=hp) + bias


def ddgcrn_cell_ref(x, state, emb_dyn, emb_stat, gate_p, up_p):
    h = state.shape[-1]
    inp = jnp.concatenate([x, state], axis=-1)
    zr = jax.nn.sigmoid(_dgcn_ref(inp, emb_dyn, emb_stat, gate_p))
    z, r = zr[..., :h], zr[..., h:]
    cand = jnp.concatenate([x, z * state], axis=-1)
    hc = jnp.tanh(_dgcn_ref(cand, emb_dyn, emb_stat, up_p))
    return r * state + (1.0 - r) * hc


# -----------------------------------------------------------------------------------
def _init_dgcn_params(key, cin, out_dim, embed_dim, hyper_dim=16, middle_dim=2):
    ks = jax.random.split(key, 8)
    s = 0.1
    return {
        "weights_pool": s * jax.random.normal(ks[0], (embed_dim, 2, cin, out_dim), jnp.float32),
        "bias_pool":    s * jax.random.normal(ks[1], (embed_dim, out_dim), jnp.float32),
        "w1": s * jax.random.normal(ks[2], (cin, hyper_dim), jnp.float32),
        "b1": s * jax.random.normal(ks[3], (hyper_dim,), jnp.float32),
        "w2": s * jax.random.normal(ks[4], (hyper_dim, middle_dim), jnp.float32),
        "b2": s * jax.random.normal(ks[5], (middle_dim,), jnp.float32),
        "w3": s * jax.random.normal(ks[6], (middle_dim, embed_dim), jnp.float32),
        "b3": s * jax.random.normal(ks[7], (embed_dim,), jnp.float32),
    }


if __name__ == "__main__":
    # small shapes: batch=5, node_num=16, dim_in=2, hidden=32, cheb_k=2, embed_dim=8
    # default tiling heuristic -> TB=3, grid of 2 batch tiles (exercises tiling + padding)
    B, N, DIM_IN, HIDDEN, EMBED = 5, 16, 2, 32, 8
    CIN = DIM_IN + HIDDEN

    key = jax.random.PRNGKey(0)
    k_x, k_s, k_ed, k_es, k_g, k_u = jax.random.split(key, 6)

    x = jax.random.normal(k_x, (B, N, DIM_IN), jnp.float32)
    state = jax.random.normal(k_s, (B, N, HIDDEN), jnp.float32)
    emb_dyn = jax.random.normal(k_ed, (B, N, EMBED), jnp.float32)       # node_embeddings[0]
    emb_stat = jax.random.normal(k_es, (N, EMBED), jnp.float32)         # node_embeddings[1]

    gate_params = _init_dgcn_params(k_g, CIN, 2 * HIDDEN, EMBED)
    update_params = _init_dgcn_params(k_u, CIN, HIDDEN, EMBED)

    h = ddgcrn_cell(x, state, emb_dyn, emb_stat, gate_params, update_params)
    h = jax.block_until_ready(h)

    h_ref = ddgcrn_cell_ref(x, state, emb_dyn, emb_stat, gate_params, update_params)
    assert h.shape == (B, N, HIDDEN)
    err = float(jnp.max(jnp.abs(h - h_ref)))
    # bf16 MXU operands (f32 accumulation) vs. the f32/HIGHEST-precision reference.
    assert jnp.allclose(h, h_ref, atol=8e-2, rtol=8e-2), \
        f"mismatch vs pure-JAX reference (max|err|={err:.2e})"

    print("KERNEL_OK")
</pallas_src>

<mosaic_0001>
module attributes {stable_mosaic.version = 11 : i64} {
  func.func @ddgcrn_cell_kernel(%arg0: i32, %arg1: memref<3x16x128xf32, #tpu.memory_space<vmem>>, %arg2: memref<3x16x8xf32, #tpu.memory_space<vmem>>, %arg3: memref<128x16xbf16, #tpu.memory_space<vmem>>, %arg4: memref<1x16xf32, #tpu.memory_space<vmem>>, %arg5: memref<2x16xf32, #tpu.memory_space<vmem>>, %arg6: memref<1x2xf32, #tpu.memory_space<vmem>>, %arg7: memref<2x8xf32, #tpu.memory_space<vmem>>, %arg8: memref<1x8xf32, #tpu.memory_space<vmem>>, %arg9: memref<128x512xbf16, #tpu.memory_space<vmem>>, %arg10: memref<128x512xbf16, #tpu.memory_space<vmem>>, %arg11: memref<16x64xf32, #tpu.memory_space<vmem>>, %arg12: memref<16x512xf32, #tpu.memory_space<vmem>>, %arg13: memref<128x16xbf16, #tpu.memory_space<vmem>>, %arg14: memref<1x16xf32, #tpu.memory_space<vmem>>, %arg15: memref<2x16xf32, #tpu.memory_space<vmem>>, %arg16: memref<1x2xf32, #tpu.memory_space<vmem>>, %arg17: memref<2x8xf32, #tpu.memory_space<vmem>>, %arg18: memref<1x8xf32, #tpu.memory_space<vmem>>, %arg19: memref<128x256xbf16, #tpu.memory_space<vmem>>, %arg20: memref<128x256xbf16, #tpu.memory_space<vmem>>, %arg21: memref<16x32xf32, #tpu.memory_space<vmem>>, %arg22: memref<16x256xf32, #tpu.memory_space<vmem>>, %arg23: memref<3x16x128xf32, #tpu.memory_space<vmem>>) attributes {dimension_semantics = [#tpu.dimension_semantics<parallel>], iteration_bounds = array<i64: 2>, scalar_prefetch = 0 : i64, scratch_operands = 0 : i64, tpu.core_type = #tpu.core_type<tc>, window_params = [{transform_indices = @transform_0, window_bounds = array<i64: 3, 16, 128>}, {transform_indices = @transform_1, window_bounds = array<i64: 3, 16, 8>}, {pipeline_mode = #tpu.pipeline_mode<synchronous>, transform_indices = @transform_2, window_bounds = array<i64: 128, 16>}, {pipeline_mode = #tpu.pipeline_mode<synchronous>, transform_indices = @transform_3, window_bounds = array<i64: 1, 16>}, {pipeline_mode = #tpu.pipeline_mode<synchronous>, transform_indices = @transform_4, window_bounds = array<i64: 2, 16>}, {pipeline_mode = #tpu.pipeline_mode<synchronous>, transform_indices = @transform_5, window_bounds = array<i64: 1, 2>}, {pipeline_mode = #tpu.pipeline_mode<synchronous>, transform_indices = @transform_6, window_bounds = array<i64: 2, 8>}, {pipeline_mode = #tpu.pipeline_mode<synchronous>, transform_indices = @transform_7, window_bounds = array<i64: 1, 8>}, {pipeline_mode = #tpu.pipeline_mode<synchronous>, transform_indices = @transform_8, window_bounds = array<i64: 128, 512>}, {pipeline_mode = #tpu.pipeline_mode<synchronous>, transform_indices = @transform_9, window_bounds = array<i64: 128, 512>}, {pipeline_mode = #tpu.pipeline_mode<synchronous>, transform_indices = @transform_10, window_bounds = array<i64: 16, 64>}, {pipeline_mode = #tpu.pipeline_mode<synchronous>, transform_indices = @transform_11, window_bounds = array<i64: 16, 512>}, {pipeline_mode = #tpu.pipeline_mode<synchronous>, transform_indices = @transform_12, window_bounds = array<i64: 128, 16>}, {pipeline_mode = #tpu.pipeline_mode<synchronous>, transform_indices = @transform_13, window_bounds = array<i64: 1, 16>}, {pipeline_mode = #tpu.pipeline_mode<synchronous>, transform_indices = @transform_14, window_bounds = array<i64: 2, 16>}, {pipeline_mode = #tpu.pipeline_mode<synchronous>, transform_indices = @transform_15, window_bounds = array<i64: 1, 2>}, {pipeline_mode = #tpu.pipeline_mode<synchronous>, transform_indices = @transform_16, window_bounds = array<i64: 2, 8>}, {pipeline_mode = #tpu.pipeline_mode<synchronous>, transform_indices = @transform_17, window_bounds = array<i64: 1, 8>}, {pipeline_mode = #tpu.pipeline_mode<synchronous>, transform_indices = @transform_18, window_bounds = array<i64: 128, 256>}, {pipeline_mode = #tpu.pipeline_mode<synchronous>, transform_indices = @transform_19, window_bounds = array<i64: 128, 256>}, {pipeline_mode = #tpu.pipeline_mode<synchronous>, transform_indices = @transform_20, window_bounds = array<i64: 16, 32>}, {pipeline_mode = #tpu.pipeline_mode<synchronous>, transform_indices = @transform_21, window_bounds = array<i64: 16, 256>}, {transform_indices = @transform_22, window_bounds = array<i64: 3, 16, 128>}]} {
    %c0 = arith.constant 0 : index
    %c0_0 = arith.constant 0 : index
    %c0_1 = arith.constant 0 : index
    %0 = vector.load %arg1[%c0, %c0_0, %c0_1] : memref<3x16x128xf32, #tpu.memory_space<vmem>>, vector<3x16x128xf32>
    %c0_2 = arith.constant 0 : index
    %c0_3 = arith.constant 0 : index
    %c0_4 = arith.constant 0 : index
    %1 = vector.load %arg2[%c0_2, %c0_3, %c0_4] : memref<3x16x8xf32, #tpu.memory_space<vmem>>, vector<3x16x8xf32>
    %2 = vector.shape_cast %0 : vector<3x16x128xf32> to vector<48x128xf32>
    %3 = vector.shape_cast %0 : vector<3x16x128xf32> to vector<48x128xf32>
    %4 = arith.truncf %3 : vector<48x128xf32> to vector<48x128xbf16>
    %c0_5 = arith.constant 0 : index
    %c0_6 = arith.constant 0 : index
    %5 = vector.load %arg3[%c0_5, %c0_6] : memref<128x16xbf16, #tpu.memory_space<vmem>>, vector<128x16xbf16>
    %cst = arith.constant dense<0.000000e+00> : vector<48x16xf32>
    %6 = tpu.matmul %4, %5, %cst {dimension_numbers = #tpu.dot_dimension_numbers<[1], [0], [0], [1], [0, 0, 1, 1], [], []>} : vector<48x128xbf16>, vector<128x16xbf16>, vector<48x16xf32> -> vector<48x16xf32>
    %c0_7 = arith.constant 0 : index
    %c0_8 = arith.constant 0 : index
    %7 = vector.load %arg4[%c0_7, %c0_8] : memref<1x16xf32, #tpu.memory_space<vmem>>, vector<1x16xf32>
    %8 = vector.broadcast %7 : vector<1x16xf32> to vector<48x16xf32>
    %9 = arith.addf %6, %8 : vector<48x16xf32>
    %10 = arith.negf %9 : vector<48x16xf32>
    %11 = math.exp %10 : vector<48x16xf32>
    %cst_9 = arith.constant 1.000000e+00 : f32
    %12 = vector.broadcast %cst_9 : f32 to vector<48x16xf32>
    %13 = arith.addf %12, %11 : vector<48x16xf32>
    %14 = arith.divf %12, %13 : vector<48x16xf32>
    %c0_10 = arith.constant 0 : index
    %c0_11 = arith.constant 0 : index
    %15 = vector.load %arg5[%c0_10, %c0_11] : memref<2x16xf32, #tpu.memory_space<vmem>>, vector<2x16xf32>
    %c0_12 = arith.constant 0 : index
    %c0_13 = arith.constant 0 : index
    %16 = vector.load %arg6[%c0_12, %c0_13] : memref<1x2xf32, #tpu.memory_space<vmem>>, vector<1x2xf32>
    %c0_14 = arith.constant 0 : index
    %c0_15 = arith.constant 0 : index
    %17 = vector.load %arg7[%c0_14, %c0_15] : memref<2x8xf32, #tpu.memory_space<vmem>>, vector<2x8xf32>
    %c0_16 = arith.constant 0 : index
    %c0_17 = arith.constant 0 : index
    %18 = vector.load %arg8[%c0_16, %c0_17] : memref<1x8xf32, #tpu.memory_space<vmem>>, vector<1x8xf32>
    %19 = vector.shape_cast %18 : vector<1x8xf32> to vector<1x8xf32>
    %20 = vector.broadcast %19 : vector<1x8xf32> to vector<48x8xf32>
    %21 = vector.extract_strided_slice %15 {offsets = [0, 0], sizes = [1, 16], strides = [1, 1]} : vector<2x16xf32> to vector<1x16xf32>
    %22 = vector.broadcast %21 : vector<1x16xf32> to vector<48x16xf32>
    %23 = arith.mulf %14, %22 : vector<48x16xf32>
    %cst_18 = arith.constant dense<0.000000e+00> : vector<48xf32>
    %24 = vector.multi_reduction <add>, %23, %cst_18 [1] : vector<48x16xf32> to vector<48xf32>
    %25 = vector.shape_cast %24 : vector<48xf32> to vector<48x1xf32>
    %26 = vector.extract_strided_slice %16 {offsets = [0, 0], sizes = [1, 1], strides = [1, 1]} : vector<1x2xf32> to vector<1x1xf32>
    %27 = vector.broadcast %26 : vector<1x1xf32> to vector<48x1xf32>
    %28 = arith.addf %25, %27 : vector<48x1xf32>
    %29 = arith.negf %28 : vector<48x1xf32>
    %30 = math.exp %29 : vector<48x1xf32>
    %cst_19 = arith.constant 1.000000e+00 : f32
    %31 = vector.broadcast %cst_19 : f32 to vector<48x1xf32>
    %32 = arith.addf %31, %30 : vector<48x1xf32>
    %33 = arith.divf %31, %32 : vector<48x1xf32>
    %34 = vector.extract_strided_slice %17 {offsets = [0, 0], sizes = [1, 8], strides = [1, 1]} : vector<2x8xf32> to vector<1x8xf32>
    %35 = vector.broadcast %33 : vector<48x1xf32> to vector<48x8xf32>
    %36 = vector.broadcast %34 : vector<1x8xf32> to vector<48x8xf32>
    %37 = arith.mulf %35, %36 : vector<48x8xf32>
    %38 = arith.addf %20, %37 : vector<48x8xf32>
    %39 = vector.extract_strided_slice %15 {offsets = [1, 0], sizes = [1, 16], strides = [1, 1]} : vector<2x16xf32> to vector<1x16xf32>
    %40 = vector.broadcast %39 : vector<1x16xf32> to vector<48x16xf32>
    %41 = arith.mulf %14, %40 : vector<48x16xf32>
    %cst_20 = arith.constant dense<0.000000e+00> : vector<48xf32>
    %42 = vector.multi_reduction <add>, %41, %cst_20 [1] : vector<48x16xf32> to vector<48xf32>
    %43 = vector.shape_cast %42 : vector<48xf32> to vector<48x1xf32>
    %44 = vector.extract_strided_slice %16 {offsets = [0, 1], sizes = [1, 1], strides = [1, 1]} : vector<1x2xf32> to vector<1x1xf32>
    %45 = vector.broadcast %44 : vector<1x1xf32> to vector<48x1xf32>
    %46 = arith.addf %43, %45 : vector<48x1xf32>
    %47 = arith.negf %46 : vector<48x1xf32>
    %48 = math.exp %47 : vector<48x1xf32>
    %cst_21 = arith.constant 1.000000e+00 : f32
    %49 = vector.broadcast %cst_21 : f32 to vector<48x1xf32>
    %50 = arith.addf %49, %48 : vector<48x1xf32>
    %51 = arith.divf %49, %50 : vector<48x1xf32>
    %52 = vector.extract_strided_slice %17 {offsets = [1, 0], sizes = [1, 8], strides = [1, 1]} : vector<2x8xf32> to vector<1x8xf32>
    %53 = vector.broadcast %51 : vector<48x1xf32> to vector<48x8xf32>
    %54 = vector.broadcast %52 : vector<1x8xf32> to vector<48x8xf32>
    %55 = arith.mulf %53, %54 : vector<48x8xf32>
    %56 = arith.addf %38, %55 : vector<48x8xf32>
    %57 = vector.shape_cast %56 : vector<48x8xf32> to vector<3x16x8xf32>
    %58 = arith.mulf %1, %57 : vector<3x16x8xf32>
    %59 = math.tanh %58 : vector<3x16x8xf32>
    %60 = arith.truncf %59 : vector<3x16x8xf32> to vector<3x16x8xbf16>
    "tpu.trace_start"() <{level = 10 : i32, message = "bnd,bmd->bnm"}> : () -> ()
    %cst_22 = arith.constant dense<0.000000e+00> : vector<3x16x16xf32>
    %61 = tpu.matmul %60, %60, %cst_22 {dimension_numbers = #tpu.dot_dimension_numbers<[2], [2], [1], [1], [0, 0, 0, 1, 1, 1], [0], [0]>} : vector<3x16x8xbf16>, vector<3x16x8xbf16>, vector<3x16x16xf32> -> vector<3x16x16xf32>
    "tpu.trace_stop"() : () -> ()
    %cst_23 = arith.constant 0.000000e+00 : f32
    %62 = vector.broadcast %cst_23 : f32 to vector<3x16x16xf32>
    %63 = arith.maximumf %61, %62 : vector<3x16x16xf32>
    %cst_24 = arith.constant dense<0.000000e+00> : vector<3x16xf32>
    %64 = vector.multi_reduction <add>, %63, %cst_24 [2] : vector<3x16x16xf32> to vector<3x16xf32>
    %65 = vector.shape_cast %64 : vector<3x16xf32> to vector<3x16x1xf32>
    %cst_25 = arith.constant 1.000000e+00 : f32
    %66 = vector.broadcast %cst_25 : f32 to vector<3x16x1xf32>
    %67 = arith.addf %65, %66 : vector<3x16x1xf32>
    %68 = math.rsqrt %67 : vector<3x16x1xf32>
    %69 = arith.truncf %63 : vector<3x16x16xf32> to vector<3x16x16xbf16>
    %70 = vector.broadcast %68 : vector<3x16x1xf32> to vector<3x16x128xf32>
    %71 = arith.mulf %0, %70 : vector<3x16x128xf32>
    %72 = arith.truncf %71 : vector<3x16x128xf32> to vector<3x16x128xbf16>
    "tpu.trace_start"() <{level = 10 : i32, message = "bnm,bmc->bnc"}> : () -> ()
    %cst_26 = arith.constant dense<0.000000e+00> : vector<3x16x128xf32>
    %73 = tpu.matmul %69, %72, %cst_26 {dimension_numbers = #tpu.dot_dimension_numbers<[2], [1], [1], [2], [0, 0, 0, 1, 1, 2], [0], [0]>} : vector<3x16x16xbf16>, vector<3x16x128xbf16>, vector<3x16x128xf32> -> vector<3x16x128xf32>
    "tpu.trace_stop"() : () -> ()
    %74 = vector.broadcast %68 : vector<3x16x1xf32> to vector<3x16x128xf32>
    %75 = arith.mulf %74, %73 : vector<3x16x128xf32>
    %76 = arith.mulf %68, %68 : vector<3x16x1xf32>
    %77 = vector.broadcast %76 : vector<3x16x1xf32> to vector<3x16x128xf32>
    %78 = arith.mulf %77, %0 : vector<3x16x128xf32>
    %79 = arith.addf %75, %78 : vector<3x16x128xf32>
    %80 = vector.shape_cast %79 : vector<3x16x128xf32> to vector<48x128xf32>
    %81 = arith.truncf %80 : vector<48x128xf32> to vector<48x128xbf16>
    %c0_27 = arith.constant 0 : index
    %c0_28 = arith.constant 0 : index
    %82 = vector.load %arg9[%c0_27, %c0_28] : memref<128x512xbf16, #tpu.memory_space<vmem>>, vector<128x512xbf16>
    %cst_29 = arith.constant dense<0.000000e+00> : vector<48x512xf32>
    %83 = tpu.matmul %4, %82, %cst_29 {dimension_numbers = #tpu.dot_dimension_numbers<[1], [0], [0], [1], [0, 0, 1, 1], [], []>} : vector<48x128xbf16>, vector<128x512xbf16>, vector<48x512xf32> -> vector<48x512xf32>
    %c0_30 = arith.constant 0 : index
    %c0_31 = arith.constant 0 : index
    %84 = vector.load %arg10[%c0_30, %c0_31] : memref<128x512xbf16, #tpu.memory_space<vmem>>, vector<128x512xbf16>
    %cst_32 = arith.constant dense<0.000000e+00> : vector<48x512xf32>
    %85 = tpu.matmul %81, %84, %cst_32 {dimension_numbers = #tpu.dot_dimension_numbers<[1], [0], [0], [1], [0, 0, 1, 1], [], []>} : vector<48x128xbf16>, vector<128x512xbf16>, vector<48x512xf32> -> vector<48x512xf32>
    %86 = arith.addf %83, %85 : vector<48x512xf32>
    %c0_33 = arith.constant 0 : index
    %c0_34 = arith.constant 0 : index
    %87 = vector.load %arg12[%c0_33, %c0_34] : memref<16x512xf32, #tpu.memory_space<vmem>>, vector<16x512xf32>
    %88 = vector.shape_cast %87 : vector<16x512xf32> to vector<1x16x512xf32>
    %89 = vector.shape_cast %88 : vector<1x16x512xf32> to vector<1x16x512xf32>
    %90 = vector.broadcast %89 : vector<1x16x512xf32> to vector<3x16x512xf32>
    %91 = vector.shape_cast %90 : vector<3x16x512xf32> to vector<48x512xf32>
    %92 = arith.mulf %86, %91 : vector<48x512xf32>
    %c0_35 = arith.constant 0 : index
    %c0_36 = arith.constant 0 : index
    %93 = vector.load %arg11[%c0_35, %c0_36] : memref<16x64xf32, #tpu.memory_space<vmem>>, vector<16x64xf32>
    %94 = vector.shape_cast %93 : vector<16x64xf32> to vector<1x16x64xf32>
    %95 = vector.shape_cast %94 : vector<1x16x64xf32> to vector<1x16x64xf32>
    %96 = vector.broadcast %95 : vector<1x16x64xf32> to vector<3x16x64xf32>
    %97 = vector.shape_cast %96 : vector<3x16x64xf32> to vector<48x64xf32>
    %98 = vector.extract_strided_slice %92 {offsets = [0, 0], sizes = [48, 64], strides = [1, 1]} : vector<48x512xf32> to vector<48x64xf32>
    %99 = arith.addf %97, %98 : vector<48x64xf32>
    %100 = vector.extract_strided_slice %92 {offsets = [0, 64], sizes = [48, 64], strides = [1, 1]} : vector<48x512xf32> to vector<48x64xf32>
    %101 = arith.addf %99, %100 : vector<48x64xf32>
    %102 = vector.extract_strided_slice %92 {offsets = [0, 128], sizes = [48, 64], strides = [1, 1]} : vector<48x512xf32> to vector<48x64xf32>
    %103 = arith.addf %101, %102 : vector<48x64xf32>
    %104 = vector.extract_strided_slice %92 {offsets = [0, 192], sizes = [48, 64], strides = [1, 1]} : vector<48x512xf32> to vector<48x64xf32>
    %105 = arith.addf %103, %104 : vector<48x64xf32>
    %106 = vector.extract_strided_slice %92 {offsets = [0, 256], sizes = [48, 64], strides = [1, 1]} : vector<48x512xf32> to vector<48x64xf32>
    %107 = arith.addf %105, %106 : vector<48x64xf32>
    %108 = vector.extract_strided_slice %92 {offsets = [0, 320], sizes = [48, 64], strides = [1, 1]} : vector<48x512xf32> to vector<48x64xf32>
    %109 = arith.addf %107, %108 : vector<48x64xf32>
    %110 = vector.extract_strided_slice %92 {offsets = [0, 384], sizes = [48, 64], strides = [1, 1]} : vector<48x512xf32> to vector<48x64xf32>
    %111 = arith.addf %109, %110 : vector<48x64xf32>
    %112 = vector.extract_strided_slice %92 {offsets = [0, 448], sizes = [48, 64], strides = [1, 1]} : vector<48x512xf32> to vector<48x64xf32>
    %113 = arith.addf %111, %112 : vector<48x64xf32>
    %114 = arith.negf %113 : vector<48x64xf32>
    %115 = math.exp %114 : vector<48x64xf32>
    %cst_37 = arith.constant 1.000000e+00 : f32
    %116 = vector.broadcast %cst_37 : f32 to vector<48x64xf32>
    %117 = arith.addf %116, %115 : vector<48x64xf32>
    %118 = arith.divf %116, %117 : vector<48x64xf32>
    %119 = vector.extract_strided_slice %118 {offsets = [0, 0], sizes = [48, 32], strides = [1, 1]} : vector<48x64xf32> to vector<48x32xf32>
    %120 = vector.extract_strided_slice %2 {offsets = [0, 0], sizes = [48, 32], strides = [1, 1]} : vector<48x128xf32> to vector<48x32xf32>
    %121 = arith.mulf %119, %120 : vector<48x32xf32>
    %122 = vector.extract_strided_slice %2 {offsets = [0, 32], sizes = [48, 96], strides = [1, 1]} : vector<48x128xf32> to vector<48x96xf32>
    %123 = tpu.concatenate %121, %122 in 1 : vector<48x32xf32>, vector<48x96xf32> -> vector<48x128xf32>
    %124 = vector.shape_cast %123 : vector<48x128xf32> to vector<3x16x128xf32>
    %125 = vector.shape_cast %124 : vector<3x16x128xf32> to vector<48x128xf32>
    %126 = arith.truncf %125 : vector<48x128xf32> to vector<48x128xbf16>
    %c0_38 = arith.constant 0 : index
    %c0_39 = arith.constant 0 : index
    %127 = vector.load %arg13[%c0_38, %c0_39] : memref<128x16xbf16, #tpu.memory_space<vmem>>, vector<128x16xbf16>
    %cst_40 = arith.constant dense<0.000000e+00> : vector<48x16xf32>
    %128 = tpu.matmul %126, %127, %cst_40 {dimension_numbers = #tpu.dot_dimension_numbers<[1], [0], [0], [1], [0, 0, 1, 1], [], []>} : vector<48x128xbf16>, vector<128x16xbf16>, vector<48x16xf32> -> vector<48x16xf32>
    %c0_41 = arith.constant 0 : index
    %c0_42 = arith.constant 0 : index
    %129 = vector.load %arg14[%c0_41, %c0_42] : memref<1x16xf32, #tpu.memory_space<vmem>>, vector<1x16xf32>
    %130 = vector.broadcast %129 : vector<1x16xf32> to vector<48x16xf32>
    %131 = arith.addf %128, %130 : vector<48x16xf32>
    %132 = arith.negf %131 : vector<48x16xf32>
    %133 = math.exp %132 : vector<48x16xf32>
    %cst_43 = arith.constant 1.000000e+00 : f32
    %134 = vector.broadcast %cst_43 : f32 to vector<48x16xf32>
    %135 = arith.addf %134, %133 : vector<48x16xf32>
    %136 = arith.divf %134, %135 : vector<48x16xf32>
    %c0_44 = arith.constant 0 : index
    %c0_45 = arith.constant 0 : index
    %137 = vector.load %arg15[%c0_44, %c0_45] : memref<2x16xf32, #tpu.memory_space<vmem>>, vector<2x16xf32>
    %c0_46 = arith.constant 0 : index
    %c0_47 = arith.constant 0 : index
    %138 = vector.load %arg16[%c0_46, %c0_47] : memref<1x2xf32, #tpu.memory_space<vmem>>, vector<1x2xf32>
    %c0_48 = arith.constant 0 : index
    %c0_49 = arith.constant 0 : index
    %139 = vector.load %arg17[%c0_48, %c0_49] : memref<2x8xf32, #tpu.memory_space<vmem>>, vector<2x8xf32>
    %c0_50 = arith.constant 0 : index
    %c0_51 = arith.constant 0 : index
    %140 = vector.load %arg18[%c0_50, %c0_51] : memref<1x8xf32, #tpu.memory_space<vmem>>, vector<1x8xf32>
    %141 = vector.shape_cast %140 : vector<1x8xf32> to vector<1x8xf32>
    %142 = vector.broadcast %141 : vector<1x8xf32> to vector<48x8xf32>
    %143 = vector.extract_strided_slice %137 {offsets = [0, 0], sizes = [1, 16], strides = [1, 1]} : vector<2x16xf32> to vector<1x16xf32>
    %144 = vector.broadcast %143 : vector<1x16xf32> to vector<48x16xf32>
    %145 = arith.mulf %136, %144 : vector<48x16xf32>
    %cst_52 = arith.constant dense<0.000000e+00> : vector<48xf32>
    %146 = vector.multi_reduction <add>, %145, %cst_52 [1] : vector<48x16xf32> to vector<48xf32>
    %147 = vector.shape_cast %146 : vector<48xf32> to vector<48x1xf32>
    %148 = vector.extract_strided_slice %138 {offsets = [0, 0], sizes = [1, 1], strides = [1, 1]} : vector<1x2xf32> to vector<1x1xf32>
    %149 = vector.broadcast %148 : vector<1x1xf32> to vector<48x1xf32>
    %150 = arith.addf %147, %149 : vector<48x1xf32>
    %151 = arith.negf %150 : vector<48x1xf32>
    %152 = math.exp %151 : vector<48x1xf32>
    %cst_53 = arith.constant 1.000000e+00 : f32
    %153 = vector.broadcast %cst_53 : f32 to vector<48x1xf32>
    %154 = arith.addf %153, %152 : vector<48x1xf32>
    %155 = arith.divf %153, %154 : vector<48x1xf32>
    %156 = vector.extract_strided_slice %139 {offsets = [0, 0], sizes = [1, 8], strides = [1, 1]} : vector<2x8xf32> to vector<1x8xf32>
    %157 = vector.broadcast %155 : vector<48x1xf32> to vector<48x8xf32>
    %158 = vector.broadcast %156 : vector<1x8xf32> to vector<48x8xf32>
    %159 = arith.mulf %157, %158 : vector<48x8xf32>
    %160 = arith.addf %142, %159 : vector<48x8xf32>
    %161 = vector.extract_strided_slice %137 {offsets = [1, 0], sizes = [1, 16], strides = [1, 1]} : vector<2x16xf32> to vector<1x16xf32>
    %162 = vector.broadcast %161 : vector<1x16xf32> to vector<48x16xf32>
    %163 = arith.mulf %136, %162 : vector<48x16xf32>
    %cst_54 = arith.constant dense<0.000000e+00> : vector<48xf32>
    %164 = vector.multi_reduction <add>, %163, %cst_54 [1] : vector<48x16xf32> to vector<48xf32>
    %165 = vector.shape_cast %164 : vector<48xf32> to vector<48x1xf32>
    %166 = vector.extract_strided_slice %138 {offsets = [0, 1], sizes = [1, 1], strides = [1, 1]} : vector<1x2xf32> to vector<1x1xf32>
    %167 = vector.broadcast %166 : vector<1x1xf32> to vector<48x1xf32>
    %168 = arith.addf %165, %167 : vector<48x1xf32>
    %169 = arith.negf %168 : vector<48x1xf32>
    %170 = math.exp %169 : vector<48x1xf32>
    %cst_55 = arith.constant 1.000000e+00 : f32
    %171 = vector.broadcast %cst_55 : f32 to vector<48x1xf32>
    %172 = arith.addf %171, %170 : vector<48x1xf32>
    %173 = arith.divf %171, %172 : vector<48x1xf32>
    %174 = vector.extract_strided_slice %139 {offsets = [1, 0], sizes = [1, 8], strides = [1, 1]} : vector<2x8xf32> to vector<1x8xf32>
    %175 = vector.broadcast %173 : vector<48x1xf32> to vector<48x8xf32>
    %176 = vector.broadcast %174 : vector<1x8xf32> to vector<48x8xf32>
    %177 = arith.mulf %175, %176 : vector<48x8xf32>
    %178 = arith.addf %160, %177 : vector<48x8xf32>
    %179 = vector.shape_cast %178 : vector<48x8xf32> to vector<3x16x8xf32>
    %180 = arith.mulf %1, %179 : vector<3x16x8xf32>
    %181 = math.tanh %180 : vector<3x16x8xf32>
    %182 = arith.truncf %181 : vector<3x16x8xf32> to vector<3x16x8xbf16>
    "tpu.trace_start"() <{level = 10 : i32, message = "bnd,bmd->bnm"}> : () -> ()
    %cst_56 = arith.constant dense<0.000000e+00> : vector<3x16x16xf32>
    %183 = tpu.matmul %182, %182, %cst_56 {dimension_numbers = #tpu.dot_dimension_numbers<[2], [2], [1], [1], [0, 0, 0, 1, 1, 1], [0], [0]>} : vector<3x16x8xbf16>, vector<3x16x8xbf16>, vector<3x16x16xf32> -> vector<3x16x16xf32>
    "tpu.trace_stop"() : () -> ()
    %cst_57 = arith.constant 0.000000e+00 : f32
    %184 = vector.broadcast %cst_57 : f32 to vector<3x16x16xf32>
    %185 = arith.maximumf %183, %184 : vector<3x16x16xf32>
    %cst_58 = arith.constant dense<0.000000e+00> : vector<3x16xf32>
    %186 = vector.multi_reduction <add>, %185, %cst_58 [2] : vector<3x16x16xf32> to vector<3x16xf32>
    %187 = vector.shape_cast %186 : vector<3x16xf32> to vector<3x16x1xf32>
    %cst_59 = arith.constant 1.000000e+00 : f32
    %188 = vector.broadcast %cst_59 : f32 to vector<3x16x1xf32>
    %189 = arith.addf %187, %188 : vector<3x16x1xf32>
    %190 = math.rsqrt %189 : vector<3x16x1xf32>
    %191 = arith.truncf %185 : vector<3x16x16xf32> to vector<3x16x16xbf16>
    %192 = vector.broadcast %190 : vector<3x16x1xf32> to vector<3x16x128xf32>
    %193 = arith.mulf %124, %192 : vector<3x16x128xf32>
    %194 = arith.truncf %193 : vector<3x16x128xf32> to vector<3x16x128xbf16>
    "tpu.trace_start"() <{level = 10 : i32, message = "bnm,bmc->bnc"}> : () -> ()
    %cst_60 = arith.constant dense<0.000000e+00> : vector<3x16x128xf32>
    %195 = tpu.matmul %191, %194, %cst_60 {dimension_numbers = #tpu.dot_dimension_numbers<[2], [1], [1], [2], [0, 0, 0, 1, 1, 2], [0], [0]>} : vector<3x16x16xbf16>, vector<3x16x128xbf16>, vector<3x16x128xf32> -> vector<3x16x128xf32>
    "tpu.trace_stop"() : () -> ()
    %196 = vector.broadcast %190 : vector<3x16x1xf32> to vector<3x16x128xf32>
    %197 = arith.mulf %196, %195 : vector<3x16x128xf32>
    %198 = arith.mulf %190, %190 : vector<3x16x1xf32>
    %199 = vector.broadcast %198 : vector<3x16x1xf32> to vector<3x16x128xf32>
    %200 = arith.mulf %199, %124 : vector<3x16x128xf32>
    %201 = arith.addf %197, %200 : vector<3x16x128xf32>
    %202 = vector.shape_cast %201 : vector<3x16x128xf32> to vector<48x128xf32>
    %203 = arith.truncf %202 : vector<48x128xf32> to vector<48x128xbf16>
    %c0_61 = arith.constant 0 : index
    %c0_62 = arith.constant 0 : index
    %204 = vector.load %arg19[%c0_61, %c0_62] : memref<128x256xbf16, #tpu.memory_space<vmem>>, vector<128x256xbf16>
    %cst_63 = arith.constant dense<0.000000e+00> : vector<48x256xf32>
    %205 = tpu.matmul %126, %204, %cst_63 {dimension_numbers = #tpu.dot_dimension_numbers<[1], [0], [0], [1], [0, 0, 1, 1], [], []>} : vector<48x128xbf16>, vector<128x256xbf16>, vector<48x256xf32> -> vector<48x256xf32>
    %c0_64 = arith.constant 0 : index
    %c0_65 = arith.constant 0 : index
    %206 = vector.load %arg20[%c0_64, %c0_65] : memref<128x256xbf16, #tpu.memory_space<vmem>>, vector<128x256xbf16>
    %cst_66 = arith.constant dense<0.000000e+00> : vector<48x256xf32>
    %207 = tpu.matmul %203, %206, %cst_66 {dimension_numbers = #tpu.dot_dimension_numbers<[1], [0], [0], [1], [0, 0, 1, 1], [], []>} : vector<48x128xbf16>, vector<128x256xbf16>, vector<48x256xf32> -> vector<48x256xf32>
    %208 = arith.addf %205, %207 : vector<48x256xf32>
    %c0_67 = arith.constant 0 : index
    %c0_68 = arith.constant 0 : index
    %209 = vector.load %arg22[%c0_67, %c0_68] : memref<16x256xf32, #tpu.memory_space<vmem>>, vector<16x256xf32>
    %210 = vector.shape_cast %209 : vector<16x256xf32> to vector<1x16x256xf32>
    %211 = vector.shape_cast %210 : vector<1x16x256xf32> to vector<1x16x256xf32>
    %212 = vector.broadcast %211 : vector<1x16x256xf32> to vector<3x16x256xf32>
    %213 = vector.shape_cast %212 : vector<3x16x256xf32> to vector<48x256xf32>
    %214 = arith.mulf %208, %213 : vector<48x256xf32>
    %c0_69 = arith.constant 0 : index
    %c0_70 = arith.constant 0 : index
    %215 = vector.load %arg21[%c0_69, %c0_70] : memref<16x32xf32, #tpu.memory_space<vmem>>, vector<16x32xf32>
    %216 = vector.shape_cast %215 : vector<16x32xf32> to vector<1x16x32xf32>
    %217 = vector.shape_cast %216 : vector<1x16x32xf32> to vector<1x16x32xf32>
    %218 = vector.broadcast %217 : vector<1x16x32xf32> to vector<3x16x32xf32>
    %219 = vector.shape_cast %218 : vector<3x16x32xf32> to vector<48x32xf32>
    %220 = vector.extract_strided_slice %214 {offsets = [0, 0], sizes = [48, 32], strides = [1, 1]} : vector<48x256xf32> to vector<48x32xf32>
    %221 = arith.addf %219, %220 : vector<48x32xf32>
    %222 = vector.extract_strided_slice %214 {offsets = [0, 32], sizes = [48, 32], strides = [1, 1]} : vector<48x256xf32> to vector<48x32xf32>
    %223 = arith.addf %221, %222 : vector<48x32xf32>
    %224 = vector.extract_strided_slice %214 {offsets = [0, 64], sizes = [48, 32], strides = [1, 1]} : vector<48x256xf32> to vector<48x32xf32>
    %225 = arith.addf %223, %224 : vector<48x32xf32>
    %226 = vector.extract_strided_slice %214 {offsets = [0, 96], sizes = [48, 32], strides = [1, 1]} : vector<48x256xf32> to vector<48x32xf32>
    %227 = arith.addf %225, %226 : vector<48x32xf32>
    %228 = vector.extract_strided_slice %214 {offsets = [0, 128], sizes = [48, 32], strides = [1, 1]} : vector<48x256xf32> to vector<48x32xf32>
    %229 = arith.addf %227, %228 : vector<48x32xf32>
    %230 = vector.extract_strided_slice %214 {offsets = [0, 160], sizes = [48, 32], strides = [1, 1]} : vector<48x256xf32> to vector<48x32xf32>
    %231 = arith.addf %229, %230 : vector<48x32xf32>
    %232 = vector.extract_strided_slice %214 {offsets = [0, 192], sizes = [48, 32], strides = [1, 1]} : vector<48x256xf32> to vector<48x32xf32>
    %233 = arith.addf %231, %232 : vector<48x32xf32>
    %234 = vector.extract_strided_slice %214 {offsets = [0, 224], sizes = [48, 32], strides = [1, 1]} : vector<48x256xf32> to vector<48x32xf32>
    %235 = arith.addf %233, %234 : vector<48x32xf32>
    %236 = math.tanh %235 : vector<48x32xf32>
    %237 = vector.extract_strided_slice %118 {offsets = [0, 32], sizes = [48, 32], strides = [1, 1]} : vector<48x64xf32> to vector<48x32xf32>
    %238 = vector.extract_strided_slice %2 {offsets = [0, 0], sizes = [48, 32], strides = [1, 1]} : vector<48x128xf32> to vector<48x32xf32>
    %239 = arith.mulf %237, %238 : vector<48x32xf32>
    %cst_71 = arith.constant 1.000000e+00 : f32
    %240 = vector.broadcast %cst_71 : f32 to vector<48x32xf32>
    %241 = arith.subf %240, %237 : vector<48x32xf32>
    %242 = arith.mulf %241, %236 : vector<48x32xf32>
    %243 = arith.addf %239, %242 : vector<48x32xf32>
    %cst_72 = arith.constant 0.000000e+00 : f32
    %244 = vector.broadcast %cst_72 : f32 to vector<48x96xf32>
    %245 = tpu.concatenate %243, %244 in 1 : vector<48x32xf32>, vector<48x96xf32> -> vector<48x128xf32>
    %246 = vector.shape_cast %245 : vector<48x128xf32> to vector<3x16x128xf32>
    %c0_73 = arith.constant 0 : index
    %c0_74 = arith.constant 0 : index
    %c0_75 = arith.constant 0 : index
    %247 = vector.load %arg23[%c0_73, %c0_74, %c0_75] : memref<3x16x128xf32, #tpu.memory_space<vmem>>, vector<3x16x128xf32>
    tpu.vector_store %arg23[%c0_73, %c0_74, %c0_75], %246 {strides = array<i32>} : memref<3x16x128xf32, #tpu.memory_space<vmem>>, vector<3x16x128xf32>,
    return
  }
  func.func @transform_0(%arg0: i32) -> (i32, i32, i32) {
    %c0_i32 = arith.constant 0 : i32
    %c0_i32_0 = arith.constant 0 : i32
    %c0_i32_1 = arith.constant 0 : i32
    return %arg0, %c0_i32, %c0_i32_0 : i32, i32, i32
  }
  func.func @transform_1(%arg0: i32) -> (i32, i32, i32) {
    %c0_i32 = arith.constant 0 : i32
    %c0_i32_0 = arith.constant 0 : i32
    %c0_i32_1 = arith.constant 0 : i32
    return %arg0, %c0_i32, %c0_i32_0 : i32, i32, i32
  }
  func.func @transform_2(%arg0: i32) -> (i32, i32) {
    %c0_i32 = arith.constant 0 : i32
    %c0_i32_0 = arith.constant 0 : i32
    %c0_i32_1 = arith.constant 0 : i32
    return %c0_i32, %c0_i32_0 : i32, i32
  }
  func.func @transform_3(%arg0: i32) -> (i32, i32) {
    %c0_i32 = arith.constant 0 : i32
    %c0_i32_0 = arith.constant 0 : i32
    %c0_i32_1 = arith.constant 0 : i32
    return %c0_i32, %c0_i32_0 : i32, i32
  }
  func.func @transform_4(%arg0: i32) -> (i32, i32) {
    %c0_i32 = arith.constant 0 : i32
    %c0_i32_0 = arith.constant 0 : i32
    %c0_i32_1 = arith.constant 0 : i32
    return %c0_i32, %c0_i32_0 : i32, i32
  }
  func.func @transform_5(%arg0: i32) -> (i32, i32) {
    %c0_i32 = arith.constant 0 : i32
    %c0_i32_0 = arith.constant 0 : i32
    %c0_i32_1 = arith.constant 0 : i32
    return %c0_i32, %c0_i32_0 : i32, i32
  }
  func.func @transform_6(%arg0: i32) -> (i32, i32) {
    %c0_i32 = arith.constant 0 : i32
    %c0_i32_0 = arith.constant 0 : i32
    %c0_i32_1 = arith.constant 0 : i32
    return %c0_i32, %c0_i32_0 : i32, i32
  }
  func.func @transform_7(%arg0: i32) -> (i32, i32) {
    %c0_i32 = arith.constant 0 : i32
    %c0_i32_0 = arith.constant 0 : i32
    %c0_i32_1 = arith.constant 0 : i32
    return %c0_i32, %c0_i32_0 : i32, i32
  }
  func.func @transform_8(%arg0: i32) -> (i32, i32) {
    %c0_i32 = arith.constant 0 : i32
    %c0_i32_0 = arith.constant 0 : i32
    %c0_i32_1 = arith.constant 0 : i32
    return %c0_i32, %c0_i32_0 : i32, i32
  }
  func.func @transform_9(%arg0: i32) -> (i32, i32) {
    %c0_i32 = arith.constant 0 : i32
    %c0_i32_0 = arith.constant 0 : i32
    %c0_i32_1 = arith.constant 0 : i32
    return %c0_i32, %c0_i32_0 : i32, i32
  }
  func.func @transform_10(%arg0: i32) -> (i32, i32) {
    %c0_i32 = arith.constant 0 : i32
    %c0_i32_0 = arith.constant 0 : i32
    %c0_i32_1 = arith.constant 0 : i32
    return %c0_i32, %c0_i32_0 : i32, i32
  }
  func.func @transform_11(%arg0: i32) -> (i32, i32) {
    %c0_i32 = arith.constant 0 : i32
    %c0_i32_0 = arith.constant 0 : i32
    %c0_i32_1 = arith.constant 0 : i32
    return %c0_i32, %c0_i32_0 : i32, i32
  }
  func.func @transform_12(%arg0: i32) -> (i32, i32) {
    %c0_i32 = arith.constant 0 : i32
    %c0_i32_0 = arith.constant 0 : i32
    %c0_i32_1 = arith.constant 0 : i32
    return %c0_i32, %c0_i32_0 : i32, i32
  }
  func.func @transform_13(%arg0: i32) -> (i32, i32) {
    %c0_i32 = arith.constant 0 : i32
    %c0_i32_0 = arith.constant 0 : i32
    %c0_i32_1 = arith.constant 0 : i32
    return %c0_i32, %c0_i32_0 : i32, i32
  }
  func.func @transform_14(%arg0: i32) -> (i32, i32) {
    %c0_i32 = arith.constant 0 : i32
    %c0_i32_0 = arith.constant 0 : i32
    %c0_i32_1 = arith.constant 0 : i32
    return %c0_i32, %c0_i32_0 : i32, i32
  }
  func.func @transform_15(%arg0: i32) -> (i32, i32) {
    %c0_i32 = arith.constant 0 : i32
    %c0_i32_0 = arith.constant 0 : i32
    %c0_i32_1 = arith.constant 0 : i32
    return %c0_i32, %c0_i32_0 : i32, i32
  }
  func.func @transform_16(%arg0: i32) -> (i32, i32) {
    %c0_i32 = arith.constant 0 : i32
    %c0_i32_0 = arith.constant 0 : i32
    %c0_i32_1 = arith.constant 0 : i32
    return %c0_i32, %c0_i32_0 : i32, i32
  }
  func.func @transform_17(%arg0: i32) -> (i32, i32) {
    %c0_i32 = arith.constant 0 : i32
    %c0_i32_0 = arith.constant 0 : i32
    %c0_i32_1 = arith.constant 0 : i32
    return %c0_i32, %c0_i32_0 : i32, i32
  }
  func.func @transform_18(%arg0: i32) -> (i32, i32) {
    %c0_i32 = arith.constant 0 : i32
    %c0_i32_0 = arith.constant 0 : i32
    %c0_i32_1 = arith.constant 0 : i32
    return %c0_i32, %c0_i32_0 : i32, i32
  }
  func.func @transform_19(%arg0: i32) -> (i32, i32) {
    %c0_i32 = arith.constant 0 : i32
    %c0_i32_0 = arith.constant 0 : i32
    %c0_i32_1 = arith.constant 0 : i32
    return %c0_i32, %c0_i32_0 : i32, i32
  }
  func.func @transform_20(%arg0: i32) -> (i32, i32) {
    %c0_i32 = arith.constant 0 : i32
    %c0_i32_0 = arith.constant 0 : i32
    %c0_i32_1 = arith.constant 0 : i32
    return %c0_i32, %c0_i32_0 : i32, i32
  }
  func.func @transform_21(%arg0: i32) -> (i32, i32) {
    %c0_i32 = arith.constant 0 : i32
    %c0_i32_0 = arith.constant 0 : i32
    %c0_i32_1 = arith.constant 0 : i32
    return %c0_i32, %c0_i32_0 : i32, i32
  }
  func.func @transform_22(%arg0: i32) -> (i32, i32, i32) {
    %c0_i32 = arith.constant 0 : i32
    %c0_i32_0 = arith.constant 0 : i32
    %c0_i32_1 = arith.constant 0 : i32
    return %arg0, %c0_i32, %c0_i32_0 : i32, i32, i32
  }
}

</mosaic_0001>

<bundles_post_ra>
// kernel: tpu_custom_call.1
= control target key start
LH: loop header
LB: loop body
LE: loop exit
PB: predicated region body
PF: predicated region fallthrough
CT: control target
= control target key end

     0   :  { %s7472_s0 = inlined_call_operand.hbm [shape: f32[6,16,128], index: 0, kind: input, shape index: {}]   ;;  %s7473_s1 = inlined_call_operand.vmem [shape: f32[6,16,8], index: 1, kind: input, shape index: {}]   ;;  %s7474_s2 = inlined_call_operand.vmem [shape: bf16[128,16], index: 2, kind: input, shape index: {}]   ;;  %s7475_s3 = inlined_call_operand.hbm [shape: f32[1,16], index: 3, kind: input, shape index: {}]   ;;  %s7476_s4 = inlined_call_operand.hbm [shape: f32[2,16], index: 4, kind: input, shape index: {}]   ;;  %s7477_s5 = inlined_call_operand.hbm [shape: f32[1,2], index: 5, kind: input, shape index: {}]   ;;  %s7478_s6 = inlined_call_operand.hbm [shape: f32[2,8], index: 6, kind: input, shape index: {}]   ;;  %s7479_s7 = inlined_call_operand.hbm [shape: f32[1,8], index: 7, kind: input, shape index: {}]   ;;  %s7480_s8 = inlined_call_operand.vmem [shape: bf16[128,512], index: 8, kind: input, shape index: {}]   ;;  %s7481_s9 = inlined_call_operand.hbm [shape: bf16[128,512], index: 9, kind: input, shape index: {}]   ;;  %s7482_s10 = inlined_call_operand.hbm [shape: f32[16,64], index: 10, kind: input, shape index: {}]   ;;  %s7483_s11 = inlined_call_operand.vmem [shape: f32[16,512], index: 11, kind: input, shape index: {}]   ;;  %s7484_s12 = inlined_call_operand.vmem [shape: bf16[128,16], index: 12, kind: input, shape index: {}]   ;;  %s7485_s13 = inlined_call_operand.hbm [shape: f32[1,16], index: 13, kind: input, shape index: {}]   ;;  %s7486_s14 = inlined_call_operand.hbm [shape: f32[2,16], index: 14, kind: input, shape index: {}]   ;;  %s7487_s15 = inlined_call_operand.hbm [shape: f32[1,2], index: 15, kind: input, shape index: {}]   ;;  %s7488_s16 = inlined_call_operand.hbm [shape: f32[2,8], index: 16, kind: input, shape index: {}]   ;;  %s7489_s17 = inlined_call_operand.hbm [shape: f32[1,8], index: 17, kind: input, shape index: {}]   ;;  %s7490_s18 = inlined_call_operand.hbm [shape: bf16[128,256], index: 18, kind: input, shape index: {}]   ;;  %s7491_s19 = inlined_call_operand.hbm [shape: bf16[128,256], index: 19, kind: input, shape index: {}]   ;;  %s7492_s20 = inlined_call_operand.hbm [shape: f32[16,32], index: 20, kind: input, shape index: {}]   ;;  %s7493_s21 = inlined_call_operand.vmem [shape: f32[16,256], index: 21, kind: input, shape index: {}]   ;;  %s7494_s22 = inlined_call_operand.hbm [shape: f32[6,16,128], index: 22, kind: output, shape index: {}]  }
   0x1   :  { %7522 = sst [smem:[#allocation42_spill]] %s7472_s0 }
   0x2   :  { %7523 = sst [smem:[#allocation43_spill]] %s7473_s1 }
   0x3   :  { %7524 = sst [smem:[#allocation44_spill]] %s7474_s2 }
   0x4   :  { %7525 = sst [smem:[#allocation45_spill]] %s7475_s3 }
   0x5   :  { %7526 = sst [smem:[#allocation46_spill]] %s7476_s4 }
   0x6   :  { %7527 = sst [smem:[#allocation47_spill]] %s7477_s5 }
   0x7   :  { %7528 = sst [smem:[#allocation48_spill]] %s7478_s6 }
   0x8   :  { %7529 = sst [smem:[#allocation49_spill]] %s7479_s7 }
   0x9   :  { %7530 = sst [smem:[#allocation50_spill]] %s7480_s8 }
   0xa   :  { %7531 = sst [smem:[#allocation51_spill]] %s7481_s9 }
   0xb   :  { %7532 = sst [smem:[#allocation52_spill]] %s7482_s10 }
   0xc   :  { %7533 = sst [smem:[#allocation53_spill]] %s7483_s11 }
   0xd   :  { %7534 = sst [smem:[#allocation54_spill]] %s7484_s12 }
   0xe   :  { %7535 = sst [smem:[#allocation55_spill]] %s7485_s13 }
   0xf   :  { %7536 = sst [smem:[#allocation56_spill]] %s7486_s14 }
  0x10   :  { %7537 = sst [smem:[#allocation57_spill]] %s7487_s15 }
  0x11   :  { %7538 = sst [smem:[#allocation58_spill]] %s7493_s21 }
  0x12   :  { %7539 = sst [smem:[#allocation59_spill]] %s7494_s22 }
  0x13   :  { %27 = vsyncpa [#allocation3], 0 }
  0x14   :  { %29 = vsyncpa [#allocation3 + $0x1], 0 }
  0x15   :  { %30 = vsyncpa [#allocation6], 0 }
  0x16   :  { %31 = vsyncpa [#allocation9], 0 }
  0x17   :  { %32 = vsyncpa [#allocation12], 0 }
  0x18   :  { %33 = vsyncpa [#allocation15], 0 }
  0x19   :  { %34 = vsyncpa [#allocation18], 0 }
  0x1a   :  { %35 = vsyncpa [#allocation21], 0 }
  0x1b   :  { %36 = vsyncpa [#allocation24], 0 }
  0x1c   :  { %37 = vsyncpa [#allocation27], 0 }
  0x1d   :  { %38 = vsyncpa [#allocation4], 0 }
  0x1e   :  { %40 = vsyncpa [#allocation4 + $0x1], 0  ;;  %s5970_s3 = smov 0   ;;  %s5972_s28 = smov 0  }
  0x1f   :  { %s5974_s29 = smov 0   ;;  %s5976_s30 = smov 0  }
  0x20 LB: > { %7540 = sst [smem:[#allocation39_spill]] %s5811_s3  ;;  %s5825_s4 = smov [#allocation5]   ;;  %s5823_s30 = sphi %s5976_s30, %s7602_s30   ;;  %s5819_s29 = sphi %s5974_s29, %s7601_s29   ;;  %s5815_s28 = sphi %s5972_s28, %s7600_s28   ;;  %s5811_s3 = sphi %s5970_s3, %s7599_s3  }
  0x21   : > { %s565_s0 = sshll.u32 %s5825_s4, 4  ;;  %s5991_s23 = sadd.s32 4294967295, %s5823_s30   ;;  %s5996_s0 = int_to_ptr.vmem [resolvable:$true] %s565_s0 }
  0x22   : > { %7541 = sst [smem:[#allocation40_spill]] %s5991_s23  ;;  %p4206_p0 = scmp.ge.s32.totalorder %s5823_s30, 1 }
  0x23   : > { %p7510_p1 = scmp.eq.s32.totalorder %s5991_s23, 0  ;;  %p549_p2 = scmp.lt.s32.totalorder %s5823_s30, 3 }
  0x24   : > { %s5826_s5 = smov [#allocation8]   ;;  %s5827_s6 = smov [#allocation11]  }
  0x25   : > { %p5998_p3 = pnand %p4206_p0, %p549_p2  ;;  %s587_s24 = sshll.u32 %s5826_s5, 4  ;;  %s6005_s24 = int_to_ptr.vmem [resolvable:$true] %s587_s24 }
  0x26   : > { %s609_s25 = sshll.u32 %s5827_s6, 4  ;;  %s5828_s2 = smov [#allocation14]   ;;  %s6013_s25 = int_to_ptr.vmem [resolvable:$true] %s609_s25 }
  0x27   : > { %s7542_s1 = scalar_select %p5998_p3, 1, 0 }
  0x28   : > { %p4702_p5 = pneg %p5998_p3  ;;  %s6015_s27 = sshll.u32 %s5828_s2, 4  ;;  %s636_s27 = int_to_ptr.vmem [resolvable:$true] %s6015_s27 }
  0x29   : > { %7543 = sst [smem:[#allocation41_spill]] %s7542_s1  ;;  %s7545_s21 = sld [smem:[#allocation45_spill]] }
  0x2a   : > { %p6009_p6 = pnand %p4702_p5, %p7510_p1 }
  0x2c   : > { %p6025_p8 = pneg %p6009_p6 }
  0x2f   : > { %s5275_s12 = scalar_lea.hbm %s7545_s21, 16 }
  0x30   : > { %p5276_p7 = scmp.ne.s32.totalorder %s7545_s21, %s5275_s12  ;;  %p5282_p11 = scmp.lt.u32.totalorder %s5275_s12, %s7545_s21 }
  0x32   : > { %p5278_p9 = pnand %p6025_p8, %p5276_p7 }
  0x34   : > { %p5279_p10 = pneg %p5278_p9 }
  0x36   : > { %p5284_p12 = pnand %p5282_p11, %p5279_p10 }
  0x38   : > { %5287 = shalt.err (!%p5284_p12)
}
  0x39   : > { %s5288_s11 = scalar_lea.vmem %s5996_s0, 16  ;;  %s5295_s22 = scalar_lea.vmem %s5996_s0, 32 }
  0x3a   : > { %p5289_p13 = scmp.ne.s32.totalorder %s5996_s0, %s5288_s11  ;;  %p5296_p5 = scmp.lt.s32.totalorder %s5996_s0, %s5996_s0 }
  0x3b   : > { %p5297_p7 = scmp.lt.s32.totalorder %s5295_s22, %s5288_s11 }
  0x3c   : > { %p5291_p0 = pnand %p5289_p13, %p6025_p8 }
  0x3d   : > { %p5298_p9 = por %p5297_p7, %p5296_p5 }
  0x3e   : > { %p5292_p2 = pneg %p5291_p0 }
  0x40   : > { %p5299_p4 = pnand %p5298_p9, %p5292_p2 }
  0x42   : > { %5302 = shalt.err (!%p5299_p4)
}
  0x43   : > { %4705 = dma.hbm_to_vmem [thread:$0]  (!%p6009_p6), %s7545_s21, 16, %s5996_s0, [#allocation6]  }
  0x44   : > { %s7547_s2 = sld [smem:[#allocation47_spill]] }
  0x4a   : > { %s5303_s1 = scalar_lea.hbm %s7547_s2, 16 }
  0x4b   : > { %p5304_p10 = scmp.ne.s32.totalorder %s7547_s2, %s5303_s1  ;;  %p5310_p4 = scmp.lt.u32.totalorder %s5303_s1, %s7547_s2 }
  0x4d   : > { %p5306_p11 = pnand %p5304_p10, %p6025_p8 }
  0x4f   : > { %p5307_p12 = pneg %p5306_p11 }
  0x51   : > { %p5312_p13 = pnand %p5310_p4, %p5307_p12 }
  0x53   : > { %5315 = shalt.err (!%p5312_p13)
}
  0x54   : > { %s5316_s0 = scalar_lea.vmem %s6005_s24, 16  ;;  %s5323_s3 = scalar_lea.vmem %s6005_s24, 32 }
  0x55   : > { %p5317_p0 = scmp.ne.s32.totalorder %s6005_s24, %s5316_s0  ;;  %p5324_p7 = scmp.lt.s32.totalorder %s6005_s24, %s6005_s24 }
  0x56   : > { %p5325_p9 = scmp.lt.s32.totalorder %s5323_s3, %s5316_s0 }
  0x57   : > { %p5319_p2 = pnand %p5317_p0, %p6025_p8 }
  0x58   : > { %p5326_p10 = por %p5325_p9, %p5324_p7 }
  0x59   : > { %p5320_p5 = pneg %p5319_p2 }
  0x5b   : > { %p5327_p11 = pnand %p5326_p10, %p5320_p5 }
  0x5d   : > { %5330 = shalt.err (!%p5327_p11)
}
  0x5e   : > { %4711 = dma.hbm_to_vmem [thread:$0]  (!%p6009_p6), %s7547_s2, 16, %s6005_s24, [#allocation9]  }
  0x5f   : > { %s7548_s7 = sld [smem:[#allocation49_spill]] }
  0x65   : > { %s5331_s4 = scalar_lea.hbm %s7548_s7, 16 }
  0x66   : > { %p5332_p12 = scmp.ne.s32.totalorder %s7548_s7, %s5331_s4  ;;  %p5338_p0 = scmp.lt.u32.totalorder %s5331_s4, %s7548_s7 }
  0x68   : > { %p5334_p4 = pnand %p5332_p12, %p6025_p8 }
  0x6a   : > { %p5335_p13 = pneg %p5334_p4 }
  0x6c   : > { %p5340_p2 = pnand %p5338_p0, %p5335_p13 }
  0x6e   : > { %5343 = shalt.err (!%p5340_p2)
}
  0x6f   : > { %s5344_s24 = scalar_lea.vmem %s6013_s25, 16  ;;  %s5351_s3 = scalar_lea.vmem %s6013_s25, 32 }
  0x70   : > { %p5345_p5 = scmp.ne.s32.totalorder %s6013_s25, %s5344_s24  ;;  %p5352_p10 = scmp.lt.s32.totalorder %s6013_s25, %s6013_s25 }
  0x71   : > { %p5353_p11 = scmp.lt.s32.totalorder %s5351_s3, %s5344_s24 }
  0x72   : > { %p5347_p7 = pnand %p5345_p5, %p6025_p8 }
  0x73   : > { %p5354_p12 = por %p5353_p11, %p5352_p10 }
  0x74   : > { %p5348_p9 = pneg %p5347_p7 }
  0x76   : > { %p5355_p4 = pnand %p5354_p12, %p5348_p9 }
  0x78   : > { %5358 = shalt.err (!%p5355_p4)
}
  0x79   : > { %4717 = dma.hbm_to_vmem [thread:$0]  (!%p6009_p6), %s7548_s7, 16, %s6013_s25, [#allocation12]  }
  0x7a   : > { %s7549_s10 = sld [smem:[#allocation52_spill]] }
  0x80   : > { %s5359_s4 = scalar_lea.hbm %s7549_s10, 256 }
  0x81   : > { %p5360_p13 = scmp.ne.s32.totalorder %s7549_s10, %s5359_s4  ;;  %p5366_p5 = scmp.lt.u32.totalorder %s5359_s4, %s7549_s10 }
  0x83   : > { %p5362_p0 = pnand %p5360_p13, %p6025_p8 }
  0x85   : > { %p5363_p2 = pneg %p5362_p0 }
  0x87   : > { %p5368_p7 = pnand %p5366_p5, %p5363_p2 }
  0x89   : > { %5371 = shalt.err (!%p5368_p7)
}
  0x8a   : > { %s5372_s24 = scalar_lea.vmem %s636_s27, 256  ;;  %p5380_p12 = scmp.lt.s32.totalorder %s636_s27, %s636_s27 }
  0x8b   : > { %p5373_p9 = scmp.ne.s32.totalorder %s636_s27, %s5372_s24  ;;  %p5381_p4 = scmp.lt.s32.totalorder %s5372_s24, %s5372_s24 }
  0x8d   : > { %p5375_p10 = pnand %p5373_p9, %p6025_p8  ;;  %p5382_p1 = por %p5381_p4, %p5380_p12 }
  0x8f   : > { %p5376_p11 = pneg %p5375_p10 }
  0x91   : > { %p5383_p3 = pnand %p5382_p1, %p5376_p11 }
  0x93   : > { %5386 = shalt.err (!%p5383_p3)
}
  0x94   : > { %s7513_s25 = smov 128   ;;  %s7515_s3 = smov 8  }
  0x95   : > { %4723 = dma.hbm_to_vmem [thread:$0]  (!%p6009_p6), %s7549_s10, 256, %s636_s27, [#allocation15], %s7513_s25, %s7513_s25, %s7515_s3  }
  0x96   : > { %s5831_s8 = smov [#allocation17]   ;;  %s5832_s4 = smov [#allocation20]  }
  0x97   : > { %s666_s12 = sshll.u32 %s5831_s8, 4  ;;  %s688_s5 = sshll.u32 %s5832_s4, 4  ;;  %s667_s12 = int_to_ptr.vmem [resolvable:$true] %s666_s12  ;;  %s6117_s5 = int_to_ptr.vmem [resolvable:$true] %s688_s5 }
  0x98   : > { %s7550_s14 = sld [smem:[#allocation56_spill]] }
  0x9e   : > { %s5387_s0 = scalar_lea.hbm %s7550_s14, 32 }
  0x9f   : > { %p5388_p1 = scmp.ne.s32.totalorder %s7550_s14, %s5387_s0  ;;  %p5394_p0 = scmp.lt.u32.totalorder %s5387_s0, %s7550_s14 }
  0xa1   : > { %p5390_p3 = pnand %p5388_p1, %p6025_p8 }
  0xa3   : > { %p5391_p13 = pneg %p5390_p3 }
  0xa5   : > { %p5396_p2 = pnand %p5394_p0, %p5391_p13 }
  0xa7   : > { %5399 = shalt.err (!%p5396_p2)
}
  0xa8   : > { %s5400_s1 = scalar_lea.vmem %s667_s12, 32  ;;  %p5408_p10 = scmp.lt.s32.totalorder %s667_s12, %s667_s12 }
  0xa9   : > { %p5401_p5 = scmp.ne.s32.totalorder %s667_s12, %s5400_s1  ;;  %p5409_p11 = scmp.lt.s32.totalorder %s5400_s1, %s5400_s1 }
  0xab   : > { %p5403_p7 = pnand %p5401_p5, %p6025_p8  ;;  %p5410_p12 = por %p5409_p11, %p5408_p10 }
  0xad   : > { %p5404_p9 = pneg %p5403_p7 }
  0xaf   : > { %p5411_p4 = pnand %p5410_p12, %p5404_p9 }
  0xb1   : > { %5414 = shalt.err (!%p5411_p4)
}
  0xb2   : > { %4729 = dma.hbm_to_vmem [thread:$0]  (!%p6009_p6), %s7550_s14, 32, %s667_s12, [#allocation18]  }
  0xb3   : > { %s5415_s22 = scalar_lea.hbm %s7488_s16, 32 }
  0xb4   : > { %p5416_p1 = scmp.ne.s32.totalorder %s7488_s16, %s5415_s22  ;;  %p5422_p0 = scmp.lt.u32.totalorder %s5415_s22, %s7488_s16 }
  0xb6   : > { %p5418_p3 = pnand %p5416_p1, %p6025_p8 }
  0xb8   : > { %p5419_p13 = pneg %p5418_p3 }
  0xba   : > { %p5424_p2 = pnand %p5422_p0, %p5419_p13 }
  0xbc   : > { %5427 = shalt.err (!%p5424_p2)
}
  0xbd   : > { %s5428_s12 = scalar_lea.vmem %s6117_s5, 32  ;;  %p5436_p10 = scmp.lt.s32.totalorder %s6117_s5, %s6117_s5 }
  0xbe   : > { %p5429_p5 = scmp.ne.s32.totalorder %s6117_s5, %s5428_s12  ;;  %p5437_p11 = scmp.lt.s32.totalorder %s5428_s12, %s5428_s12 }
  0xc0   : > { %p5431_p7 = pnand %p5429_p5, %p6025_p8  ;;  %p5438_p12 = por %p5437_p11, %p5436_p10 }
  0xc2   : > { %p5432_p9 = pneg %p5431_p7 }
  0xc4   : > { %p5439_p4 = pnand %p5438_p12, %p5432_p9 }
  0xc6   : > { %5442 = shalt.err (!%p5439_p4)
}
  0xc7   : > { %4735 = dma.hbm_to_vmem [thread:$0]  (!%p6009_p6), %s7488_s16, 32, %s6117_s5, [#allocation21]  }
  0xc8   : > { %s5833_s8 = smov [#allocation23]   ;;  %s5834_s11 = smov [#allocation7]  }
  0xc9   : > { %s709_s4 = sshll.u32 %s5833_s8, 4  ;;  %s576_s22 = sshll.u32 %s5834_s11, 4  ;;  %s710_s4 = int_to_ptr.vmem [resolvable:$true] %s709_s4  ;;  %s6160_s22 = int_to_ptr.vmem [resolvable:$true] %s576_s22 }
  0xca   : > { %s5443_s23 = scalar_lea.hbm %s7490_s18, 2048 }
  0xcb   : > { %p5444_p1 = scmp.ne.s32.totalorder %s7490_s18, %s5443_s23  ;;  %p5450_p0 = scmp.lt.u32.totalorder %s5443_s23, %s7490_s18 }
  0xcd   : > { %p5446_p3 = pnand %p5444_p1, %p6025_p8 }
  0xcf   : > { %p5447_p13 = pneg %p5446_p3 }
  0xd1   : > { %p5452_p2 = pnand %p5450_p0, %p5447_p13 }
  0xd3   : > { %5455 = shalt.err (!%p5452_p2)
}
  0xd4   : > { %s5456_s2 = scalar_lea.vmem %s710_s4, 2048  ;;  %p5464_p10 = scmp.lt.s32.totalorder %s710_s4, %s710_s4 }
  0xd5   : > { %p5457_p5 = scmp.ne.s32.totalorder %s710_s4, %s5456_s2  ;;  %p5465_p11 = scmp.lt.s32.totalorder %s5456_s2, %s5456_s2 }
  0xd7   : > { %p5459_p7 = pnand %p5457_p5, %p6025_p8  ;;  %p5466_p12 = por %p5465_p11, %p5464_p10 }
  0xd9   : > { %p5460_p9 = pneg %p5459_p7 }
  0xdb   : > { %p5467_p4 = pnand %p5466_p12, %p5460_p9 }
  0xdd   : > { %5470 = shalt.err (!%p5467_p4)
}
  0xde   : > { %4741 = dma.hbm_to_vmem [thread:$0]  (!%p6009_p6), %s7490_s18, 2048, %s710_s4, [#allocation24], %s7513_s25, %s7513_s25, %s7515_s3  }
  0xdf   : > { %s7551_s23 = sld [smem:[#allocation46_spill]] }
  0xe5   : > { %s5471_s27 = scalar_lea.hbm %s7551_s23, 32 }
  0xe6   : > { %p5472_p1 = scmp.ne.s32.totalorder %s7551_s23, %s5471_s27  ;;  %p5478_p0 = scmp.lt.u32.totalorder %s5471_s27, %s7551_s23 }
  0xe8   : > { %p5474_p3 = pnand %p5472_p1, %p6025_p8 }
  0xea   : > { %p5475_p13 = pneg %p5474_p3 }
  0xec   : > { %p5480_p2 = pnand %p5478_p0, %p5475_p13 }
  0xee   : > { %5483 = shalt.err (!%p5480_p2)
}
  0xef   : > { %s5484_s4 = scalar_lea.vmem %s6160_s22, 32  ;;  %p5492_p10 = scmp.lt.s32.totalorder %s6160_s22, %s6160_s22 }
  0xf0   : > { %p5485_p5 = scmp.ne.s32.totalorder %s6160_s22, %s5484_s4  ;;  %p5493_p11 = scmp.lt.s32.totalorder %s5484_s4, %s5484_s4 }
  0xf2   : > { %p5487_p7 = pnand %p5485_p5, %p6025_p8  ;;  %p5494_p12 = por %p5493_p11, %p5492_p10 }
  0xf4   : > { %p5488_p9 = pneg %p5487_p7 }
  0xf6   : > { %p5495_p4 = pnand %p5494_p12, %p5488_p9 }
  0xf8   : > { %5498 = shalt.err (!%p5495_p4)
}
  0xf9   : > { %4708 = dma.hbm_to_vmem [thread:$0]  (!%p6009_p6), %s7551_s23, 32, %s6160_s22, [#allocation6]  }
  0xfa   : > { %s5835_s0 = smov [#allocation10]   ;;  %s5836_s27 = smov [#allocation13]  }
  0xfb   : > { %s598_s24 = sshll.u32 %s5835_s0, 4  ;;  %s622_s12 = sshll.u32 %s5836_s27, 4  ;;  %s599_s24 = int_to_ptr.vmem [resolvable:$true] %s598_s24  ;;  %s6206_s12 = int_to_ptr.vmem [resolvable:$true] %s622_s12 }
  0xfc   : > { %s7552_s2 = sld [smem:[#allocation48_spill]] }
 0x102   : > { %s5499_s4 = scalar_lea.hbm %s7552_s2, 32 }
 0x103   : > { %p5500_p1 = scmp.ne.s32.totalorder %s7552_s2, %s5499_s4  ;;  %p5506_p0 = scmp.lt.u32.totalorder %s5499_s4, %s7552_s2 }
 0x105   : > { %p5502_p3 = pnand %p5500_p1, %p6025_p8 }
 0x107   : > { %p5503_p13 = pneg %p5502_p3 }
 0x109   : > { %p5508_p2 = pnand %p5506_p0, %p5503_p13 }
 0x10b   : > { %5511 = shalt.err (!%p5508_p2)
}
 0x10c   : > { %s5512_s11 = scalar_lea.vmem %s599_s24, 32  ;;  %p5520_p10 = scmp.lt.s32.totalorder %s599_s24, %s599_s24 }
 0x10d   : > { %p5513_p5 = scmp.ne.s32.totalorder %s599_s24, %s5512_s11  ;;  %p5521_p11 = scmp.lt.s32.totalorder %s5512_s11, %s5512_s11 }
 0x10f   : > { %p5515_p7 = pnand %p5513_p5, %p6025_p8  ;;  %p5522_p12 = por %p5521_p11, %p5520_p10 }
 0x111   : > { %p5516_p9 = pneg %p5515_p7 }
 0x113   : > { %p5523_p4 = pnand %p5522_p12, %p5516_p9 }
 0x115   : > { %5526 = shalt.err (!%p5523_p4)
}
 0x116   : > { %4714 = dma.hbm_to_vmem [thread:$0]  (!%p6009_p6), %s7552_s2, 32, %s599_s24, [#allocation9]  }
 0x117   : > { %s7553_s9 = sld [smem:[#allocation51_spill]] }
 0x11d   : > { %s5527_s1 = scalar_lea.hbm %s7553_s9, 4096 }
 0x11e   : > { %p5528_p1 = scmp.ne.s32.totalorder %s7553_s9, %s5527_s1  ;;  %p5534_p0 = scmp.lt.u32.totalorder %s5527_s1, %s7553_s9 }
 0x120   : > { %p5530_p3 = pnand %p5528_p1, %p6025_p8 }
 0x122   : > { %p5531_p13 = pneg %p5530_p3 }
 0x124   : > { %p5536_p2 = pnand %p5534_p0, %p5531_p13 }
 0x126   : > { %5539 = shalt.err (!%p5536_p2)
}
 0x127   : > { %s5540_s24 = scalar_lea.vmem %s6206_s12, 4096  ;;  %p5548_p10 = scmp.lt.s32.totalorder %s6206_s12, %s6206_s12 }
 0x128   : > { %p5541_p5 = scmp.ne.s32.totalorder %s6206_s12, %s5540_s24  ;;  %p5549_p11 = scmp.lt.s32.totalorder %s5540_s24, %s5540_s24 }
 0x12a   : > { %p5543_p7 = pnand %p5541_p5, %p6025_p8  ;;  %p5550_p12 = por %p5549_p11, %p5548_p10 }
 0x12c   : > { %p5544_p9 = pneg %p5543_p7 }
 0x12e   : > { %p5551_p4 = pnand %p5550_p12, %p5544_p9 }
 0x130   : > { %5554 = shalt.err (!%p5551_p4)
}
 0x131   : > { %s5837_s11 = smov 256   ;;  %s5838_s25 = smov 16  }
 0x132   : > { %4720 = dma.hbm_to_vmem [thread:$0]  (!%p6009_p6), %s7553_s9, 4096, %s6206_s12, [#allocation12], %s5837_s11, %s5837_s11, %s5838_s25  }
 0x133   : > { %s5839_s27 = smov [#allocation16]   ;;  %s5840_s5 = smov [#allocation19]  }
 0x134   : > { %s655_s1 = sshll.u32 %s5839_s27, 4  ;;  %s677_s4 = sshll.u32 %s5840_s5, 4  ;;  %s656_s1 = int_to_ptr.vmem [resolvable:$true] %s655_s1  ;;  %s6249_s4 = int_to_ptr.vmem [resolvable:$true] %s677_s4 }
 0x135   : > { %s7554_s13 = sld [smem:[#allocation55_spill]] }
 0x13b   : > { %s5555_s24 = scalar_lea.hbm %s7554_s13, 16 }
 0x13c   : > { %p5556_p1 = scmp.ne.s32.totalorder %s7554_s13, %s5555_s24  ;;  %p5562_p0 = scmp.lt.u32.totalorder %s5555_s24, %s7554_s13 }
 0x13e   : > { %p5558_p3 = pnand %p5556_p1, %p6025_p8 }
 0x140   : > { %p5559_p13 = pneg %p5558_p3 }
 0x142   : > { %p5564_p2 = pnand %p5562_p0, %p5559_p13 }
 0x144   : > { %5567 = shalt.err (!%p5564_p2)
}
 0x145   : > { %s5568_s11 = scalar_lea.vmem %s656_s1, 16  ;;  %s5575_s25 = scalar_lea.vmem %s656_s1, 32 }
 0x146   : > { %p5569_p5 = scmp.ne.s32.totalorder %s656_s1, %s5568_s11  ;;  %p5576_p10 = scmp.lt.s32.totalorder %s656_s1, %s656_s1 }
 0x147   : > { %p5577_p11 = scmp.lt.s32.totalorder %s5575_s25, %s5568_s11 }
 0x148   : > { %p5571_p7 = pnand %p5569_p5, %p6025_p8 }
 0x149   : > { %p5578_p12 = por %p5577_p11, %p5576_p10 }
 0x14a   : > { %p5572_p9 = pneg %p5571_p7 }
 0x14c   : > { %p5579_p4 = pnand %p5578_p12, %p5572_p9 }
 0x14e   : > { %5582 = shalt.err (!%p5579_p4)
}
 0x14f   : > { %4726 = dma.hbm_to_vmem [thread:$0]  (!%p6009_p6), %s7554_s13, 16, %s656_s1, [#allocation15]  }
 0x150   : > { %s7555_s15 = sld [smem:[#allocation57_spill]] }
 0x156   : > { %s5583_s5 = scalar_lea.hbm %s7555_s15, 16 }
 0x157   : > { %p5584_p1 = scmp.ne.s32.totalorder %s7555_s15, %s5583_s5  ;;  %p5590_p0 = scmp.lt.u32.totalorder %s5583_s5, %s7555_s15 }
 0x159   : > { %p5586_p3 = pnand %p5584_p1, %p6025_p8 }
 0x15b   : > { %p5587_p13 = pneg %p5586_p3 }
 0x15d   : > { %p5592_p2 = pnand %p5590_p0, %p5587_p13 }
 0x15f   : > { %5595 = shalt.err (!%p5592_p2)
}
 0x160   : > { %s5596_s1 = scalar_lea.vmem %s6249_s4, 16  ;;  %s5603_s12 = scalar_lea.vmem %s6249_s4, 32 }
 0x161   : > { %p5597_p5 = scmp.ne.s32.totalorder %s6249_s4, %s5596_s1  ;;  %p5604_p10 = scmp.lt.s32.totalorder %s6249_s4, %s6249_s4 }
 0x162   : > { %p5605_p11 = scmp.lt.s32.totalorder %s5603_s12, %s5596_s1 }
 0x163   : > { %p5599_p7 = pnand %p5597_p5, %p6025_p8 }
 0x164   : > { %p5606_p12 = por %p5605_p11, %p5604_p10 }
 0x165   : > { %p5600_p9 = pneg %p5599_p7 }
 0x167   : > { %p5607_p4 = pnand %p5606_p12, %p5600_p9 }
 0x169   : > { %5610 = shalt.err (!%p5607_p4)
}
 0x16a   : > { %4732 = dma.hbm_to_vmem [thread:$0]  (!%p6009_p6), %s7555_s15, 16, %s6249_s4, [#allocation18]  }
 0x16b   : > { %s5841_s7 = smov [#allocation22]   ;;  %s5842_s0 = smov [#allocation25]  }
 0x16c   : > { %s699_s2 = sshll.u32 %s5841_s7, 4  ;;  %s722_s27 = sshll.u32 %s5842_s0, 4  ;;  %s700_s2 = int_to_ptr.vmem [resolvable:$true] %s699_s2  ;;  %s6293_s27 = int_to_ptr.vmem [resolvable:$true] %s722_s27 }
 0x16d   : > { %s5611_s22 = scalar_lea.hbm %s7489_s17, 16 }
 0x16e   : > { %p5612_p1 = scmp.ne.s32.totalorder %s7489_s17, %s5611_s22  ;;  %p5618_p0 = scmp.lt.u32.totalorder %s5611_s22, %s7489_s17 }
 0x170   : > { %p5614_p3 = pnand %p5612_p1, %p6025_p8 }
 0x172   : > { %p5615_p13 = pneg %p5614_p3 }
 0x174   : > { %p5620_p2 = pnand %p5618_p0, %p5615_p13 }
 0x176   : > { %5623 = shalt.err (!%p5620_p2)
}
 0x177   : > { %s5624_s12 = scalar_lea.vmem %s700_s2, 16  ;;  %s5631_s11 = scalar_lea.vmem %s700_s2, 32 }
 0x178   : > { %p5625_p5 = scmp.ne.s32.totalorder %s700_s2, %s5624_s12  ;;  %p5632_p10 = scmp.lt.s32.totalorder %s700_s2, %s700_s2 }
 0x179   : > { %p5633_p11 = scmp.lt.s32.totalorder %s5631_s11, %s5624_s12 }
 0x17a   : > { %p5627_p7 = pnand %p5625_p5, %p6025_p8 }
 0x17b   : > { %p5634_p12 = por %p5633_p11, %p5632_p10 }
 0x17c   : > { %p5628_p9 = pneg %p5627_p7 }
 0x17e   : > { %p5635_p4 = pnand %p5634_p12, %p5628_p9 }
 0x180   : > { %5638 = shalt.err (!%p5635_p4)
}
 0x181   : > { %4738 = dma.hbm_to_vmem [thread:$0]  (!%p6009_p6), %s7489_s17, 16, %s700_s2, [#allocation21]  }
 0x182   : > { %s5639_s8 = scalar_lea.hbm %s7491_s19, 2048 }
 0x183   : > { %p5640_p1 = scmp.ne.s32.totalorder %s7491_s19, %s5639_s8  ;;  %p5646_p0 = scmp.lt.u32.totalorder %s5639_s8, %s7491_s19 }
 0x185   : > { %p5642_p3 = pnand %p5640_p1, %p6025_p8 }
 0x187   : > { %p5643_p13 = pneg %p5642_p3 }
 0x189   : > { %p5648_p2 = pnand %p5646_p0, %p5643_p13 }
 0x18b   : > { %5651 = shalt.err (!%p5648_p2)
}
 0x18c   : > { %s5652_s2 = scalar_lea.vmem %s6293_s27, 2048  ;;  %p5660_p10 = scmp.lt.s32.totalorder %s6293_s27, %s6293_s27 }
 0x18d   : > { %p5653_p5 = scmp.ne.s32.totalorder %s6293_s27, %s5652_s2  ;;  %p5661_p11 = scmp.lt.s32.totalorder %s5652_s2, %s5652_s2 }
 0x18f   : > { %p5655_p7 = pnand %p5653_p5, %p6025_p8  ;;  %p5662_p12 = por %p5661_p11, %p5660_p10 }
 0x191   : > { %p5656_p9 = pneg %p5655_p7 }
 0x193   : > { %p5663_p4 = pnand %p5662_p12, %p5656_p9 }
 0x195   : > { %5666 = shalt.err (!%p5663_p4)
}
 0x196   : > { %s7556_s4 = smov 8   ;;  %s7557_s12 = smov 128  }
 0x197   : > { %4744 = dma.hbm_to_vmem [thread:$0]  (!%p6009_p6), %s7491_s19, 2048, %s6293_s27, [#allocation24], %s7557_s12, %s7557_s12, %s7556_s4  }
 0x198   : > { %s5843_s7 = smov [#allocation26]   ;;  %s5667_s22 = scalar_lea.hbm %s7492_s20, 256 }
 0x199   : > { %s735_s0 = sshll.u32 %s5843_s7, 4  ;;  %p5668_p1 = scmp.ne.s32.totalorder %s7492_s20, %s5667_s22  ;;  %s736_s0 = int_to_ptr.vmem [resolvable:$true] %s735_s0 }
 0x19a   : > { %p5674_p0 = scmp.lt.u32.totalorder %s5667_s22, %s7492_s20 }
 0x19b   : > { %p5670_p3 = pnand %p5668_p1, %p6025_p8 }
 0x19d   : > { %p5671_p13 = pneg %p5670_p3 }
 0x19f   : > { %p5676_p2 = pnand %p5674_p0, %p5671_p13 }
 0x1a1   : > { %5679 = shalt.err (!%p5676_p2)
}
 0x1a2   : > { %s5680_s27 = scalar_lea.vmem %s736_s0, 256  ;;  %p5688_p10 = scmp.lt.s32.totalorder %s736_s0, %s736_s0 }
 0x1a3   : > { %p5681_p5 = scmp.ne.s32.totalorder %s736_s0, %s5680_s27  ;;  %p5689_p11 = scmp.lt.s32.totalorder %s5680_s27, %s5680_s27 }
 0x1a5   : > { %p5683_p7 = pnand %p5681_p5, %p6025_p8  ;;  %p5690_p12 = por %p5689_p11, %p5688_p10 }
 0x1a7   : > { %p5684_p9 = pneg %p5683_p7 }
 0x1a9   : > { %p5691_p4 = pnand %p5690_p12, %p5684_p9 }
 0x1ab   : > { %5694 = shalt.err (!%p5691_p4)
}
 0x1ac   : > { %s7558_s6 = sld [smem:[#allocation39_spill]]  ;;  %s7559_s7 = sld [smem:[#allocation40_spill]] }
 0x1ad   : > { %4747 = dma.hbm_to_vmem [thread:$0]  (!%p6009_p6), %s7492_s20, 256, %s736_s0, [#allocation27], %s7557_s12, %s7557_s12, %s7556_s4  }
 0x1ae   : > { %s4205_s26 = sadd.s32 4294967294, %s5823_s30   ;;  %s6362_s5 = sadd.s32 1, %s5823_s30  }
 0x1af   : > { %s53_s8 = sadd.s32 1, %s5819_s29  ;;  %s50_s22 = ssub.s32 %s5823_s30, %s6362_s5 }
 0x1b0   : > { %p60_p8 = scmp.ne.s32.totalorder %s5819_s29, %s5815_s28  ;;  %p51_p1 = scmp.eq.s32.totalorder %s50_s22, 0 }
 0x1b1   : > { %p61_p3 = scmp.eq.s32.totalorder %s5823_s30, 0  ;;  %p542_p9 = scmp.eq.s32.totalorder %s4205_s26, 1 }
 0x1b2   : > { %p66_p13 = scmp.ne.s32.totalorder %s5815_s28, %s7558_s6  ;;  %p536_p0 = scmp.eq.s32.totalorder %s7559_s7, 1 }
 0x1b3   : > { %s6374_s24 = scalar_select %p51_p1, %s5819_s29, %s53_s8  }
 0x1b4   : > { %p62_p2 = por %p61_p3, %p60_p8  ;;  %p7560_p5 = scmp.eq.s32.totalorder %s7559_s7, 0 }
 0x1b5   : > { %p6382_p6 = por %p536_p0, %p60_p8  ;;  %p4771_p10 = scmp.lt.s32.totalorder %s5823_s30, 2 }
 0x1b6   : > { %p6378_p7 = por %p7560_p5, %p66_p13  ;;  %s752_s1 = sand.u32 1, %s5819_s29  }
 0x1b7   : > { %s7562_s0 = scalar_select %p6382_p6, 1, 0 }
 0x1b8   : > { %p6388_p11 = por %p542_p9, %p66_p13  ;;  %s4636_s27 = smul.u32 48, %s752_s1 }
 0x1b9   : > { %p6392_p12 = pnand %p4771_p10, %p62_p2  ;;  %s4424_s25 = smul.u32 768, %s5823_s30 }
 0x1ba   : > { %s7563_s2 = scalar_select %p6388_p11, 1, 0 }
 0x1bb   : > { %s7565_s8 = sld [smem:[#allocation42_spill]]  ;;  %s756_s26 = scalar_lea.vmem [#allocation2], %s4636_s27 }
 0x1bc   : > { %s764_s9 = sshll.u32 %s756_s26, 4  ;;  %s6404_s10 = scalar_lea.sflag [#allocation3], %s752_s1  ;;  %s6402_s9 = int_to_ptr.vmem [resolvable:$true] %s764_s9 }
 0x1bd   : > { %p5697_p8 = pneg %p6392_p12 }
 0x1c1   : > { %s6400_s22 = scalar_lea.hbm %s7565_s8, %s4424_s25  ;;  %s5700_s7 = scalar_lea.hbm %s7565_s8, 1536 }
 0x1c2   : > { %s5695_s13 = scalar_lea.hbm %s6400_s22, 768  ;;  %p5701_p13 = scmp.lt.u32.totalorder %s6400_s22, %s7565_s8 }
 0x1c3   : > { %p5696_p4 = scmp.ne.s32.totalorder %s6400_s22, %s5695_s13  ;;  %p5702_p0 = scmp.lt.u32.totalorder %s5700_s7, %s5695_s13 }
 0x1c4   : > { %p5704_p5 = scmp.lt.u32.totalorder %s5695_s13, %s6400_s22 }
 0x1c5   : > { %p5698_p1 = pnand %p5697_p8, %p5696_p4  ;;  %p5703_p2 = por %p5702_p0, %p5701_p13 }
 0x1c7   : > { %p5699_p3 = pneg %p5698_p1  ;;  %p5705_p9 = por %p5704_p5, %p5703_p2 }
 0x1c9   : > { %p5706_p10 = pnand %p5705_p9, %p5699_p3 }
 0x1cb   : > { %5709 = shalt.err (!%p5706_p10)
}
 0x1cc   : > { %s5710_s1 = scalar_lea.vmem %s6402_s9, 768  ;;  %s5844_s27 = smov [#allocation2]  }
 0x1cd   : > { %p5711_p4 = scmp.ne.s32.totalorder %s6402_s9, %s5710_s1  ;;  %s5715_s26 = sshll.u32 %s5844_s27, 4  ;;  %s5716_s26 = int_to_ptr.vmem [resolvable:$false] %s5715_s26 }
 0x1ce   : > { %s5717_s14 = scalar_lea.vmem %s5716_s26, 1536  ;;  %p5718_p6 = scmp.lt.s32.totalorder %s6402_s9, %s5716_s26 }
 0x1cf   : > { %p5713_p1 = pnand %p5711_p4, %p5697_p8  ;;  %p5719_p13 = scmp.lt.s32.totalorder %s5717_s14, %s5710_s1 }
 0x1d1   : > { %p5714_p11 = pneg %p5713_p1  ;;  %p5720_p0 = por %p5719_p13, %p5718_p6 }
 0x1d3   : > { %p5721_p2 = pnand %p5720_p0, %p5714_p11 }
 0x1d5   : > { %5724 = shalt.err (!%p5721_p2)
}
 0x1d6   : > { %4751 = dma.hbm_to_vmem [thread:$0]  (!%p6392_p12), %s6400_s22, 768, %s6402_s9, %s6404_s10, %s7557_s12, %s7557_s12, %s7556_s4  }
 0x1d7   : > { %s7566_s13 = sld [smem:[#allocation41_spill]] }
 0x1dd   : > { %p7567_p8 = scmp.ne.s32.totalorder %s7566_s13, 0 }
 0x1de   : > { %s6438_s15 = sand.u32 (!%p7567_p8), 1, %s5815_s28  }
 0x1df   : > { %786 = sbr.rel (%p7567_p8) target bundleno = 4037 (0xfc5), region = 108  ;;  %s789_s6 = scalar_lea.sflag (!%p7567_p8), [#allocation3], %s6438_s15 }
 0x1e0   : > { %s7519_s25 = smul.u32 (!%p7567_p8), 48, %s6438_s15 }
 0x1e2   : > { %s6444_s11 = scalar_lea.vmem (!%p7567_p8), [#allocation2], %s7519_s25 }
 0x1e6   : > { %5770 = dma.done.wait (%p6378_p7), %s789_s6, 768  }
 0x1e7   : > { %5772 = vsyncadd (%p6378_p7), %s789_s6, 4294966528  ;;  %s7568_s9 = sld [smem:[#allocation40_spill]] }
 0x1ed   : > { %p7569_p6 = scmp.eq.s32.totalorder %s7568_s9, 0 }
 0x1ef   : > { %5774 = dma.done.wait (%p7569_p6), [#allocation6], 48   ;;  %p7570_p11 = pmov %p7569_p6 }
 0x1f0   : > { %p7571_p12 = pmov %p7569_p6 }
 0x1f1   : > { %5776 = vsyncadd (%p7570_p11), [#allocation6], 4294967248 }
 0x1f2   : > { %5778 = dma.done.wait (%p7571_p12), [#allocation9], 48   ;;  %p7572_p3 = pmov %p7569_p6 }
 0x1f4   : > { %5780 = vsyncadd (%p7572_p3), [#allocation9], 4294967248  ;;  %p7573_p5 = pmov %p7572_p3 }
 0x1f5   : > { %p7574_p9 = pmov %p7572_p3 }
 0x1f6   : > { %5782 = dma.done.wait (%p7573_p5), [#allocation12], 4112  }
 0x1f7   : > { %5784 = vsyncadd (%p7574_p9), [#allocation12], 4294963184  ;;  %p7575_p7 = pmov %p7572_p3 }
 0x1f8   : > { %p7576_p10 = pmov %p7572_p3 }
 0x1f9   : > { %5786 = dma.done.wait (%p7575_p7), [#allocation15], 272  }
 0x1fa   : > { %5788 = vsyncadd (%p7576_p10), [#allocation15], 4294967024  ;;  %p7577_p4 = pmov %p7572_p3 }
 0x1fb   : > { %p7578_p1 = pmov %p7572_p3 }
 0x1fc   : > { %5790 = dma.done.wait (%p7577_p4), [#allocation18], 48  }
 0x1fd   : > { %5792 = vsyncadd (%p7578_p1), [#allocation18], 4294967248  ;;  %p7579_p13 = pmov %p7578_p1 }
 0x1fe   : > { %p7580_p0 = pmov %p7578_p1 }
 0x1ff   : > { %5794 = dma.done.wait (%p7579_p13), [#allocation21], 48  }
 0x200   : > { %5796 = vsyncadd (%p7580_p0), [#allocation21], 4294967248  ;;  %p7581_p2 = pmov %p7580_p0 }
 0x201   : > { %p7582_p8 = pmov %p7580_p0 }
 0x202   : > { %5798 = dma.done.wait (%p7581_p2), [#allocation24], 4096  }
 0x203   : > { %5800 = vsyncadd (%p7582_p8), [#allocation24], 4294963200  ;;  %p7583_p6 = pmov %p7580_p0 }
 0x204   : > { %p7584_p11 = pmov %p7580_p0 }
 0x205   : > { %5802 = dma.done.wait (%p7583_p6), [#allocation27], 256  }
 0x206   : > { %5804 = vsyncadd (%p7584_p11), [#allocation27], 4294967040  ;;  %v5845_v0 = vmov 0.0   ;;  %vm5846_vm0 = vmmov 0   ;;  %s7585_s12 = sld [smem:[#allocation44_spill]]  ;;  %v6516_v9 = vld [vmem:[%s6444_s11] sm:$0xff]  ;;  %v1118_v35 = vlaneseq }
 0x207   : > { %4472 = vmatprep.subr.bf16.mxu1 %v5845_v0  ;;  %4488 = vmatprep.mubr.msk.bf16.mxu1 %vm5846_vm0, %v5845_v0  ;;  %v6519_v10 = vld [vmem:[%s6444_s11 + $0x8] sm:$0xff]  ;;  %v6528_v12 = vld [vmem:[%s6444_s11 + $0x10] sm:$0xff]  ;;  %v6531_v13 = vld [vmem:[%s6444_s11 + $0x18] sm:$0xff]  ;;  %vm1128_vm1 = vcmask 130048   ;;  %s920_s1 = smul.u32 3, %s7568_s9  ;;  %s7586_s13 = sld [smem:[#allocation43_spill]] }
 0x208   : > { %v6524_v11 = vpack.c.bf16 %v6519_v10, %v6516_v9  ;;  %v6538_v14 = vpack.c.bf16 %v6531_v13, %v6528_v12  ;;  %v6541_v15 = vld [vmem:[%s6444_s11 + $0x20] sm:$0xff]  ;;  %v6544_v16 = vld [vmem:[%s6444_s11 + $0x28] sm:$0xff]  ;;  %v1119_v42 = vshrl.u32 %v1118_v35, 7  ;;  %vm1372_vm2 = vcmask 64512   ;;  %s7587_s3 = sld [smem:[#allocation50_spill]]  ;;  %s5849_s26 = smov 64  }
 0x209   : > { %v6551_v17 = vpack.c.bf16 %v6544_v16, %v6541_v15  ;;  %v4243_v18 = vld [vmem:[#allocation5] ss:$0 sm:$0xff]  ;;  %v1108_v51 = vld [vmem:[#allocation7] sm:$0x3]  ;;  %p921_p12 = scmp.lt.s32.totalorder %s920_s1, 5  ;;  %s7590_s25 = sld [smem:[#allocation54_spill]] }
 0x20a   : > { %v6556_v49 = vsub.s32 1, %v1119_v42  ;;  %v6558_v50 = vsub.s32 0, %v1119_v42  ;;  %vm2568_vm3 = vcmask 261120   ;;  %s5850_s14 = smov 96   ;;  %s5851_s4 = smov 32  }
 0x20b   : > { %s7604_s1 = smov (!%p921_p12, %s920_s1), 5  ;;  %p7595_p5 = scmp.ne.s32.totalorder %s7562_s0, 0 }
 0x20c   : > { %v4869_v1 = vld [vmem:[%s7585_s12] sm:$0xff]   ;;  %v4870_v2 = vld [vmem:[%s7585_s12 + $0x8] sm:$0xff]   ;;  %v4871_v3 = vld [vmem:[%s7585_s12 + $0x10] sm:$0xff]   ;;  %v1244_v55 = vrot.slane %v1108_v51, %v6556_v49  ;;  %v1121_v56 = vrot.slane %v1108_v51, %v6558_v50  ;;  %s4421_s27 = sshll.u32 %s7604_s1, 4  ;;  %s3963_s1 = scalar_lea.sflag [#allocation4], %s6438_s15 }
 0x20d   : > { %4473 = vmatpush3.bf16.msra.mxu1 %v4869_v1  ;;  %v4872_v4 = vld [vmem:[%s7585_s12 + $0x18] sm:$0xff]   ;;  %v4873_v5 = vld [vmem:[%s7585_s12 + $0x20] sm:$0xff]   ;;  %v4874_v6 = vld [vmem:[%s7585_s12 + $0x28] sm:$0xff]   ;;  %s6608_s6 = scalar_lea.vmem %s7586_s13, %s4421_s27  ;;  %s7589_s13 = sld [smem:[#allocation53_spill]] }
 0x20e   : > { %4474 = vmatprep.subr.bf16.mxu1 %v5845_v0  ;;  %v4875_v7 = vld [vmem:[%s7585_s12 + $0x30] sm:$0xff]   ;;  %v4876_v8 = vld [vmem:[%s7585_s12 + $0x38] sm:$0xff]   ;;  %s7588_s22 = smov %s7587_s3 }
 0x211   : > { %4475 = vmatpush3.bf16.msra.mxu1 %v4870_v2 }
 0x212   : > { %4476 = vmatprep.subr.bf16.mxu1 %v5845_v0 }
 0x215   : > { %4477 = vmatpush3.bf16.msra.mxu1 %v4871_v3 }
 0x216   : > { %4478 = vmatprep.subr.bf16.mxu1 %v5845_v0 }
 0x219   : > { %4479 = vmatpush3.bf16.msra.mxu1 %v4872_v4 }
 0x21a   : > { %4480 = vmatprep.subr.bf16.mxu1 %v5845_v0 }
 0x21d   : > { %4481 = vmatpush3.bf16.msra.mxu1 %v4873_v5 }
 0x21e   : > { %4482 = vmatprep.subr.bf16.mxu1 %v5845_v0 }
 0x221   : > { %4483 = vmatpush3.bf16.msra.mxu1 %v4874_v6 }
 0x222   : > { %4484 = vmatprep.subr.bf16.mxu1 %v5845_v0 }
 0x225   : > { %4485 = vmatpush3.bf16.msra.mxu1 %v4875_v7 }
 0x226   : > { %4486 = vmatprep.subr.bf16.mxu1 %v5845_v0 }
 0x229   : > { %4487 = vmatpush3.bf16.msra.mxu1 %v4876_v8 }
 0x22a   : > { %4500 = vmatprep.subr.bf16.mxu1 %v5845_v0 }
 0x22c   : > { %4489 = vmatmul.mubr.bf16.vlgmr.msra.gmra.mrb[0].mxu1 %v6524_v11 }
 0x22d   : > { %4492 = vmatprep.mubr.msk.bf16.mxu1 %vm5846_vm0, %v5845_v0 }
 0x234   : > { %4493 = vmatmul.mubr.bf16.gmra.mrb[4].mxu1 %v6538_v14 }
 0x235   : > { %4496 = vmatprep.mubr.msk.bf16.mxu1 %vm5846_vm0, %v5845_v0 }
 0x23c   : > { %4497 = vmatmul.mubr.bf16.gmra.mrb[8].mxu1 %v6551_v17 }
 0x23d   : > { %4502 = vmatprep.mubr.msk.bf16.mxu1 %vm5846_vm0, %v5845_v0 }
 0x2ff   : > { %v1049_v19 = vpop.f32.mrb[0].mxu1 }
 0x300   : > { %v1050_v20 = vadd.f32 %v4243_v18, %v1049_v19  ;;  %v4490_v21 = vpop.f32.mrb[1].mxu1 }
 0x301   : > { %v1052_v22 = vpop.f32.mrb[2].mxu1 }
 0x302   : > { %v4252_v23 = vmul.f32 -1.442695, %v1050_v20  ;;  %v1053_v24 = vadd.f32 %v4243_v18, %v1052_v22  ;;  %v4491_v25 = vpop.f32.mrb[3].mxu1 }
 0x304   : > { %5029 = vpow2.f32 %v4252_v23  ;;  %v4253_v26 = vmul.f32 -1.442695, %v1053_v24 }
 0x306   : > { %5031 = vpow2.f32 %v4253_v26 }
 0x307   : > { %v1057_v27 = vpop.f32.mrb[4].mxu1 }
 0x308   : > { %v1058_v28 = vadd.f32 %v4243_v18, %v1057_v27  ;;  %v4494_v29 = vpop.f32.mrb[5].mxu1 }
 0x309   : > { %v1060_v30 = vpop.f32.mrb[6].mxu1 }
 0x30a   : > { %v4254_v31 = vmul.f32 -1.442695, %v1058_v28  ;;  %v1061_v32 = vadd.f32 %v4243_v18, %v1060_v30  ;;  %v4495_v33 = vpop.f32.mrb[7].mxu1 }
 0x30c   : > { %5033 = vpow2.f32 %v4254_v31  ;;  %v4255_v34 = vmul.f32 -1.442695, %v1061_v32 }
 0x30e   : > { %v5030_v36 = vpop.eup %5029  ;;  %5035 = vpow2.f32 %v4255_v34 }
 0x30f   : > { %v1090_v37 = vadd.f32 1.0, %v5030_v36  ;;  %v1065_v38 = vpop.f32.mrb[8].mxu1 }
 0x310   : > { %v5032_v39 = vpop.eup %5031  ;;  %v1066_v40 = vadd.f32 %v4243_v18, %v1065_v38  ;;  %v4498_v41 = vpop.f32.mrb[9].mxu1  ;;  %v5847_v38 = vmov 1  }
 0x311   : > { %5037 = vrcp.f32 %v1090_v37  ;;  %v1091_v43 = vadd.f32 1.0, %v5032_v39  ;;  %v1068_v44 = vpop.f32.mrb[10].mxu1  ;;  %4849 = vset.pattern.permute.xlu1 %v5847_v38  ;;  %v5848_v39 = vmov 0  }
 0x312   : > { %v4256_v45 = vmul.f32 -1.442695, %v1066_v40  ;;  %v1069_v46 = vadd.f32 %v4243_v18, %v1068_v44  ;;  %v4499_v47 = vpop.f32.mrb[11].mxu1  ;;  %4848 = vset.pattern.permute.xlu0 %v5848_v39  ;;  %1968 = vmatprep.mubr.bf16.mxu0 %v5848_v39  ;;  %v6577_v40 = vld [vmem:[#allocation8] ss:$0 sm:$0xff] }
 0x313   : > { %5039 = vrcp.f32 %v1091_v43 }
 0x314   : > { %5041 = vpow2.f32 %v4256_v45  ;;  %v4257_v48 = vmul.f32 -1.442695, %v1069_v46 }
 0x316   : > { %v5034_v52 = vpop.eup %5033  ;;  %5043 = vpow2.f32 %v4257_v48 }
 0x317   : > { %v1092_v53 = vadd.f32 1.0, %v5034_v52 }
 0x318   : > { %v5036_v54 = vpop.eup %5035 }
 0x319   : > { %5045 = vrcp.f32 %v1092_v53  ;;  %v1093_v57 = vadd.f32 1.0, %v5036_v54 }
 0x31b   : > { %v5038_v58 = vpop.eup %5037  ;;  %5047 = vrcp.f32 %v1093_v57 }
 0x31c   : > { %v1245_v59 = vmul.f32 %v5038_v58, %v1244_v55  ;;  %v1122_v60 = vmul.f32 %v5038_v58, %v1121_v56 }
 0x31d   : > { %v5040_v61 = vpop.eup %5039 }
 0x31e   : > { %v5042_v62 = vpop.eup %5041  ;;  %v1251_v63 = vsel %vm1128_vm1, %v1245_v59, 0.0  ;;  %v1129_v1 = vsel %vm1128_vm1, %v1122_v60, 0.0  ;;  %v1246_v2 = vmul.f32 %v5040_v61, %v1244_v55  ;;  %v1123_v3 = vmul.f32 %v5040_v61, %v1121_v56 }
 0x31f   : > { %v1094_v4 = vadd.f32 1.0, %v5042_v62  ;;  %1252 = vadd.xlane.f32.xlu1 %v1251_v63  ;;  %1130 = vadd.xlane.f32.xlu0 %v1129_v1 }
 0x320   : > { %v5044_v5 = vpop.eup %5043  ;;  %v1254_v7 = vsel %vm1128_vm1, %v1246_v2, 0.0  ;;  %v1132_v8 = vsel %vm1128_vm1, %v1123_v3, 0.0 }
 0x321   : > { %5049 = vrcp.f32 %v1094_v4  ;;  %v1095_v6 = vadd.f32 1.0, %v5044_v5 }
 0x323   : > { %v5046_v18 = vpop.eup %5045  ;;  %5051 = vrcp.f32 %v1095_v6  ;;  %1255 = vadd.xlane.f32.xlu1 %v1254_v7  ;;  %1133 = vadd.xlane.f32.xlu0 %v1132_v8 }
 0x324   : > { %v1124_v19 = vmul.f32 %v5046_v18, %v1121_v56  ;;  %v1247_v20 = vmul.f32 %v5046_v18, %v1244_v55 }
 0x325   : > { %v5048_v21 = vpop.eup %5047 }
 0x326   : > { %v1125_v22 = vmul.f32 %v5048_v21, %v1121_v56  ;;  %v1135_v23 = vsel %vm1128_vm1, %v1124_v19, 0.0  ;;  %v1248_v24 = vmul.f32 %v5048_v21, %v1244_v55  ;;  %v1257_v26 = vsel %vm1128_vm1, %v1247_v20, 0.0 }
 0x327   : > { %1136 = vadd.xlane.f32.xlu0 %v1135_v23 }
 0x328   : > { %v1138_v25 = vsel %vm1128_vm1, %v1125_v22, 0.0  ;;  %v1260_v27 = vsel %vm1128_vm1, %v1248_v24, 0.0 }
 0x329   : > { %1139 = vadd.xlane.f32.xlu1 %v1138_v25 }
 0x32b   : > { %v5050_v28 = vpop.eup %5049  ;;  %1258 = vadd.xlane.f32.xlu0 %v1257_v26 }
 0x32c   : > { %v1126_v29 = vmul.f32 %v5050_v28, %v1121_v56  ;;  %v1249_v30 = vmul.f32 %v5050_v28, %v1244_v55 }
 0x32d   : > { %v5052_v31 = vpop.eup %5051  ;;  %1261 = vadd.xlane.f32.xlu1 %v1260_v27 }
 0x32e   : > { %v1127_v32 = vmul.f32 %v5052_v31, %v1121_v56  ;;  %v1250_v33 = vmul.f32 %v5052_v31, %v1244_v55  ;;  %v1141_v34 = vsel %vm1128_vm1, %v1126_v29, 0.0  ;;  %v1263_v36 = vsel %vm1128_vm1, %v1249_v30, 0.0 }
 0x32f   : > { %1142 = vadd.xlane.f32.xlu0 %v1141_v34 }
 0x330   : > { %v1144_v35 = vsel %vm1128_vm1, %v1127_v32, 0.0  ;;  %v1266_v37 = vsel %vm1128_vm1, %v1250_v33, 0.0 }
 0x331   : > { %1145 = vadd.xlane.f32.xlu1 %v1144_v35 }
 0x333   : > { %1264 = vadd.xlane.f32.xlu0 %v1263_v36 }
 0x335   : > { %1267 = vadd.xlane.f32.xlu1 %v1266_v37 }
 0x3ac   : > { %v1253_v41 = vpop.xlane.xlu1 %1252  ;;  %v1131_v42 = vpop.xlane.xlu0 %1130 }
 0x3ad   : > { %v1269_v43 = vadd.f32 %v6577_v40, %v1253_v41  ;;  %v1153_v44 = vadd.f32 %v6577_v40, %v1131_v42 }
 0x3af   : > { %v4266_v45 = vmul.f32 -1.442695, %v1269_v43  ;;  %v4260_v46 = vmul.f32 -1.442695, %v1153_v44 }
 0x3b0   : > { %v1256_v47 = vpop.xlane.xlu1 %1255  ;;  %v1134_v48 = vpop.xlane.xlu0 %1133 }
 0x3b1   : > { %5053 = vpow2.f32 %v4266_v45  ;;  %v1270_v51 = vadd.f32 %v6577_v40, %v1256_v47  ;;  %v1154_v52 = vadd.f32 %v6577_v40, %v1134_v48 }
 0x3b2   : > { %5055 = vpow2.f32 %v4260_v46 }
 0x3b3   : > { %v4267_v53 = vmul.f32 -1.442695, %v1270_v51  ;;  %v4261_v54 = vmul.f32 -1.442695, %v1154_v52 }
 0x3b4   : > { %v1137_v55 = vpop.xlane.xlu0 %1136 }
 0x3b5   : > { %v1155_v56 = vadd.f32 %v6577_v40, %v1137_v55  ;;  %5057 = vpow2.f32 %v4261_v54 }
 0x3b6   : > { %v1140_v57 = vpop.xlane.xlu1 %1139  ;;  %5059 = vpow2.f32 %v4267_v53 }
 0x3b7   : > { %v4262_v58 = vmul.f32 -1.442695, %v1155_v56  ;;  %v1156_v4 = vadd.f32 %v6577_v40, %v1140_v57 }
 0x3b8   : > { %v1259_v59 = vpop.xlane.xlu0 %1258 }
 0x3b9   : > { %v1271_v60 = vadd.f32 %v6577_v40, %v1259_v59  ;;  %5061 = vpow2.f32 %v4262_v58  ;;  %v4263_v20 = vmul.f32 -1.442695, %v1156_v4 }
 0x3ba   : > { %v1262_v61 = vpop.xlane.xlu1 %1261 }
 0x3bb   : > { %v5054_v62 = vpop.eup %5053  ;;  %v4268_v3 = vmul.f32 -1.442695, %v1271_v60  ;;  %v1272_v21 = vadd.f32 %v6577_v40, %v1262_v61 }
 0x3bc   : > { %v5056_v63 = vpop.eup %5055  ;;  %v1293_v1 = vadd.f32 1.0, %v5054_v62  ;;  %v1143_v26 = vpop.xlane.xlu0 %1142 }
 0x3bd   : > { %v1177_v2 = vadd.f32 1.0, %v5056_v63  ;;  %v4269_v28 = vmul.f32 -1.442695, %v1272_v21  ;;  %v1157_v31 = vadd.f32 %v6577_v40, %v1143_v26 }
 0x3be   : > { %5063 = vrcp.f32 %v1293_v1  ;;  %v1146_v5 = vpop.xlane.xlu1 %1145 }
 0x3bf   : > { %5065 = vrcp.f32 %v1177_v2  ;;  %v1158_v6 = vadd.f32 %v6577_v40, %v1146_v5  ;;  %v5058_v7 = vpop.eup %5057  ;;  %v4264_v35 = vmul.f32 -1.442695, %v1157_v31  ;;  %v1110_v2 = vld [vmem:[#allocation10] sm:$0x3]  ;;  %v4258_v5 = vld [vmem:[#allocation11] ss:$0 sm:$0xff] }
 0x3c0   : > { %v5060_v8 = vpop.eup %5059  ;;  %v1178_v18 = vadd.f32 1.0, %v5058_v7  ;;  %5067 = vpow2.f32 %v4268_v3  ;;  %v1265_v33 = vpop.xlane.xlu0 %1264  ;;  %v1228_v3 = vrot.slane %v1110_v2, %v6558_v50 }
 0x3c1   : > { %v4265_v19 = vmul.f32 -1.442695, %v1158_v6  ;;  %v1294_v25 = vadd.f32 1.0, %v5060_v8  ;;  %v1273_v37 = vadd.f32 %v6577_v40, %v1265_v33  ;;  %v1344_v8 = vrot.slane %v1110_v2, %v6556_v49 }
 0x3c2   : > { %v1268_v22 = vpop.xlane.xlu1 %1267  ;;  %5069 = vrcp.f32 %v1178_v18 }
 0x3c3   : > { %v1274_v23 = vadd.f32 %v6577_v40, %v1268_v22  ;;  %v5062_v24 = vpop.eup %5061  ;;  %5071 = vpow2.f32 %v4265_v19  ;;  %v4270_v46 = vmul.f32 -1.442695, %v1273_v37 }
 0x3c4   : > { %5073 = vpow2.f32 %v4263_v20  ;;  %v1179_v29 = vadd.f32 1.0, %v5062_v24 }
 0x3c5   : > { %v4271_v27 = vmul.f32 -1.442695, %v1274_v23  ;;  %v935_v23 = vld [vmem:[%s6608_s6] sm:$0xff] }
 0x3c7   : > { %5075 = vpow2.f32 %v4271_v27 }
 0x3c8   : > { %v5064_v30 = vpop.eup %5063  ;;  %5077 = vrcp.f32 %v1294_v25 }
 0x3c9   : > { %v5066_v32 = vpop.eup %5065  ;;  %1313 = vperm.xlu1 %4849, %v5064_v30   ;;  %5079 = vpow2.f32 %v4269_v28  ;;  %v936_v28 = vld [vmem:[%s6608_s6 + $0x8] sm:$0xff] }
 0x3ca   : > { %1197 = vperm.xlu0 %4848, %v5066_v32   ;;  %v5068_v34 = vpop.eup %5067  ;;  %5081 = vrcp.f32 %v1179_v29 }
 0x3cb   : > { %v1295_v42 = vadd.f32 1.0, %v5068_v34  ;;  %5083 = vpow2.f32 %v4264_v35 }
 0x3cc   : > { %v5070_v36 = vpop.eup %5069 }
 0x3cd   : > { %4850 = vset.pattern.permute.xlu1 %v5848_v39  ;;  %v5072_v41 = vpop.eup %5071 }
 0x3ce   : > { %1202 = vperm.xlu1 %4850, %v5070_v36   ;;  %v1182_v43 = vadd.f32 1.0, %v5072_v41  ;;  %v5074_v44 = vpop.eup %5073 }
 0x3cf   : > { %v1180_v51 = vadd.f32 1.0, %v5074_v44 }
 0x3d0   : > { %5085 = vrcp.f32 %v1182_v43 }
 0x3d1   : > { %v5076_v45 = vpop.eup %5075  ;;  %5087 = vrcp.f32 %v1295_v42 }
 0x3d2   : > { %v5078_v47 = vpop.eup %5077  ;;  %v1298_v48 = vadd.f32 1.0, %v5076_v45  ;;  %4851 = vset.pattern.permute.xlu1 %v5847_v38 }
 0x3d3   : > { %1318 = vperm.xlu1 %4851, %v5078_v47   ;;  %v5080_v52 = vpop.eup %5079 }
 0x3d4   : > { %5089 = vrcp.f32 %v1298_v48  ;;  %v5082_v40 = vpop.eup %5081  ;;  %v1296_v53 = vadd.f32 1.0, %v5080_v52 }
 0x3d5   : > { %5091 = vpow2.f32 %v4270_v46  ;;  %v5084_v54 = vpop.eup %5083  ;;  %v937_v46 = vld [vmem:[%s6608_s6 + $0x10] sm:$0xff] }
 0x3d6   : > { %5093 = vrcp.f32 %v1180_v51  ;;  %v1181_v57 = vadd.f32 1.0, %v5084_v54 }
 0x3d7   : > { %4852 = vset.pattern.permute.xlu1 %v5848_v39  ;;  %5095 = vrcp.f32 %v1296_v53 }
 0x3d8   : > { %1207 = vperm.xlu1 %4852, %v5082_v40   ;;  %5097 = vrcp.f32 %v1181_v57 }
 0x3da   : > { %v5086_v55 = vpop.eup %5085 }
 0x3db   : > { %v5088_v56 = vpop.eup %5087  ;;  %1222 = vperm.xlu0 %4848, %v5086_v55   ;;  %v938_v55 = vld [vmem:[%s6608_s6 + $0x18] sm:$0xff] }
 0x3dc   : > { %4853 = vset.pattern.permute.xlu1 %v5847_v38 }
 0x3dd   : > { %1323 = vperm.xlu1 %4853, %v5088_v56  }
 0x3de   : > { %v5090_v58 = vpop.eup %5089 }
 0x3df   : > { %v5092_v59 = vpop.eup %5091  ;;  %4858 = vset.pattern.permute.xlu0 %v5847_v38 }
 0x3e0   : > { %v5094_v60 = vpop.eup %5093  ;;  %1338 = vperm.xlu0 %4858, %v5090_v58   ;;  %v1297_v61 = vadd.f32 1.0, %v5092_v59 }
 0x3e1   : > { %4854 = vset.pattern.permute.xlu1 %v5848_v39  ;;  %v5096_v62 = vpop.eup %5095 }
 0x3e2   : > { %1212 = vperm.xlu1 %4854, %v5094_v60   ;;  %5099 = vrcp.f32 %v1297_v61  ;;  %v5098_v63 = vpop.eup %5097 }
 0x3e4   : > { %4860 = vset.pattern.permute.xlu0 %v5848_v39 }
 0x3e6   : > { %4855 = vset.pattern.permute.xlu1 %v5847_v38 }
 0x3e7   : > { %1328 = vperm.xlu1 %4855, %v5096_v62  }
 0x3eb   : > { %4856 = vset.pattern.permute.xlu1 %v5848_v39 }
 0x3ec   : > { %1217 = vperm.xlu1 %4856, %v5098_v63   ;;  %v5100_v1 = vpop.eup %5099  ;;  %v940_v63 = vld [vmem:[%s6608_s6 + $0x28] sm:$0xff] }
 0x3f0   : > { %4857 = vset.pattern.permute.xlu1 %v5847_v38 }
 0x3f1   : > { %1333 = vperm.xlu1 %4857, %v5100_v1  }
 0x3f5   : > { %4859 = vset.pattern.permute.xlu1 %v5848_v39 }
 0x448   : > { %v1314_v4 = vpop.permute.xlu1 %1313 }
 0x449   : > { %v1198_v6 = vpop.permute.xlu0 %1197  ;;  %v1345_v20 = vmul.f32 %v1344_v8, %v1314_v4 }
 0x44a   : > { %v1229_v7 = vmul.f32 %v1228_v3, %v1198_v6 }
 0x44c   : > { %v1235_v18 = vadd.f32 %v4258_v5, %v1229_v7  ;;  %v939_v7 = vld [vmem:[%s6608_s6 + $0x20] sm:$0xff] }
 0x44d   : > { %v1203_v19 = vpop.permute.xlu1 %1202 }
 0x44e   : > { %v1230_v21 = vmul.f32 %v1228_v3, %v1203_v19  ;;  %v1351_v22 = vadd.f32 %v1345_v20, %v1235_v18 }
 0x450   : > { %v1236_v25 = vadd.f32 %v4258_v5, %v1230_v21  ;;  %v1357_v27 = vmul.f32 %v1351_v22, %v935_v23 }
 0x452   : > { %v1319_v24 = vpop.permute.xlu1 %1318  ;;  %5101 = vtanh.f32 %v1357_v27 }
 0x453   : > { %v1346_v26 = vmul.f32 %v1344_v8, %v1319_v24 }
 0x455   : > { %v1352_v29 = vadd.f32 %v1346_v26, %v1236_v25 }
 0x457   : > { %v1358_v30 = vmul.f32 %v1352_v29, %v936_v28  ;;  %v1208_v31 = vpop.permute.xlu1 %1207 }
 0x458   : > { %v1231_v33 = vmul.f32 %v1228_v3, %v1208_v31 }
 0x459   : > { %5103 = vtanh.f32 %v1358_v30 }
 0x45a   : > { %v1223_v35 = vpop.permute.xlu0 %1222  ;;  %v1237_v41 = vadd.f32 %v4258_v5, %v1231_v33 }
 0x45b   : > { %v1234_v53 = vmul.f32 %v1228_v3, %v1223_v35 }
 0x45c   : > { %v1324_v32 = vpop.permute.xlu1 %1323  ;;  %v5102_v37 = vpop.eup %5101 }
 0x45d   : > { %v1347_v34 = vmul.f32 %v1344_v8, %v1324_v32  ;;  %v1240_v60 = vadd.f32 %v4258_v5, %v1234_v53 }
 0x45f   : > { %v1353_v44 = vadd.f32 %v1347_v34, %v1237_v41  ;;  %v1339_v51 = vpop.permute.xlu0 %1338 }
 0x460   : > { %v1350_v57 = vmul.f32 %v1344_v8, %v1339_v51 }
 0x461   : > { %v1213_v36 = vpop.permute.xlu1 %1212  ;;  %v1359_v54 = vmul.f32 %v1353_v44, %v937_v46 }
 0x462   : > { %v1232_v43 = vmul.f32 %v1228_v3, %v1213_v36  ;;  %v1356_v62 = vadd.f32 %v1350_v57, %v1240_v60  ;;  %v4882_v57 = vld [vmem:[#allocation13] ss:$16 sps:$4 sm:$0xff]   ;;  %v4889_v60 = vld [vmem:[#allocation13 + $0x44] ss:$16 sps:$4 sm:$0xff]  }
 0x463   : > { %v5104_v42 = vpop.eup %5103  ;;  %5105 = vtanh.f32 %v1359_v54 }
 0x464   : > { %v1369_v45 = vpack.c.bf16 %v5104_v42, %v5102_v37  ;;  %v1238_v52 = vadd.f32 %v4258_v5, %v1232_v43  ;;  %v1362_v6 = vmul.f32 %v1356_v62, %v940_v63  ;;  %v4895_v62 = vld [vmem:[#allocation13 + $0x64] ss:$16 sps:$4 sm:$0xff]   ;;  %v4900_v63 = vld [vmem:[#allocation13 + $0x60] ss:$16 sps:$4 sm:$0xff]  }
 0x466   : > { %v1329_v47 = vpop.permute.xlu1 %1328  ;;  %v1374_v48 = vsel %vm1372_vm2, %v1369_v45, 0 }
 0x467   : > { %v1348_v40 = vmul.f32 %v1344_v8, %v1329_v47  ;;  %4501 = vmatpush3.bf16.xpose.msra.mxu1 %v1374_v48 }
 0x468   : > { %4506 = vmatprep.subr.bf16.mxu1 %v5845_v0 }
 0x469   : > { %v1354_v56 = vadd.f32 %v1348_v40, %v1238_v52 }
 0x46b   : > { %v1360_v58 = vmul.f32 %v1354_v56, %v938_v55  ;;  %v1218_v59 = vpop.permute.xlu1 %1217  ;;  %v4877_v56 = vld [vmem:[#allocation13 + $0x4] ss:$16 sps:$4 sm:$0xff]  }
 0x46c   : > { %v1233_v61 = vmul.f32 %v1228_v3, %v1218_v59  ;;  %1936 = vmatprep.subr.bf16.mxu0 %v4877_v56  ;;  %v4888_v59 = vld [vmem:[#allocation13 + $0x20] ss:$16 sps:$4 sm:$0xff]   ;;  %v4923_v56 = vld [vmem:[#allocation13 + $0xec] ss:$16 sps:$4 sm:$0xff]  }
 0x46d   : > { %5107 = vtanh.f32 %v1360_v58  ;;  %v5106_v20 = vpop.eup %5105  ;;  %v4883_v58 = vld [vmem:[#allocation13 + $0x24] ss:$16 sps:$4 sm:$0xff]   ;;  %1937 = vmatpush1.bf16.msra.mxu0 %v4882_v57  ;;  %v4921_v57 = vld [vmem:[#allocation13 + $0xe8] ss:$16 sps:$4 sm:$0xff]  }
 0x46e   : > { %4503 = vmatmul.mubr.msk.bf16.vlgmr.msra.gmra.mrb[12].mxu1 %vm1372_vm2, %v1369_v45  ;;  %v1239_v2 = vadd.f32 %v4258_v5, %v1233_v61  ;;  %5109 = vtanh.f32 %v1362_v6  ;;  %1938 = vmatprep.subr.bf16.mxu0 %v4883_v58  ;;  %v4894_v61 = vld [vmem:[#allocation13 + $0x40] ss:$16 sps:$4 sm:$0xff]  }
 0x46f   : > { %4508 = vmatprep.mubr.msk.bf16.mxu1 %vm5846_vm0, %v5845_v0  ;;  %v4912_v6 = vld [vmem:[#allocation13 + $0xa0] ss:$16 sps:$4 sm:$0xff]  }
 0x470   : > { %v1334_v1 = vpop.permute.xlu1 %1333  ;;  %v4924_v58 = vld [vmem:[#allocation13 + $0xe0] ss:$16 sps:$4 sm:$0xff]  }
 0x471   : > { %v1349_v4 = vmul.f32 %v1344_v8, %v1334_v1  ;;  %1939 = vmatpush1.bf16.msra.mxu0 %v4888_v59  ;;  %v4901_v1 = vld [vmem:[#allocation13 + $0x84] ss:$16 sps:$4 sm:$0xff]   ;;  %v4927_v59 = vld [vmem:[%s7587_s3 + $0x4] ss:$16 sps:$4 sm:$0xff]   ;;  %s7591_s3 = sld [smem:[#allocation58_spill]] }
 0x472   : > { %1940 = vmatprep.subr.bf16.mxu0 %v4889_v60  ;;  %v4930_v60 = vld [vmem:[%s7588_s22 + $0xc] ss:$16 sps:$4 sm:$0xff]  }
 0x473   : > { %v1355_v18 = vadd.f32 %v1349_v4, %v1239_v2  ;;  %v4906_v2 = vld [vmem:[#allocation13 + $0x80] ss:$16 sps:$4 sm:$0xff]   ;;  %v4907_v4 = vld [vmem:[#allocation13 + $0xa4] ss:$16 sps:$4 sm:$0xff]  }
 0x475   : > { %v1361_v19 = vmul.f32 %v1355_v18, %v939_v7  ;;  %1941 = vmatpush1.bf16.msra.mxu0 %v4894_v61 }
 0x476   : > { %1942 = vmatprep.subr.bf16.mxu0 %v4895_v62 }
 0x477   : > { %v5108_v21 = vpop.eup %5107  ;;  %5111 = vtanh.f32 %v1361_v19  ;;  %s7592_s7 = smov %s7591_s3 }
 0x478   : > { %v1370_v22 = vpack.c.bf16 %v5108_v21, %v5106_v20  ;;  %v5110_v23 = vpop.eup %5109 }
 0x479   : > { %1943 = vmatpush1.bf16.msra.mxu0 %v4900_v63 }
 0x47a   : > { %v1418_v3 = vsel %vm1372_vm2, %v1370_v22, 0  ;;  %1944 = vmatprep.subr.bf16.mxu0 %v4901_v1 }
 0x47b   : > { %4507 = vmatpush3.bf16.xpose.msra.mxu1 %v1418_v3 }
 0x47c   : > { %4512 = vmatprep.subr.bf16.mxu1 %v5845_v0 }
 0x47d   : > { %1945 = vmatpush1.bf16.msra.mxu0 %v4906_v2 }
 0x47e   : > { %1946 = vmatprep.subr.bf16.mxu0 %v4907_v4 }
 0x481   : > { %v5112_v24 = vpop.eup %5111  ;;  %1947 = vmatpush1.bf16.msra.mxu0 %v4912_v6  ;;  %v6692_v6 = vld [vmem:[%s6444_s11] sm:$0xff] }
 0x482   : > { %4509 = vmatmul.mubr.msk.bf16.vlgmr.msra.gmra.mrb[16].mxu1 %vm1372_vm2, %v1370_v22  ;;  %v1371_v5 = vpack.c.bf16 %v5110_v23, %v5112_v24 }
 0x483   : > { %4514 = vmatprep.mubr.msk.bf16.mxu1 %vm5846_vm0, %v5845_v0 }
 0x484   : > { %v1462_v8 = vsel %vm1372_vm2, %v1371_v5, 0 }
 0x485   : > { %4513 = vmatpush3.bf16.xpose.msra.mxu1 %v1462_v8 }
 0x486   : > { %4518 = vmatprep.subr.bf16.mxu1 %v5845_v0 }
 0x48c   : > { %4515 = vmatmul.mubr.msk.bf16.vlgmr.msra.gmra.mrb[20].mxu1 %vm1372_vm2, %v1371_v5 }
 0x48d   : > { %4520 = vmatprep.mubr.msk.bf16.mxu1 %vm5846_vm0, %v5845_v0 }
 0x541   : > { %v1410_v25 = vpop.f32.mrb[12].mxu1 }
 0x542   : > { %v1505_v26 = vmax.f32 %v1410_v25, 0.0  ;;  %v4504_v27 = vpop.f32.mrb[13].mxu1 }
 0x543   : > { %v1413_v28 = vpop.f32.mrb[14].mxu1 }
 0x544   : > { %v1506_v29 = vmax.f32 %v1413_v28, 0.0  ;;  %v4505_v30 = vpop.f32.mrb[15].mxu1  ;;  %v1511_v31 = vsel %vm1128_vm1, %v1505_v26, 0.0 }
 0x545   : > { %1512 = vadd.xlane.f32.xlu1 %v1511_v31 }
 0x546   : > { %v6632_v32 = vpack.c.bf16 %v1506_v29, %v1505_v26  ;;  %v1514_v33 = vsel %vm1128_vm1, %v1506_v29, 0.0 }
 0x547   : > { %1515 = vadd.xlane.f32.xlu0 %v1514_v33 }
 0x555   : > { %v1454_v34 = vpop.f32.mrb[16].mxu1 }
 0x556   : > { %v1507_v35 = vmax.f32 %v1454_v34, 0.0  ;;  %v4510_v36 = vpop.f32.mrb[17].mxu1 }
 0x557   : > { %v1457_v37 = vpop.f32.mrb[18].mxu1  ;;  %v4881_v36 = vld [vmem:[#allocation13 + $0xc] ss:$16 sps:$4 sm:$0xff]  }
 0x558   : > { %v1508_v41 = vmax.f32 %v1457_v37, 0.0  ;;  %v4511_v42 = vpop.f32.mrb[19].mxu1  ;;  %v1517_v43 = vsel %vm1128_vm1, %v1507_v35, 0.0 }
 0x559   : > { %1518 = vadd.xlane.f32.xlu1 %v1517_v43  ;;  %v4887_v42 = vld [vmem:[#allocation13 + $0x2c] ss:$16 sps:$4 sm:$0xff]   ;;  %v4885_v43 = vld [vmem:[#allocation13 + $0x28] ss:$16 sps:$4 sm:$0xff]  }
 0x55a   : > { %v6636_v44 = vpack.c.bf16 %v1508_v41, %v1507_v35  ;;  %v1520_v45 = vsel %vm1128_vm1, %v1508_v41, 0.0  ;;  %v4879_v41 = vld [vmem:[#allocation13 + $0x8] ss:$16 sps:$4 sm:$0xff]  }
 0x55b   : > { %1521 = vadd.xlane.f32.xlu0 %v1520_v45  ;;  %v4899_v45 = vld [vmem:[#allocation13 + $0x6c] ss:$16 sps:$4 sm:$0xff]  }
 0x55f   : > { %v1498_v46 = vpop.f32.mrb[20].mxu1 }
 0x560   : > { %v1509_v47 = vmax.f32 %v1498_v46, 0.0  ;;  %v4516_v48 = vpop.f32.mrb[21].mxu1  ;;  %v4905_v46 = vld [vmem:[#allocation13 + $0x8c] ss:$16 sps:$4 sm:$0xff]  }
 0x561   : > { %v1501_v51 = vpop.f32.mrb[22].mxu1  ;;  %v4911_v48 = vld [vmem:[#allocation13 + $0xac] ss:$16 sps:$4 sm:$0xff]  }
 0x562   : > { %v1510_v52 = vmax.f32 %v1501_v51, 0.0  ;;  %v4517_v40 = vpop.f32.mrb[23].mxu1  ;;  %v1523_v53 = vsel %vm1128_vm1, %v1509_v47, 0.0  ;;  %v4909_v51 = vld [vmem:[#allocation13 + $0xa8] ss:$16 sps:$4 sm:$0xff]  }
 0x563   : > { %1524 = vadd.xlane.f32.xlu1 %v1523_v53  ;;  %v4917_v40 = vld [vmem:[#allocation13 + $0xcc] ss:$16 sps:$4 sm:$0xff]   ;;  %v4915_v53 = vld [vmem:[#allocation13 + $0xc8] ss:$16 sps:$4 sm:$0xff]  }
 0x564   : > { %v6640_v54 = vpack.c.bf16 %v1510_v52, %v1509_v47  ;;  %v1526_v55 = vsel %vm1128_vm1, %v1510_v52, 0.0  ;;  %v4903_v47 = vld [vmem:[#allocation13 + $0x88] ss:$16 sps:$4 sm:$0xff]   ;;  %v4913_v52 = vld [vmem:[#allocation13 + $0xc4] ss:$16 sps:$4 sm:$0xff]  }
 0x565   : > { %1527 = vadd.xlane.f32.xlu0 %v1526_v55  ;;  %1948 = vmatprep.subr.bf16.mxu0 %v4913_v52  ;;  %v4919_v55 = vld [vmem:[#allocation13 + $0xe4] ss:$16 sps:$4 sm:$0xff]  }
 0x566   : > { %v6767_v52 = vld [vmem:[%s6444_s11 + $0x18] sm:$0xff] }
 0x5d2   : > { %v1513_v7 = vpop.xlane.xlu1 %1512 }
 0x5d3   : > { %v1529_v18 = vadd.f32 1.0, %v1513_v7 }
 0x5d4   : > { %v1516_v19 = vpop.xlane.xlu0 %1515 }
 0x5d5   : > { %5113 = vrsqrt.f32 %v1529_v18  ;;  %v1530_v20 = vadd.f32 1.0, %v1516_v19  ;;  %v6697_v19 = vld [vmem:[%s6444_s11 + $0x8] sm:$0xff] }
 0x5d7   : > { %5115 = vrsqrt.f32 %v1530_v20 }
 0x5df   : > { %v6643_v21 = vpop.eup %5113 }
 0x5e0   : > { %v1544_v3 = vmul.f32 %v6643_v21, %v6516_v9  ;;  %v1691_v61 = vmul.f32 %v6643_v21, %v6643_v21 }
 0x5e1   : > { %v6645_v22 = vpop.eup %5115 }
 0x5e2   : > { %v1545_v23 = vmul.f32 %v6645_v22, %v6519_v10  ;;  %v1692_v62 = vmul.f32 %v6645_v22, %v6645_v22  ;;  %v1697_v7 = vmul.f32 %v6692_v6, %v1691_v61 }
 0x5e4   : > { %v1550_v24 = vpack.c.bf16 %v1545_v23, %v1544_v3  ;;  %v1698_v20 = vmul.f32 %v6697_v19, %v1692_v62 }
 0x5e6   : > { %4519 = vmatpush3.bf16.msra.mxu1 %v1550_v24  ;;  %v1519_v5 = vpop.xlane.xlu1 %1518 }
 0x5e7   : > { %v1531_v8 = vadd.f32 1.0, %v1519_v5  ;;  %4524 = vmatprep.subr.bf16.mxu1 %v5845_v0  ;;  %v4925_v5 = vld [vmem:[%s7588_s22] ss:$16 sps:$4 sm:$0xff]  }
 0x5e8   : > { %v1522_v25 = vpop.xlane.xlu0 %1521 }
 0x5e9   : > { %5117 = vrsqrt.f32 %v1531_v8  ;;  %v1532_v26 = vadd.f32 1.0, %v1522_v25  ;;  %4521 = vmatmul.mubr.msk.bf16.vlgmr.msra.gmra.mrb[24].mxu1 %vm1128_vm1, %v6632_v32  ;;  %v4936_v25 = vld [vmem:[%s7588_s22 + $0x2c] ss:$16 sps:$4 sm:$0xff]  }
 0x5ea   : > { %4526 = vmatprep.mubr.msk.bf16.mxu1 %vm5846_vm0, %v5845_v0 }
 0x5eb   : > { %5119 = vrsqrt.f32 %v1532_v26  ;;  %v4931_v26 = vld [vmem:[%s7588_s22 + $0x20] ss:$16 sps:$4 sm:$0xff]  }
 0x5f0   : > { %v1525_v9 = vpop.xlane.xlu1 %1524 }
 0x5f1   : > { %v1533_v27 = vadd.f32 1.0, %v1525_v9  ;;  %v4934_v9 = vld [vmem:[%s7588_s22 + $0x28] ss:$16 sps:$4 sm:$0xff]  }
 0x5f2   : > { %v1528_v28 = vpop.xlane.xlu0 %1527 }
 0x5f3   : > { %v6656_v10 = vpop.eup %5117  ;;  %5121 = vrsqrt.f32 %v1533_v27  ;;  %v1534_v29 = vadd.f32 1.0, %v1528_v28  ;;  %v4939_v27 = vld [vmem:[%s7588_s22 + $0x44] ss:$16 sps:$4 sm:$0xff]   ;;  %v4942_v28 = vld [vmem:[%s7588_s22 + $0x4c] ss:$16 sps:$4 sm:$0xff]  }
 0x5f4   : > { %v1546_v31 = vmul.f32 %v6656_v10, %v6528_v12 }
 0x5f5   : > { %v6658_v30 = vpop.eup %5119  ;;  %5123 = vrsqrt.f32 %v1534_v29  ;;  %v4937_v29 = vld [vmem:[%s7588_s22 + $0x40] ss:$16 sps:$4 sm:$0xff]  }
 0x5f6   : > { %v1547_v32 = vmul.f32 %v6658_v30, %v6531_v13 }
 0x5f8   : > { %v1551_v33 = vpack.c.bf16 %v1547_v32, %v1546_v31  ;;  %v4940_v31 = vld [vmem:[%s7588_s22 + $0x48] ss:$16 sps:$4 sm:$0xff]   ;;  %v4945_v32 = vld [vmem:[%s7588_s22 + $0x64] ss:$16 sps:$4 sm:$0xff]  }
 0x5fa   : > { %4525 = vmatpush3.bf16.msra.mxu1 %v1551_v33  ;;  %v4948_v33 = vld [vmem:[%s7588_s22 + $0x6c] ss:$16 sps:$4 sm:$0xff]  }
 0x5fb   : > { %4530 = vmatprep.subr.bf16.mxu1 %v5845_v0 }
 0x5fd   : > { %v6665_v34 = vpop.eup %5121  ;;  %4527 = vmatmul.mubr.msk.bf16.vlgmr.msra.gmra.mrb[28].mxu1 %vm1128_vm1, %v6636_v44  ;;  %v4893_v44 = vld [vmem:[#allocation13 + $0x4c] ss:$16 sps:$4 sm:$0xff]  }
 0x5fe   : > { %4532 = vmatprep.mubr.msk.bf16.mxu1 %vm5846_vm0, %v5845_v0  ;;  %v1548_v12 = vmul.f32 %v6665_v34, %v6541_v15  ;;  %v4891_v15 = vld [vmem:[#allocation13 + $0x48] ss:$16 sps:$4 sm:$0xff]   ;;  %v1695_v61 = vmul.f32 %v6665_v34, %v6665_v34 }
 0x5ff   : > { %v6671_v35 = vpop.eup %5123 }
 0x600   : > { %v1549_v13 = vmul.f32 %v6671_v35, %v6544_v16  ;;  %v4897_v16 = vld [vmem:[#allocation13 + $0x68] ss:$16 sps:$4 sm:$0xff]   ;;  %v1696_v62 = vmul.f32 %v6671_v35, %v6671_v35 }
 0x602   : > { %v1552_v37 = vpack.c.bf16 %v1549_v13, %v1548_v12  ;;  %v4943_v12 = vld [vmem:[%s7588_s22 + $0x60] ss:$16 sps:$4 sm:$0xff]   ;;  %v4946_v13 = vld [vmem:[%s7588_s22 + $0x68] ss:$16 sps:$4 sm:$0xff]  }
 0x604   : > { %4531 = vmatpush3.bf16.msra.mxu1 %v1552_v37  ;;  %v1694_v37 = vmul.f32 %v6658_v30, %v6658_v30 }
 0x605   : > { %1999 = vmatprep.subr.bf16.mxu1 %v4881_v36  ;;  %v1693_v36 = vmul.f32 %v6656_v10, %v6656_v10 }
 0x607   : > { %4533 = vmatmul.mubr.msk.bf16.vlgmr.msra.gmra.mrb[32].mxu1 %vm1128_vm1, %v6640_v54  ;;  %v4918_v54 = vld [vmem:[#allocation13 + $0xc0] ss:$16 sps:$4 sm:$0xff]  }
 0x608   : > { %2000 = vmatpush1.bf16.msra.mxu1 %v4879_v41  ;;  %2031 = vmatprep.mubr.bf16.mxu1 %v5848_v39  ;;  %v4951_v41 = vld [vmem:[%s7588_s22 + $0x84] ss:$16 sps:$4 sm:$0xff]  }
 0x609   : > { %2001 = vmatprep.subr.bf16.mxu1 %v4887_v42  ;;  %1949 = vmatpush1.bf16.msra.mxu0 %v4918_v54  ;;  %v4954_v42 = vld [vmem:[%s7588_s22 + $0x8c] ss:$16 sps:$4 sm:$0xff]  }
 0x60a   : > { %1950 = vmatprep.subr.bf16.mxu0 %v4919_v55  ;;  %v4960_v54 = vld [vmem:[%s7588_s22 + $0xac] ss:$16 sps:$4 sm:$0xff]  }
 0x60c   : > { %2002 = vmatpush1.bf16.msra.mxu1 %v4885_v43 }
 0x60d   : > { %2003 = vmatprep.subr.bf16.mxu1 %v4893_v44  ;;  %1951 = vmatpush1.bf16.msra.mxu0 %v4924_v58 }
 0x60e   : > { %2222 = vmatprep.subr.bf16.mxu0 %v4927_v59  ;;  %v4963_v59 = vld [vmem:[%s7588_s22 + $0xc4] ss:$16 sps:$4 sm:$0xff]  }
 0x610   : > { %2004 = vmatpush1.bf16.msra.mxu1 %v4891_v15 }
 0x611   : > { %2005 = vmatprep.subr.bf16.mxu1 %v4899_v45 }
 0x614   : > { %2006 = vmatpush1.bf16.msra.mxu1 %v4897_v16  ;;  %v4949_v16 = vld [vmem:[%s7588_s22 + $0x80] ss:$16 sps:$4 sm:$0xff]  }
 0x615   : > { %2007 = vmatprep.subr.bf16.mxu1 %v4905_v46  ;;  %v4952_v46 = vld [vmem:[%s7588_s22 + $0x88] ss:$16 sps:$4 sm:$0xff]  }
 0x618   : > { %2008 = vmatpush1.bf16.msra.mxu1 %v4903_v47  ;;  %v6762_v47 = vld [vmem:[%s6444_s11 + $0x10] sm:$0xff] }
 0x619   : > { %2009 = vmatprep.subr.bf16.mxu1 %v4911_v48  ;;  %v1699_v48 = vmul.f32 %v6762_v47, %v1693_v36 }
 0x61c   : > { %2010 = vmatpush1.bf16.msra.mxu1 %v4909_v51 }
 0x61d   : > { %2011 = vmatprep.subr.bf16.mxu1 %v4917_v40 }
 0x620   : > { %2012 = vmatpush1.bf16.msra.mxu1 %v4915_v53  ;;  %v4957_v53 = vld [vmem:[%s7588_s22 + $0xa4] ss:$16 sps:$4 sm:$0xff]  }
 0x621   : > { %2013 = vmatprep.subr.bf16.mxu1 %v4923_v56 }
 0x624   : > { %2014 = vmatpush1.bf16.msra.mxu1 %v4921_v57  ;;  %v4958_v57 = vld [vmem:[%s7588_s22 + $0xa8] ss:$16 sps:$4 sm:$0xff]  }
 0x625   : > { %2285 = vmatprep.subr.bf16.mxu1 %v4930_v60  ;;  %v4966_v60 = vld [vmem:[%s7588_s22 + $0xcc] ss:$16 sps:$4 sm:$0xff]  }
 0x6bc   : > { %v1590_v63 = vpop.f32.mrb[24].mxu1 }
 0x6bd   : > { %v1685_v1 = vmul.f32 %v6643_v21, %v1590_v63  ;;  %v4522_v2 = vpop.f32.mrb[25].mxu1  ;;  %v4928_v21 = vld [vmem:[%s7588_s22 + $0x8] ss:$16 sps:$4 sm:$0xff]  }
 0x6be   : > { %v1593_v4 = vpop.f32.mrb[26].mxu1  ;;  %v4964_v2 = vld [vmem:[%s7588_s22 + $0xc8] ss:$16 sps:$4 sm:$0xff]  }
 0x6bf   : > { %v1686_v18 = vmul.f32 %v6645_v22, %v1593_v4  ;;  %v4523_v3 = vpop.f32.mrb[27].mxu1  ;;  %v1703_v23 = vadd.f32 %v1697_v7, %v1685_v1  ;;  %v4933_v22 = vld [vmem:[%s7588_s22 + $0x24] ss:$16 sps:$4 sm:$0xff]   ;;  %v4961_v1 = vld [vmem:[%s7588_s22 + $0xc0] ss:$16 sps:$4 sm:$0xff]  }
 0x6c1   : > { %v1704_v24 = vadd.f32 %v1698_v20, %v1686_v18  ;;  %v4969_v18 = vld [vmem:[%s7588_s22 + $0xe4] ss:$16 sps:$4 sm:$0xff]   ;;  %v4972_v20 = vld [vmem:[%s7588_s22 + $0xec] ss:$16 sps:$4 sm:$0xff]  }
 0x6c3   : > { %v1709_v8 = vpack.c.bf16 %v1704_v24, %v1703_v23  ;;  %v6808_v23 = vld [vmem:[%s6444_s11 + $0x20] sm:$0xff] }
 0x6c5   : > { %1969 = vmatmul.mubr.bf16.vlgmr.msra.gmra.mrb[0].mxu0 %v1709_v8  ;;  %2032 = vmatmul.mubr.bf16.vlgmr.msra.gmra.mrb[36].mxu1 %v1709_v8 }
 0x6c6   : > { %2223 = vmatpush1.bf16.msra.mxu0 %v4925_v5  ;;  %2286 = vmatpush1.bf16.msra.mxu1 %v4928_v21  ;;  %v6813_v5 = vld [vmem:[%s6444_s11 + $0x28] sm:$0xff] }
 0x6c7   : > { %2224 = vmatprep.subr.bf16.mxu0 %v4933_v22  ;;  %2287 = vmatprep.subr.bf16.mxu1 %v4936_v25  ;;  %v1702_v21 = vmul.f32 %v6813_v5, %v1696_v62  ;;  %v4967_v22 = vld [vmem:[%s7588_s22 + $0xe0] ss:$16 sps:$4 sm:$0xff]   ;;  %v4970_v25 = vld [vmem:[%s7588_s22 + $0xe8] ss:$16 sps:$4 sm:$0xff]  }
 0x6c8   : > { %1978 = vmatprep.mubr.bf16.mxu0 %v5848_v39  ;;  %2041 = vmatprep.mubr.bf16.mxu1 %v5848_v39 }
 0x6ca   : > { %2225 = vmatpush1.bf16.msra.mxu0 %v4931_v26  ;;  %2288 = vmatpush1.bf16.msra.mxu1 %v4934_v9 }
 0x6cb   : > { %2226 = vmatprep.subr.bf16.mxu0 %v4939_v27  ;;  %2289 = vmatprep.subr.bf16.mxu1 %v4942_v28 }
 0x6ce   : > { %2227 = vmatpush1.bf16.msra.mxu0 %v4937_v29  ;;  %2290 = vmatpush1.bf16.msra.mxu1 %v4940_v31 }
 0x6cf   : > { %2228 = vmatprep.subr.bf16.mxu0 %v4945_v32  ;;  %2291 = vmatprep.subr.bf16.mxu1 %v4948_v33  ;;  %v6859_v33 = vld [vmem:[%s7589_s13 + $0x8] sm:$0xff] }
 0x6d0   : > { %v1634_v43 = vpop.f32.mrb[28].mxu1 }
 0x6d1   : > { %v1687_v44 = vmul.f32 %v6656_v10, %v1634_v43  ;;  %v4528_v15 = vpop.f32.mrb[29].mxu1  ;;  %v1700_v10 = vmul.f32 %v6767_v52, %v1694_v37 }
 0x6d2   : > { %v1637_v45 = vpop.f32.mrb[30].mxu1  ;;  %2229 = vmatpush1.bf16.msra.mxu0 %v4943_v12  ;;  %2292 = vmatpush1.bf16.msra.mxu1 %v4946_v13  ;;  %v6864_v13 = vld [vmem:[%s7589_s13 + $0x20] sm:$0xff]  ;;  %v6884_v15 = vld [vmem:[%s7589_s13 + $0x30] sm:$0xff] }
 0x6d3   : > { %v1688_v51 = vmul.f32 %v6658_v30, %v1637_v45  ;;  %v4529_v40 = vpop.f32.mrb[31].mxu1  ;;  %2230 = vmatprep.subr.bf16.mxu0 %v4951_v41  ;;  %2293 = vmatprep.subr.bf16.mxu1 %v4954_v42  ;;  %v1705_v55 = vadd.f32 %v1699_v48, %v1687_v44  ;;  %v4955_v30 = vld [vmem:[%s7588_s22 + $0xa0] ss:$16 sps:$4 sm:$0xff]   ;;  %v6879_v44 = vld [vmem:[%s7589_s13 + $0x18] sm:$0xff] }
 0x6d4   : > { %v6899_v40 = vld [vmem:[%s7589_s13 + $0x28] sm:$0xff] }
 0x6d5   : > { %v1706_v56 = vadd.f32 %v1700_v10, %v1688_v51 }
 0x6d6   : > { %2231 = vmatpush1.bf16.msra.mxu0 %v4949_v16  ;;  %2294 = vmatpush1.bf16.msra.mxu1 %v4952_v46 }
 0x6d7   : > { %v1710_v58 = vpack.c.bf16 %v1706_v56, %v1705_v55  ;;  %2232 = vmatprep.subr.bf16.mxu0 %v4957_v53  ;;  %2295 = vmatprep.subr.bf16.mxu1 %v4960_v54 }
 0x6d9   : > { %1979 = vmatmul.mubr.bf16.gmra.mrb[4].mxu0 %v1710_v58  ;;  %2042 = vmatmul.mubr.bf16.gmra.mrb[40].mxu1 %v1710_v58 }
 0x6da   : > { %v1678_v63 = vpop.f32.mrb[32].mxu1  ;;  %2233 = vmatpush1.bf16.msra.mxu0 %v4955_v30  ;;  %2296 = vmatpush1.bf16.msra.mxu1 %v4958_v57  ;;  %v4973_v30 = vld [vmem:[%s7590_s25] sm:$0xff]  }
 0x6db   : > { %v1689_v4 = vmul.f32 %v6665_v34, %v1678_v63  ;;  %v4534_v7 = vpop.f32.mrb[33].mxu1  ;;  %1988 = vmatprep.mubr.bf16.mxu0 %v5848_v39  ;;  %2051 = vmatprep.mubr.bf16.mxu1 %v5848_v39  ;;  %v1701_v34 = vmul.f32 %v6808_v23, %v1695_v61 }
 0x6dc   : > { %v1681_v3 = vpop.f32.mrb[34].mxu1  ;;  %2234 = vmatprep.subr.bf16.mxu0 %v4963_v59  ;;  %2297 = vmatprep.subr.bf16.mxu1 %v4966_v60  ;;  %v6917_v59 = vld [vmem:[%s7589_s13 + $0x38] sm:$0xff]  ;;  %v4974_v60 = vld [vmem:[%s7590_s25 + $0x8] sm:$0xff]  }
 0x6dd   : > { %v1690_v24 = vmul.f32 %v6671_v35, %v1681_v3  ;;  %v4535_v8 = vpop.f32.mrb[35].mxu1  ;;  %v1707_v26 = vadd.f32 %v1701_v34, %v1689_v4  ;;  %v4975_v34 = vld [vmem:[%s7590_s25 + $0x10] sm:$0xff]  }
 0x6de   : > { %2235 = vmatpush1.bf16.msra.mxu0 %v4961_v1  ;;  %2298 = vmatpush1.bf16.msra.mxu1 %v4964_v2  ;;  %v4976_v8 = vld [vmem:[%s7590_s25 + $0x18] sm:$0xff]  }
 0x6df   : > { %v1708_v9 = vadd.f32 %v1702_v21, %v1690_v24  ;;  %2236 = vmatprep.subr.bf16.mxu0 %v4969_v18  ;;  %2299 = vmatprep.subr.bf16.mxu1 %v4972_v20 }
 0x6e1   : > { %v1711_v35 = vpack.c.bf16 %v1708_v9, %v1707_v26  ;;  %v4977_v26 = vld [vmem:[%s7590_s25 + $0x20] sm:$0xff]  }
 0x6e2   : > { %2237 = vmatpush1.bf16.msra.mxu0 %v4967_v22  ;;  %2300 = vmatpush1.bf16.msra.mxu1 %v4970_v25 }
 0x6e3   : > { %1989 = vmatmul.mubr.bf16.gmra.mrb[8].mxu0 %v1711_v35  ;;  %2052 = vmatmul.mubr.bf16.gmra.mrb[44].mxu1 %v1711_v35 }
 0x6e4   : > { %2254 = vmatprep.mubr.bf16.mxu0 %v5848_v39  ;;  %2317 = vmatprep.mubr.bf16.mxu1 %v5848_v39 }
 0x6e5   : > { %4536 = vmatprep.subr.bf16.mxu0 %v5845_v0  ;;  %4564 = vmatprep.subr.bf16.mxu1 %v5845_v0 }
 0x6eb   : > { %2255 = vmatmul.mubr.bf16.vlgmr.msra.gmra.mrb[0].mxu0 %v6524_v11  ;;  %2318 = vmatmul.mubr.bf16.vlgmr.msra.gmra.mrb[36].mxu1 %v6524_v11  ;;  %v6843_v11 = vld [vmem:[%s7589_s13] sm:$0xff] }
 0x6ec   : > { %2264 = vmatprep.mubr.bf16.mxu0 %v5848_v39  ;;  %2327 = vmatprep.mubr.bf16.mxu1 %v5848_v39 }
 0x6ed   : > { %4537 = vmatpush3.bf16.msra.mxu0 %v4973_v30 }
 0x6ee   : > { %4538 = vmatprep.subr.bf16.mxu0 %v5845_v0 }
 0x6f1   : > { %4539 = vmatpush3.bf16.msra.mxu0 %v4974_v60 }
 0x6f2   : > { %4540 = vmatprep.subr.bf16.mxu0 %v5845_v0 }
 0x6f3   : > { %2265 = vmatmul.mubr.bf16.gmra.mrb[4].mxu0 %v6538_v14  ;;  %2328 = vmatmul.mubr.bf16.gmra.mrb[40].mxu1 %v6538_v14  ;;  %v6848_v14 = vld [vmem:[%s7589_s13 + $0x10] sm:$0xff] }
 0x6f4   : > { %2274 = vmatprep.mubr.bf16.mxu0 %v5848_v39  ;;  %2337 = vmatprep.mubr.bf16.mxu1 %v5848_v39 }
 0x6f5   : > { %4541 = vmatpush3.bf16.msra.mxu0 %v4975_v34 }
 0x6f6   : > { %4542 = vmatprep.subr.bf16.mxu0 %v5845_v0 }
 0x6f9   : > { %4543 = vmatpush3.bf16.msra.mxu0 %v4976_v8 }
 0x6fa   : > { %4544 = vmatprep.subr.bf16.mxu0 %v5845_v0 }
 0x6fb   : > { %2275 = vmatmul.mubr.bf16.gmra.mrb[8].mxu0 %v6551_v17  ;;  %2338 = vmatmul.mubr.bf16.gmra.mrb[44].mxu1 %v6551_v17 }
 0x6fc   : > { %4552 = vmatprep.mubr.msk.bf16.mxu0 %vm5846_vm0, %v5845_v0  ;;  %4566 = vmatprep.mubr.msk.bf16.mxu1 %vm5846_vm0, %v5845_v0 }
 0x6fd   : > { %4545 = vmatpush3.bf16.msra.mxu0 %v4977_v26 }
 0x6fe   : > { %4546 = vmatprep.subr.bf16.mxu0 %v5845_v0 }
 0x7be   : > { %v2256_v27 = vpop.f32.mrb[0].mxu0  ;;  %v2319_v28 = vpop.f32.mrb[36].mxu1 }
 0x7bf   : > { %v6851_v17 = vmul.f32 %v6843_v11, %v2256_v27  ;;  %v6854_v29 = vmul.f32 %v6848_v14, %v2319_v28  ;;  %v2258_v31 = vpop.f32.mrb[1].mxu0  ;;  %v2321_v32 = vpop.f32.mrb[37].mxu1  ;;  %v4978_v27 = vld [vmem:[%s7590_s25 + $0x28] sm:$0xff]  }
 0x7c0   : > { %v2260_v12 = vpop.f32.mrb[2].mxu0  ;;  %v2323_v36 = vpop.f32.mrb[38].mxu1  ;;  %v6871_v42 = vmul.f32 %v6859_v33, %v2258_v31  ;;  %v6891_v46 = vmul.f32 %v6879_v44, %v2321_v32  ;;  %4547 = vmatpush3.bf16.msra.mxu0 %v4978_v27 }
 0x7c1   : > { %2394 = vrot.lane.b32.xlu1 %v6851_v17, %s5849_s26  ;;  %v2262_v37 = vpop.f32.mrb[3].mxu0  ;;  %2466 = vrot.lane.b32.xlu0 %v6854_v29, %s5849_s26  ;;  %v2325_v41 = vpop.f32.mrb[39].mxu1  ;;  %v6874_v43 = vmul.f32 %v6864_v13, %v2260_v12  ;;  %v6894_v48 = vmul.f32 %v6884_v15, %v2323_v36 }
 0x7c2   : > { %v6909_v57 = vmul.f32 %v6899_v40, %v2262_v37  ;;  %v6928_v63 = vmul.f32 %v6917_v59, %v2325_v41  ;;  %4548 = vmatprep.subr.bf16.mxu0 %v5845_v0  ;;  %v2380_v41 = vld [vmem:[#allocation14] sm:$0xff] }
 0x7c5   : > { %2430 = vrot.lane.b32.xlu1 %v6871_v42, %s5849_s26  ;;  %2396 = vrot.lane.b32.xlu0 %v6874_v43, %s5849_s26 }
 0x7c6   : > { %v2266_v45 = vpop.f32.mrb[4].mxu0  ;;  %v2329_v16 = vpop.f32.mrb[40].mxu1 }
 0x7c7   : > { %v2268_v51 = vpop.f32.mrb[5].mxu0  ;;  %v2331_v10 = vpop.f32.mrb[41].mxu1  ;;  %v6912_v58 = vmul.f32 %v6843_v11, %v2266_v45  ;;  %v6931_v1 = vmul.f32 %v6848_v14, %v2329_v16 }
 0x7c8   : > { %v2270_v53 = vpop.f32.mrb[6].mxu0  ;;  %v2333_v54 = vpop.f32.mrb[42].mxu1  ;;  %v6942_v24 = vmul.f32 %v6859_v33, %v2268_v51  ;;  %v6956_v22 = vmul.f32 %v6879_v44, %v2331_v10  ;;  %v2381_v10 = vld [vmem:[#allocation14 + $0x8] sm:$0xff] }
 0x7c9   : > { %v2272_v55 = vpop.f32.mrb[7].mxu0  ;;  %2502 = vrot.lane.b32.xlu0 %v6891_v46, %s5849_s26  ;;  %2468 = vrot.lane.b32.xlu1 %v6894_v48, %s5849_s26  ;;  %v2335_v56 = vpop.f32.mrb[43].mxu1  ;;  %v6945_v21 = vmul.f32 %v6864_v13, %v2270_v53  ;;  %v6959_v25 = vmul.f32 %v6884_v15, %v2333_v54 }
 0x7ca   : > { %v6970_v9 = vmul.f32 %v6899_v40, %v2272_v55  ;;  %v6984_v28 = vmul.f32 %v6917_v59, %v2335_v56  ;;  %v2383_v55 = vadd.f32 %v2381_v10, %v6874_v43 }
 0x7cd   : > { %2398 = vrot.lane.b32.xlu0 %v6912_v58, %s5849_s26  ;;  %2432 = vrot.lane.b32.xlu1 %v6909_v57, %s5849_s26 }
 0x7ce   : > { %v2276_v61 = vpop.f32.mrb[8].mxu0  ;;  %v2339_v62 = vpop.f32.mrb[44].mxu1 }
 0x7cf   : > { %v2278_v2 = vpop.f32.mrb[9].mxu0  ;;  %v2341_v4 = vpop.f32.mrb[45].mxu1  ;;  %v6973_v35 = vmul.f32 %v6843_v11, %v2276_v61  ;;  %v4979_v11 = vld [vmem:[%s7590_s25 + $0x30] sm:$0xff]   ;;  %v6998_v32 = vmul.f32 %v6848_v14, %v2339_v62 }
 0x7d0   : > { %v2280_v7 = vpop.f32.mrb[10].mxu0  ;;  %v2343_v18 = vpop.f32.mrb[46].mxu1  ;;  %v6987_v31 = vmul.f32 %v6859_v33, %v2278_v2  ;;  %4549 = vmatpush3.bf16.msra.mxu0 %v4979_v11  ;;  %v4980_v33 = vld [vmem:[%s7590_s25 + $0x38] sm:$0xff]   ;;  %v7012_v36 = vmul.f32 %v6879_v44, %v2341_v4  ;;  %v2382_v44 = vadd.f32 %v2380_v41, %v6851_v17  ;;  %v2385_v11 = vadd.f32 %v2381_v10, %v6945_v21 }
 0x7d1   : > { %v2282_v20 = vpop.f32.mrb[11].mxu0  ;;  %2504 = vrot.lane.b32.xlu1 %v6928_v63, %s5849_s26  ;;  %2470 = vrot.lane.b32.xlu0 %v6931_v1, %s5849_s26  ;;  %v2345_v3 = vpop.f32.mrb[47].mxu1  ;;  %v7001_v12 = vmul.f32 %v6864_v13, %v2280_v7  ;;  %v7023_v13 = vmul.f32 %v6884_v15, %v2343_v18 }
 0x7d2   : > { %4550 = vmatprep.subr.bf16.mxu0 %v5845_v0  ;;  %v7015_v14 = vmul.f32 %v6899_v40, %v2282_v20  ;;  %v7028_v37 = vmul.f32 %v6917_v59, %v2345_v3 }
 0x7d4   : > { %4551 = vmatpush3.bf16.msra.mxu0 %v4980_v33 }
 0x7d5   : > { %2400 = vrot.lane.b32.xlu1 %v6945_v21, %s5849_s26  ;;  %2434 = vrot.lane.b32.xlu0 %v6942_v24, %s5849_s26 }
 0x7d6   : > { %4576 = vmatprep.subr.bf16.mxu0 %v5845_v0 }
 0x7d9   : > { %2506 = vrot.lane.b32.xlu0 %v6956_v22, %s5849_s26  ;;  %2472 = vrot.lane.b32.xlu1 %v6959_v25, %s5849_s26 }
 0x7dd   : > { %2402 = vrot.lane.b32.xlu0 %v6973_v35, %s5849_s26  ;;  %2436 = vrot.lane.b32.xlu1 %v6970_v9, %s5849_s26 }
 0x7e1   : > { %2438 = vrot.lane.b32.xlu0 %v6987_v31, %s5849_s26  ;;  %2508 = vrot.lane.b32.xlu1 %v6984_v28, %s5849_s26 }
 0x7e5   : > { %2404 = vrot.lane.b32.xlu1 %v7001_v12, %s5849_s26  ;;  %2474 = vrot.lane.b32.xlu0 %v6998_v32, %s5849_s26 }
 0x7e9   : > { %2440 = vrot.lane.b32.xlu1 %v7015_v14, %s5849_s26  ;;  %2510 = vrot.lane.b32.xlu0 %v7012_v36, %s5849_s26 }
 0x7ed   : > { %2476 = vrot.lane.b32.xlu1 %v7023_v13, %s5849_s26 }
 0x7f1   : > { %2512 = vrot.lane.b32.xlu1 %v7028_v37, %s5849_s26 }
 0x833   : > { %v2395_v45 = vpop.permute.xlu1 %2394  ;;  %v2467_v16 = vpop.permute.xlu0 %2466 }
 0x834   : > { %v2412_v51 = vadd.f32 %v2395_v45, %v2382_v44 }
 0x836   : > { %v2418_v40 = vadd.f32 %v2412_v51, %v6871_v42  ;;  %v2384_v42 = vadd.f32 %v2380_v41, %v6912_v58 }
 0x837   : > { %v2431_v15 = vpop.permute.xlu1 %2430  ;;  %v2397_v53 = vpop.permute.xlu0 %2396 }
 0x838   : > { %v2448_v54 = vadd.f32 %v2431_v15, %v2418_v40  ;;  %v2413_v30 = vadd.f32 %v2397_v53, %v2383_v55 }
 0x83a   : > { %v2454_v56 = vadd.f32 %v2448_v54, %v6854_v29  ;;  %v2419_v62 = vadd.f32 %v2413_v30, %v6909_v57 }
 0x83b   : > { %v2503_v59 = vpop.permute.xlu0 %2502  ;;  %v2469_v60 = vpop.permute.xlu1 %2468 }
 0x83c   : > { %v2484_v61 = vadd.f32 %v2467_v16, %v2454_v56 }
 0x83e   : > { %v2490_v17 = vadd.f32 %v2484_v61, %v6891_v46 }
 0x83f   : > { %v2399_v2 = vpop.permute.xlu0 %2398  ;;  %v2433_v4 = vpop.permute.xlu1 %2432 }
 0x840   : > { %v2520_v7 = vadd.f32 %v2503_v59, %v2490_v17  ;;  %v2449_v18 = vadd.f32 %v2433_v4, %v2419_v62  ;;  %v2414_v3 = vadd.f32 %v2399_v2, %v2384_v42 }
 0x842   : > { %v4342_v20 = vmul.f32 -1.442695, %v2520_v7  ;;  %v2455_v43 = vadd.f32 %v2449_v18, %v6894_v48  ;;  %v2420_v57 = vadd.f32 %v2414_v3, %v6942_v24 }
 0x843   : > { %v2505_v34 = vpop.permute.xlu1 %2504  ;;  %v2471_v29 = vpop.permute.xlu0 %2470 }
 0x844   : > { %5125 = vpow2.f32 %v4342_v20  ;;  %v2485_v8 = vadd.f32 %v2469_v60, %v2455_v43 }
 0x846   : > { %v2491_v26 = vadd.f32 %v2485_v8, %v6928_v63  ;;  %v2386_v63 = vadd.f32 %v2380_v41, %v6973_v35  ;;  %v2387_v41 = vadd.f32 %v2381_v10, %v7001_v12 }
 0x847   : > { %v2401_v27 = vpop.permute.xlu1 %2400  ;;  %v2435_v46 = vpop.permute.xlu0 %2434 }
 0x848   : > { %v2521_v33 = vadd.f32 %v2505_v34, %v2491_v26  ;;  %v2450_v44 = vadd.f32 %v2435_v46, %v2420_v57  ;;  %v2415_v45 = vadd.f32 %v2401_v27, %v2385_v11 }
 0x84a   : > { %v4343_v58 = vmul.f32 -1.442695, %v2521_v33  ;;  %v2456_v16 = vadd.f32 %v2450_v44, %v6931_v1  ;;  %v2421_v24 = vadd.f32 %v2415_v45, %v6970_v9 }
 0x84b   : > { %v2507_v51 = vpop.permute.xlu0 %2506  ;;  %v2473_v48 = vpop.permute.xlu1 %2472 }
 0x84c   : > { %5127 = vpow2.f32 %v4343_v58  ;;  %v2486_v40 = vadd.f32 %v2471_v29, %v2456_v16 }
 0x84e   : > { %v5126_v15 = vpop.eup %5125  ;;  %v2492_v53 = vadd.f32 %v2486_v40, %v6956_v22 }
 0x84f   : > { %v2403_v54 = vpop.permute.xlu0 %2402  ;;  %v2437_v55 = vpop.permute.xlu1 %2436  ;;  %v2544_v59 = vadd.f32 1.0, %v5126_v15 }
 0x850   : > { %v2522_v21 = vadd.f32 %v2507_v51, %v2492_v53  ;;  %v2416_v56 = vadd.f32 %v2403_v54, %v2386_v63  ;;  %v2451_v30 = vadd.f32 %v2437_v55, %v2421_v24 }
 0x852   : > { %v4344_v60 = vmul.f32 -1.442695, %v2522_v21  ;;  %v2457_v1 = vadd.f32 %v2451_v30, %v6959_v25  ;;  %v2422_v61 = vadd.f32 %v2416_v56, %v6987_v31 }
 0x853   : > { %v2439_v62 = vpop.permute.xlu0 %2438  ;;  %v2509_v17 = vpop.permute.xlu1 %2508 }
 0x854   : > { %5129 = vpow2.f32 %v4344_v60  ;;  %v2452_v2 = vadd.f32 %v2439_v62, %v2422_v61  ;;  %v2487_v22 = vadd.f32 %v2473_v48, %v2457_v1 }
 0x855   : > { %5131 = vrcp.f32 %v2544_v59 }
 0x856   : > { %v5128_v35 = vpop.eup %5127  ;;  %v2493_v9 = vadd.f32 %v2487_v22, %v6984_v28  ;;  %v2458_v4 = vadd.f32 %v2452_v2, %v6998_v32 }
 0x857   : > { %v2545_v7 = vadd.f32 1.0, %v5128_v35  ;;  %v2405_v42 = vpop.permute.xlu1 %2404  ;;  %v2475_v18 = vpop.permute.xlu0 %2474 }
 0x858   : > { %v2523_v20 = vadd.f32 %v2509_v17, %v2493_v9  ;;  %v2417_v25 = vadd.f32 %v2405_v42, %v2387_v41  ;;  %v2488_v3 = vadd.f32 %v2475_v18, %v2458_v4  ;;  %v4348_v17 = vld [vmem:[#allocation16] ss:$0 sm:$0xff] }
 0x859   : > { %5133 = vrcp.f32 %v2545_v7 }
 0x85a   : > { %v4345_v31 = vmul.f32 -1.442695, %v2523_v20  ;;  %v2423_v43 = vadd.f32 %v2417_v25, %v7015_v14  ;;  %v2494_v34 = vadd.f32 %v2488_v3, %v7012_v36 }
 0x85b   : > { %v2441_v29 = vpop.permute.xlu1 %2440  ;;  %v2511_v8 = vpop.permute.xlu0 %2510 }
 0x85c   : > { %5135 = vpow2.f32 %v4345_v31  ;;  %v2453_v28 = vadd.f32 %v2441_v29, %v2423_v43  ;;  %v2524_v26 = vadd.f32 %v2511_v8, %v2494_v34 }
 0x85e   : > { %v5130_v12 = vpop.eup %5129  ;;  %v4346_v10 = vmul.f32 -1.442695, %v2524_v26  ;;  %v2459_v32 = vadd.f32 %v2453_v28, %v7023_v13  ;;  %v2742_v26 = vld [vmem:[#allocation17] sm:$0x3] }
 0x85f   : > { %v7055_v57 = vpop.eup %5131  ;;  %v2477_v27 = vpop.permute.xlu1 %2476  ;;  %v2546_v11 = vadd.f32 1.0, %v5130_v12  ;;  %v2755_v12 = vrot.slane %v2742_v26, %v6558_v50 }
 0x860   : > { %5137 = vpow2.f32 %v4346_v10  ;;  %v2489_v46 = vadd.f32 %v2477_v27, %v2459_v32  ;;  %v2562_v36 = vmul.f32 %v6692_v6, %v7055_v57  ;;  %v2877_v10 = vrot.slane %v2742_v26, %v6556_v49 }
 0x861   : > { %5139 = vrcp.f32 %v2546_v11 }
 0x862   : > { %v2495_v33 = vadd.f32 %v2489_v46, %v7028_v37  ;;  %v7066_v51 = vsel %vm2568_vm3, %v2562_v36, %v6692_v6 }
 0x863   : > { %v7060_v14 = vpop.eup %5133  ;;  %v2513_v44 = vpop.permute.xlu1 %2512 }
 0x864   : > { %v2525_v58 = vadd.f32 %v2513_v44, %v2495_v33  ;;  %v2563_v45 = vmul.f32 %v6697_v19, %v7060_v14 }
 0x866   : > { %v5136_v13 = vpop.eup %5135  ;;  %v4347_v16 = vmul.f32 -1.442695, %v2525_v58  ;;  %v7070_v37 = vsel %vm2568_vm3, %v2563_v45, %v6697_v19 }
 0x867   : > { %v2547_v48 = vadd.f32 1.0, %v5136_v13  ;;  %v7074_v40 = vpack.c.bf16 %v7070_v37, %v7066_v51 }
 0x868   : > { %5141 = vpow2.f32 %v4347_v16 }
 0x869   : > { %5143 = vrcp.f32 %v2547_v48  ;;  %4553 = vmatmul.mubr.bf16.vlgmr.msra.gmra.mrb[12].mxu0 %v7074_v40 }
 0x86a   : > { %v5138_v15 = vpop.eup %5137  ;;  %4556 = vmatprep.mubr.msk.bf16.mxu0 %vm5846_vm0, %v5845_v0 }
 0x86b   : > { %v2548_v53 = vadd.f32 1.0, %v5138_v15  ;;  %v7079_v6 = vpop.eup %5139 }
 0x86c   : > { %v2564_v19 = vmul.f32 %v6762_v47, %v7079_v6 }
 0x86d   : > { %5145 = vrcp.f32 %v2548_v53 }
 0x86e   : > { %v7089_v21 = vsel %vm2568_vm3, %v2564_v19, %v6762_v47 }
 0x872   : > { %v5142_v63 = vpop.eup %5141 }
 0x873   : > { %v7083_v24 = vpop.eup %5143  ;;  %v2549_v54 = vadd.f32 1.0, %v5142_v63 }
 0x874   : > { %v2565_v55 = vmul.f32 %v6767_v52, %v7083_v24 }
 0x875   : > { %5147 = vrcp.f32 %v2549_v54 }
 0x876   : > { %v7093_v56 = vsel %vm2568_vm3, %v2565_v55, %v6767_v52 }
 0x877   : > { %v7097_v30 = vpack.c.bf16 %v7093_v56, %v7089_v21  ;;  %v7102_v59 = vpop.eup %5145 }
 0x878   : > { %v2566_v60 = vmul.f32 %v6808_v23, %v7102_v59 }
 0x879   : > { %4557 = vmatmul.mubr.bf16.gmra.mrb[16].mxu0 %v7097_v30 }
 0x87a   : > { %4560 = vmatprep.mubr.msk.bf16.mxu0 %vm5846_vm0, %v5845_v0  ;;  %v7112_v1 = vsel %vm2568_vm3, %v2566_v60, %v6808_v23 }
 0x87f   : > { %v7106_v47 = vpop.eup %5147 }
 0x880   : > { %v2567_v52 = vmul.f32 %v6813_v5, %v7106_v47 }
 0x882   : > { %v7116_v61 = vsel %vm2568_vm3, %v2567_v52, %v6813_v5 }
 0x883   : > { %v7120_v62 = vpack.c.bf16 %v7116_v61, %v7112_v1 }
 0x885   : > { %4561 = vmatmul.mubr.bf16.gmra.mrb[20].mxu0 %v7120_v62 }
 0x886   : > { %4578 = vmatprep.mubr.msk.bf16.mxu0 %vm5846_vm0, %v5845_v0 }
 0x93c   : > { %v2683_v2 = vpop.f32.mrb[12].mxu0 }
 0x93d   : > { %v2684_v22 = vadd.f32 %v4348_v17, %v2683_v2  ;;  %v4554_v35 = vpop.f32.mrb[13].mxu0 }
 0x93e   : > { %v2686_v9 = vpop.f32.mrb[14].mxu0 }
 0x93f   : > { %v4357_v23 = vmul.f32 -1.442695, %v2684_v22  ;;  %v2687_v41 = vadd.f32 %v4348_v17, %v2686_v9  ;;  %v4555_v4 = vpop.f32.mrb[15].mxu0 }
 0x941   : > { %5149 = vpow2.f32 %v4357_v23  ;;  %v4358_v5 = vmul.f32 -1.442695, %v2687_v41 }
 0x943   : > { %5151 = vpow2.f32 %v4358_v5 }
 0x94b   : > { %v5150_v7 = vpop.eup %5149 }
 0x94c   : > { %v2724_v42 = vadd.f32 1.0, %v5150_v7  ;;  %v2691_v18 = vpop.f32.mrb[16].mxu0 }
 0x94d   : > { %v5152_v20 = vpop.eup %5151  ;;  %v2692_v25 = vadd.f32 %v4348_v17, %v2691_v18  ;;  %v4558_v3 = vpop.f32.mrb[17].mxu0 }
 0x94e   : > { %5153 = vrcp.f32 %v2724_v42  ;;  %v2725_v31 = vadd.f32 1.0, %v5152_v20  ;;  %v2694_v43 = vpop.f32.mrb[18].mxu0 }
 0x94f   : > { %v4359_v34 = vmul.f32 -1.442695, %v2692_v25  ;;  %v2695_v29 = vadd.f32 %v4348_v17, %v2694_v43  ;;  %v4559_v8 = vpop.f32.mrb[19].mxu0 }
 0x950   : > { %5155 = vrcp.f32 %v2725_v31 }
 0x951   : > { %5157 = vpow2.f32 %v4359_v34  ;;  %v4360_v28 = vmul.f32 -1.442695, %v2695_v29 }
 0x953   : > { %5159 = vpow2.f32 %v4360_v28 }
 0x958   : > { %v5154_v32 = vpop.eup %5153  ;;  %v2699_v27 = vpop.f32.mrb[20].mxu0 }
 0x959   : > { %v2700_v46 = vadd.f32 %v4348_v17, %v2699_v27  ;;  %v4562_v11 = vpop.f32.mrb[21].mxu0  ;;  %v2756_v33 = vmul.f32 %v5154_v32, %v2755_v12  ;;  %v2878_v58 = vmul.f32 %v5154_v32, %v2877_v10 }
 0x95a   : > { %v5156_v36 = vpop.eup %5155  ;;  %v2702_v44 = vpop.f32.mrb[22].mxu0 }
 0x95b   : > { %v5158_v45 = vpop.eup %5157  ;;  %v4361_v13 = vmul.f32 -1.442695, %v2700_v46  ;;  %v2703_v16 = vadd.f32 %v4348_v17, %v2702_v44  ;;  %v4563_v48 = vpop.f32.mrb[23].mxu0  ;;  %v2762_v15 = vsel %vm1128_vm1, %v2756_v33, 0.0  ;;  %v2757_v53 = vmul.f32 %v5156_v36, %v2755_v12  ;;  %v7139_v33 = vld [vmem:[#allocation19] ss:$0 sm:$0xff] }
 0x95c   : > { %v2726_v63 = vadd.f32 1.0, %v5158_v45  ;;  %2763 = vadd.xlane.f32.xlu0 %v2762_v15  ;;  %v2884_v52 = vsel %vm1128_vm1, %v2878_v58, 0.0  ;;  %v2879_v2 = vmul.f32 %v5156_v36, %v2877_v10 }
 0x95d   : > { %v5160_v19 = vpop.eup %5159  ;;  %5161 = vpow2.f32 %v4361_v13  ;;  %v4362_v54 = vmul.f32 -1.442695, %v2703_v16  ;;  %v2765_v55 = vsel %vm1128_vm1, %v2757_v53, 0.0 }
 0x95e   : > { %5163 = vrcp.f32 %v2726_v63  ;;  %v2727_v60 = vadd.f32 1.0, %v5160_v19  ;;  %2766 = vadd.xlane.f32.xlu1 %v2765_v55  ;;  %v2887_v17 = vsel %vm1128_vm1, %v2879_v2, 0.0 }
 0x95f   : > { %5165 = vpow2.f32 %v4362_v54 }
 0x960   : > { %5167 = vrcp.f32 %v2727_v60  ;;  %2885 = vadd.xlane.f32.xlu0 %v2884_v52 }
 0x964   : > { %2888 = vadd.xlane.f32.xlu0 %v2887_v17 }
 0x967   : > { %v5162_v22 = vpop.eup %5161 }
 0x968   : > { %v5164_v35 = vpop.eup %5163  ;;  %v2728_v9 = vadd.f32 1.0, %v5162_v22 }
 0x969   : > { %v5166_v23 = vpop.eup %5165  ;;  %v2758_v41 = vmul.f32 %v5164_v35, %v2755_v12  ;;  %v2880_v18 = vmul.f32 %v5164_v35, %v2877_v10 }
 0x96a   : > { %v5168_v4 = vpop.eup %5167  ;;  %5169 = vrcp.f32 %v2728_v9  ;;  %v2729_v5 = vadd.f32 1.0, %v5166_v23 }
 0x96b   : > { %v2768_v7 = vsel %vm1128_vm1, %v2758_v41, 0.0  ;;  %v2759_v42 = vmul.f32 %v5168_v4, %v2755_v12  ;;  %v2881_v25 = vmul.f32 %v5168_v4, %v2877_v10  ;;  %v2890_v3 = vsel %vm1128_vm1, %v2880_v18, 0.0 }
 0x96c   : > { %5171 = vrcp.f32 %v2729_v5  ;;  %2769 = vadd.xlane.f32.xlu1 %v2768_v7 }
 0x96d   : > { %v2771_v20 = vsel %vm1128_vm1, %v2759_v42, 0.0  ;;  %v2893_v31 = vsel %vm1128_vm1, %v2881_v25, 0.0 }
 0x96e   : > { %2772 = vadd.xlane.f32.xlu0 %v2771_v20 }
 0x970   : > { %2891 = vadd.xlane.f32.xlu1 %v2890_v3 }
 0x972   : > { %2894 = vadd.xlane.f32.xlu0 %v2893_v31 }
 0x974   : > { %v5170_v43 = vpop.eup %5169 }
 0x975   : > { %v2760_v34 = vmul.f32 %v5170_v43, %v2755_v12  ;;  %v2882_v26 = vmul.f32 %v5170_v43, %v2877_v10 }
 0x976   : > { %v5172_v29 = vpop.eup %5171 }
 0x977   : > { %v2774_v8 = vsel %vm1128_vm1, %v2760_v34, 0.0  ;;  %v2761_v28 = vmul.f32 %v5172_v29, %v2755_v12  ;;  %v2883_v27 = vmul.f32 %v5172_v29, %v2877_v10  ;;  %v2896_v46 = vsel %vm1128_vm1, %v2882_v26, 0.0 }
 0x978   : > { %2775 = vadd.xlane.f32.xlu1 %v2774_v8 }
 0x979   : > { %v2777_v32 = vsel %vm1128_vm1, %v2761_v28, 0.0  ;;  %v2899_v11 = vsel %vm1128_vm1, %v2883_v27, 0.0 }
 0x97a   : > { %2778 = vadd.xlane.f32.xlu0 %v2777_v32 }
 0x97c   : > { %2897 = vadd.xlane.f32.xlu1 %v2896_v46 }
 0x97e   : > { %2900 = vadd.xlane.f32.xlu0 %v2899_v11 }
 0x9e9   : > { %v2764_v36 = vpop.xlane.xlu0 %2763 }
 0x9ea   : > { %v2786_v44 = vadd.f32 %v7139_v33, %v2764_v36 }
 0x9eb   : > { %v2767_v58 = vpop.xlane.xlu1 %2766 }
 0x9ec   : > { %v4365_v45 = vmul.f32 -1.442695, %v2786_v44  ;;  %v2787_v12 = vadd.f32 %v7139_v33, %v2767_v58 }
 0x9ed   : > { %v2886_v13 = vpop.xlane.xlu0 %2885 }
 0x9ee   : > { %5173 = vpow2.f32 %v4365_v45  ;;  %v4366_v16 = vmul.f32 -1.442695, %v2787_v12  ;;  %v2902_v10 = vadd.f32 %v7139_v33, %v2886_v13 }
 0x9f0   : > { %5175 = vpow2.f32 %v4366_v16  ;;  %v4371_v48 = vmul.f32 -1.442695, %v2902_v10 }
 0x9f1   : > { %v2889_v15 = vpop.xlane.xlu0 %2888 }
 0x9f2   : > { %5177 = vpow2.f32 %v4371_v48  ;;  %v2903_v53 = vadd.f32 %v7139_v33, %v2889_v15 }
 0x9f4   : > { %v4372_v63 = vmul.f32 -1.442695, %v2903_v53 }
 0x9f6   : > { %5179 = vpow2.f32 %v4372_v63 }
 0x9f8   : > { %v5174_v19 = vpop.eup %5173 }
 0x9f9   : > { %v2810_v54 = vadd.f32 1.0, %v5174_v19  ;;  %v2770_v55 = vpop.xlane.xlu1 %2769 }
 0x9fa   : > { %v5176_v60 = vpop.eup %5175  ;;  %v2788_v52 = vadd.f32 %v7139_v33, %v2770_v55 }
 0x9fb   : > { %5181 = vrcp.f32 %v2810_v54  ;;  %v2811_v2 = vadd.f32 1.0, %v5176_v60  ;;  %v2773_v17 = vpop.xlane.xlu0 %2772 }
 0x9fc   : > { %v5178_v22 = vpop.eup %5177  ;;  %v4367_v35 = vmul.f32 -1.442695, %v2788_v52  ;;  %v2789_v9 = vadd.f32 %v7139_v33, %v2773_v17 }
 0x9fd   : > { %5183 = vrcp.f32 %v2811_v2  ;;  %v2926_v23 = vadd.f32 1.0, %v5178_v22  ;;  %v2892_v41 = vpop.xlane.xlu1 %2891 }
 0x9fe   : > { %5185 = vpow2.f32 %v4367_v35  ;;  %v2904_v4 = vadd.f32 %v7139_v33, %v2892_v41  ;;  %v4368_v42 = vmul.f32 -1.442695, %v2789_v9 }
 0x9ff   : > { %5187 = vrcp.f32 %v2926_v23  ;;  %v2895_v5 = vpop.xlane.xlu0 %2894 }
 0xa00   : > { %v5180_v7 = vpop.eup %5179  ;;  %v4373_v18 = vmul.f32 -1.442695, %v2904_v4  ;;  %v2905_v25 = vadd.f32 %v7139_v33, %v2895_v5 }
 0xa01   : > { %v2927_v20 = vadd.f32 1.0, %v5180_v7 }
 0xa02   : > { %5189 = vpow2.f32 %v4373_v18  ;;  %v4374_v31 = vmul.f32 -1.442695, %v2905_v25  ;;  %v2744_v18 = vld [vmem:[#allocation20] sm:$0x3] }
 0xa03   : > { %5191 = vrcp.f32 %v2927_v20  ;;  %v2861_v20 = vrot.slane %v2744_v18, %v6558_v50 }
 0xa04   : > { %5193 = vpow2.f32 %v4368_v42 }
 0xa05   : > { %v5182_v3 = vpop.eup %5181  ;;  %v2776_v43 = vpop.xlane.xlu1 %2775  ;;  %5195 = vpow2.f32 %v4374_v31  ;;  %v2977_v31 = vrot.slane %v2744_v18, %v6556_v49 }
 0xa06   : > { %v2790_v34 = vadd.f32 %v7139_v33, %v2776_v43  ;;  %2830 = vperm.xlu1 %4859, %v5182_v3   ;;  %v4363_v43 = vld [vmem:[#allocation22] ss:$0 sm:$0xff] }
 0xa07   : > { %v5184_v29 = vpop.eup %5183  ;;  %v2779_v8 = vpop.xlane.xlu0 %2778 }
 0xa08   : > { %v5186_v28 = vpop.eup %5185  ;;  %2835 = vperm.xlu0 %4860, %v5184_v29   ;;  %v4369_v27 = vmul.f32 -1.442695, %v2790_v34  ;;  %v2791_v11 = vadd.f32 %v7139_v33, %v2779_v8 }
 0xa09   : > { %v5188_v26 = vpop.eup %5187  ;;  %v2812_v32 = vadd.f32 1.0, %v5186_v28  ;;  %v2898_v46 = vpop.xlane.xlu1 %2897 }
 0xa0a   : > { %v2906_v36 = vadd.f32 %v7139_v33, %v2898_v46  ;;  %4861 = vset.pattern.permute.xlu1 %v5847_v38  ;;  %v4370_v10 = vmul.f32 -1.442695, %v2791_v11  ;;  %v5263_v11 = vld [vmem:[%s6608_s6] sm:$0xff] }
 0xa0b   : > { %5197 = vrcp.f32 %v2812_v32  ;;  %2946 = vperm.xlu1 %4861, %v5188_v26   ;;  %v2901_v45 = vpop.xlane.xlu0 %2900 }
 0xa0c   : > { %v5190_v44 = vpop.eup %5189  ;;  %v4375_v58 = vmul.f32 -1.442695, %v2906_v36  ;;  %4867 = vset.pattern.permute.xlu0 %v5847_v38  ;;  %5199 = vpow2.f32 %v4369_v27  ;;  %v2907_v48 = vadd.f32 %v7139_v33, %v2901_v45 }
 0xa0d   : > { %v5192_v12 = vpop.eup %5191  ;;  %v2928_v13 = vadd.f32 1.0, %v5190_v44 }
 0xa0e   : > { %v5194_v16 = vpop.eup %5193  ;;  %5201 = vpow2.f32 %v4375_v58  ;;  %v4376_v63 = vmul.f32 -1.442695, %v2907_v48  ;;  %v5264_v58 = vld [vmem:[%s6608_s6 + $0x8] sm:$0xff] }
 0xa0f   : > { %5203 = vrcp.f32 %v2928_v13  ;;  %2951 = vperm.xlu1 %4861, %v5192_v12   ;;  %v2813_v15 = vadd.f32 1.0, %v5194_v16  ;;  %v5196_v53 = vpop.eup %5195 }
 0xa10   : > { %5205 = vpow2.f32 %v4370_v10  ;;  %v2929_v54 = vadd.f32 1.0, %v5196_v53 }
 0xa11   : > { %5207 = vrcp.f32 %v2813_v15 }
 0xa12   : > { %5209 = vpow2.f32 %v4376_v63 }
 0xa13   : > { %4862 = vset.pattern.permute.xlu1 %v5848_v39  ;;  %5211 = vrcp.f32 %v2929_v54 }
 0xa15   : > { %v5198_v19 = vpop.eup %5197 }
 0xa16   : > { %2840 = vperm.xlu1 %4862, %v5198_v19   ;;  %v5200_v55 = vpop.eup %5199 }
 0xa17   : > { %v2814_v33 = vadd.f32 1.0, %v5200_v55 }
 0xa18   : > { %v5202_v60 = vpop.eup %5201 }
 0xa19   : > { %v5204_v52 = vpop.eup %5203  ;;  %v2930_v2 = vadd.f32 1.0, %v5202_v60 }
 0xa1a   : > { %4863 = vset.pattern.permute.xlu1 %v5847_v38  ;;  %v5206_v17 = vpop.eup %5205 }
 0xa1b   : > { %5213 = vrcp.f32 %v2930_v2  ;;  %2956 = vperm.xlu1 %4863, %v5204_v52   ;;  %v5208_v22 = vpop.eup %5207  ;;  %v2815_v35 = vadd.f32 1.0, %v5206_v17  ;;  %v5265_v2 = vld [vmem:[%s6608_s6 + $0x10] sm:$0xff] }
 0xa1c   : > { %5215 = vrcp.f32 %v2814_v33  ;;  %v5210_v9 = vpop.eup %5209 }
 0xa1d   : > { %5217 = vrcp.f32 %v2815_v35  ;;  %v5212_v23 = vpop.eup %5211  ;;  %v2931_v41 = vadd.f32 1.0, %v5210_v9 }
 0xa1f   : > { %4864 = vset.pattern.permute.xlu1 %v5848_v39  ;;  %5219 = vrcp.f32 %v2931_v41 }
 0xa20   : > { %2845 = vperm.xlu1 %4864, %v5208_v22   ;;  %v5266_v22 = vld [vmem:[%s6608_s6 + $0x18] sm:$0xff] }
 0xa24   : > { %4865 = vset.pattern.permute.xlu1 %v5847_v38 }
 0xa25   : > { %v5214_v4 = vpop.eup %5213  ;;  %2961 = vperm.xlu1 %4865, %v5212_v23  }
 0xa26   : > { %2966 = vperm.xlu0 %4867, %v5214_v4   ;;  %v5216_v5 = vpop.eup %5215 }
 0xa27   : > { %v5218_v7 = vpop.eup %5217 }
 0xa29   : > { %4866 = vset.pattern.permute.xlu1 %v5848_v39  ;;  %v5220_v42 = vpop.eup %5219 }
 0xa2a   : > { %2850 = vperm.xlu1 %4866, %v5216_v5  }
 0xa2e   : > { %2855 = vperm.xlu1 %4866, %v5218_v7  }
 0xa32   : > { %4868 = vset.pattern.permute.xlu1 %v5847_v38 }
 0xa33   : > { %2971 = vperm.xlu1 %4868, %v5220_v42  }
 0xa85   : > { %v2831_v25 = vpop.permute.xlu1 %2830 }
 0xa86   : > { %v2862_v3 = vmul.f32 %v2861_v20, %v2831_v25 }
 0xa87   : > { %v2836_v34 = vpop.permute.xlu0 %2835 }
 0xa88   : > { %v2868_v8 = vadd.f32 %v4363_v43, %v2862_v3  ;;  %v2863_v28 = vmul.f32 %v2861_v20, %v2836_v34 }
 0xa8a   : > { %v2947_v29 = vpop.permute.xlu1 %2946  ;;  %v2869_v46 = vadd.f32 %v4363_v43, %v2863_v28 }
 0xa8b   : > { %v2978_v26 = vmul.f32 %v2977_v31, %v2947_v29 }
 0xa8d   : > { %v2984_v32 = vadd.f32 %v2978_v26, %v2868_v8  ;;  %v5267_v8 = vld [vmem:[%s6608_s6 + $0x20] sm:$0xff] }
 0xa8e   : > { %v2952_v27 = vpop.permute.xlu1 %2951 }
 0xa8f   : > { %v2979_v38 = vmul.f32 %v2977_v31, %v2952_v27  ;;  %v2990_v36 = vmul.f32 %v5263_v11, %v2984_v32 }
 0xa91   : > { %v2985_v44 = vadd.f32 %v2979_v38, %v2869_v46  ;;  %5221 = vtanh.f32 %v2990_v36  ;;  %v5268_v46 = vld [vmem:[%s6608_s6 + $0x28] sm:$0xff] }
 0xa93   : > { %v2991_v50 = vmul.f32 %v5264_v58, %v2985_v44 }
 0xa95   : > { %5223 = vtanh.f32 %v2991_v50  ;;  %v2841_v45 = vpop.permute.xlu1 %2840 }
 0xa96   : > { %v2864_v49 = vmul.f32 %v2861_v20, %v2841_v45 }
 0xa98   : > { %v2870_v15 = vadd.f32 %v4363_v43, %v2864_v49 }
 0xa9a   : > { %v2957_v12 = vpop.permute.xlu1 %2956 }
 0xa9b   : > { %v5222_v13 = vpop.eup %5221  ;;  %v2980_v16 = vmul.f32 %v2977_v31, %v2957_v12 }
 0xa9d   : > { %v2986_v19 = vadd.f32 %v2980_v16, %v2870_v15 }
 0xa9f   : > { %v5224_v10 = vpop.eup %5223  ;;  %v2846_v48 = vpop.permute.xlu1 %2845  ;;  %v2992_v33 = vmul.f32 %v5265_v2, %v2986_v19 }
 0xaa0   : > { %v3002_v53 = vpack.c.bf16 %v5224_v10, %v5222_v13  ;;  %v2865_v63 = vmul.f32 %v2861_v20, %v2846_v48 }
 0xaa1   : > { %5225 = vtanh.f32 %v2992_v33 }
 0xaa2   : > { %v3006_v54 = vsel %vm1372_vm2, %v3002_v53, 0  ;;  %v2871_v60 = vadd.f32 %v4363_v43, %v2865_v63 }
 0xaa3   : > { %4565 = vmatpush3.bf16.xpose.msra.mxu1 %v3006_v54 }
 0xaa4   : > { %v2962_v55 = vpop.permute.xlu1 %2961  ;;  %4570 = vmatprep.subr.bf16.mxu1 %v5845_v0 }
 0xaa5   : > { %v2981_v52 = vmul.f32 %v2977_v31, %v2962_v55  ;;  %v2967_v41 = vpop.permute.xlu0 %2966 }
 0xaa6   : > { %v2982_v7 = vmul.f32 %v2977_v31, %v2967_v41 }
 0xaa7   : > { %v2987_v17 = vadd.f32 %v2981_v52, %v2871_v60 }
 0xaa9   : > { %v2993_v35 = vmul.f32 %v5266_v22, %v2987_v17  ;;  %v2851_v9 = vpop.permute.xlu1 %2850 }
 0xaaa   : > { %v2866_v23 = vmul.f32 %v2861_v20, %v2851_v9  ;;  %4567 = vmatmul.mubr.msk.bf16.vlgmr.msra.gmra.mrb[48].mxu1 %vm1372_vm2, %v3002_v53 }
 0xaab   : > { %5227 = vtanh.f32 %v2993_v35  ;;  %4572 = vmatprep.mubr.msk.bf16.mxu1 %vm5846_vm0, %v5845_v0  ;;  %v5226_v29 = vpop.eup %5225 }
 0xaac   : > { %v2872_v4 = vadd.f32 %v4363_v43, %v2866_v23 }
 0xaad   : > { %v2856_v5 = vpop.permute.xlu1 %2855 }
 0xaae   : > { %v2867_v42 = vmul.f32 %v2861_v20, %v2856_v5  ;;  %v2988_v18 = vadd.f32 %v2982_v7, %v2872_v4 }
 0xab0   : > { %v2873_v3 = vadd.f32 %v4363_v43, %v2867_v42  ;;  %v2994_v28 = vmul.f32 %v5267_v8, %v2988_v18 }
 0xab2   : > { %v2972_v25 = vpop.permute.xlu1 %2971  ;;  %5229 = vtanh.f32 %v2994_v28 }
 0xab3   : > { %v2983_v34 = vmul.f32 %v2977_v31, %v2972_v25 }
 0xab5   : > { %v5228_v26 = vpop.eup %5227  ;;  %v2989_v32 = vadd.f32 %v2983_v34, %v2873_v3 }
 0xab6   : > { %v3003_v27 = vpack.c.bf16 %v5228_v26, %v5226_v29 }
 0xab7   : > { %v2995_v38 = vmul.f32 %v5268_v46, %v2989_v32 }
 0xab8   : > { %v3050_v11 = vsel %vm1372_vm2, %v3003_v27, 0 }
 0xab9   : > { %5231 = vtanh.f32 %v2995_v38  ;;  %4571 = vmatpush3.bf16.xpose.msra.mxu1 %v3050_v11 }
 0xaba   : > { %4582 = vmatprep.subr.bf16.mxu1 %v5845_v0 }
 0xabc   : > { %v5230_v20 = vpop.eup %5229 }
 0xac0   : > { %4573 = vmatmul.mubr.msk.bf16.vlgmr.msra.gmra.mrb[52].mxu1 %vm1372_vm2, %v3003_v27 }
 0xac1   : > { %4584 = vmatprep.mubr.msk.bf16.mxu1 %vm5846_vm0, %v5845_v0 }
 0xac3   : > { %v5232_v31 = vpop.eup %5231 }
 0xac4   : > { %v3004_v43 = vpack.c.bf16 %v5232_v31, %v5230_v20 }
 0xac6   : > { %v3094_v36 = vsel %vm1372_vm2, %v3004_v43, 0 }
 0xac7   : > { %4577 = vmatpush3.bf16.xpose.msra.mxu0 %v3094_v36 }
 0xac8   : > { %4588 = vmatprep.subr.bf16.mxu0 %v5845_v0 }
 0xace   : > { %4579 = vmatmul.mubr.msk.bf16.vlgmr.msra.gmra.mrb[24].mxu0 %vm1372_vm2, %v3004_v43 }
 0xacf   : > { %4590 = vmatprep.mubr.msk.bf16.mxu0 %vm5846_vm0, %v5845_v0 }
 0xb7d   : > { %v3042_v44 = vpop.f32.mrb[48].mxu1 }
 0xb7e   : > { %v3137_v58 = vmax.f32 %v3042_v44, 0.0  ;;  %v4568_v50 = vpop.f32.mrb[49].mxu1 }
 0xb7f   : > { %v3045_v45 = vpop.f32.mrb[50].mxu1  ;;  %v4981_v50 = vld [vmem:[#allocation25] ss:$8 sps:$4 sm:$0xff]  }
 0xb80   : > { %v3138_v12 = vmax.f32 %v3045_v45, 0.0  ;;  %v4569_v49 = vpop.f32.mrb[51].mxu1  ;;  %v3143_v13 = vsel %vm1128_vm1, %v3137_v58, 0.0  ;;  %v4986_v45 = vld [vmem:[#allocation25 + $0x14] ss:$8 sps:$4 sm:$0xff]  }
 0xb81   : > { %3144 = vadd.xlane.f32.xlu1 %v3143_v13  ;;  %v4989_v13 = vld [vmem:[#allocation25 + $0x24] ss:$8 sps:$4 sm:$0xff]  }
 0xb82   : > { %v3173_v16 = vpack.c.bf16 %v3138_v12, %v3137_v58  ;;  %v3146_v10 = vsel %vm1128_vm1, %v3138_v12, 0.0  ;;  %v4984_v12 = vld [vmem:[#allocation25 + $0x10] ss:$8 sps:$4 sm:$0xff]  }
 0xb83   : > { %3147 = vadd.xlane.f32.xlu0 %v3146_v10 }
 0xb93   : > { %v3086_v48 = vpop.f32.mrb[52].mxu1 }
 0xb94   : > { %v3139_v15 = vmax.f32 %v3086_v48, 0.0  ;;  %v4574_v53 = vpop.f32.mrb[53].mxu1 }
 0xb95   : > { %v3089_v63 = vpop.f32.mrb[54].mxu1  ;;  %v4992_v53 = vld [vmem:[#allocation25 + $0x34] ss:$8 sps:$4 sm:$0xff]  }
 0xb96   : > { %v3140_v19 = vmax.f32 %v3089_v63, 0.0  ;;  %v4575_v54 = vpop.f32.mrb[55].mxu1  ;;  %v3149_v55 = vsel %vm1128_vm1, %v3139_v15, 0.0 }
 0xb97   : > { %3150 = vadd.xlane.f32.xlu0 %v3149_v55  ;;  %v4995_v54 = vld [vmem:[#allocation25 + $0x44] ss:$8 sps:$4 sm:$0xff]   ;;  %v4993_v55 = vld [vmem:[#allocation25 + $0x40] ss:$8 sps:$4 sm:$0xff]  }
 0xb98   : > { %v3174_v60 = vpack.c.bf16 %v3140_v19, %v3139_v15  ;;  %v3152_v52 = vsel %vm1128_vm1, %v3140_v19, 0.0  ;;  %v4987_v15 = vld [vmem:[#allocation25 + $0x20] ss:$8 sps:$4 sm:$0xff]   ;;  %v4990_v19 = vld [vmem:[#allocation25 + $0x30] ss:$8 sps:$4 sm:$0xff]  }
 0xb9b   : > { %3153 = vadd.xlane.f32.xlu0 %v3152_v52  ;;  %v4996_v52 = vld [vmem:[#allocation25 + $0x50] ss:$8 sps:$4 sm:$0xff]  }
 0xba1   : > { %v3130_v2 = vpop.f32.mrb[24].mxu0 }
 0xba2   : > { %v3141_v33 = vmax.f32 %v3130_v2, 0.0  ;;  %v4580_v17 = vpop.f32.mrb[25].mxu0  ;;  %v5001_v2 = vld [vmem:[#allocation25 + $0x64] ss:$8 sps:$4 sm:$0xff]  }
 0xba3   : > { %v3133_v22 = vpop.f32.mrb[26].mxu0  ;;  %v5004_v17 = vld [vmem:[#allocation25 + $0x74] ss:$8 sps:$4 sm:$0xff]  }
 0xba4   : > { %v3142_v35 = vmax.f32 %v3133_v22, 0.0  ;;  %v4581_v9 = vpop.f32.mrb[27].mxu0  ;;  %v3155_v23 = vsel %vm1128_vm1, %v3141_v33, 0.0  ;;  %v5002_v22 = vld [vmem:[#allocation25 + $0x70] ss:$8 sps:$4 sm:$0xff]  }
 0xba5   : > { %3156 = vadd.xlane.f32.xlu1 %v3155_v23 }
 0xba6   : > { %v3175_v41 = vpack.c.bf16 %v3142_v35, %v3141_v33  ;;  %v3158_v4 = vsel %vm1128_vm1, %v3142_v35, 0.0  ;;  %v4999_v33 = vld [vmem:[#allocation25 + $0x60] ss:$8 sps:$4 sm:$0xff]   ;;  %v5007_v35 = vld [vmem:[#allocation23 + $0x4] ss:$8 sps:$4 sm:$0xff]  }
 0xba7   : > { %3159 = vadd.xlane.f32.xlu0 %v3158_v4 }
 0xc0e   : > { %v3145_v5 = vpop.xlane.xlu1 %3144 }
 0xc0f   : > { %v3161_v7 = vadd.f32 1.0, %v3145_v5 }
 0xc10   : > { %v3148_v42 = vpop.xlane.xlu0 %3147 }
 0xc11   : > { %5233 = vrsqrt.f32 %v3161_v7  ;;  %v3162_v18 = vadd.f32 1.0, %v3148_v42 }
 0xc13   : > { %5235 = vrsqrt.f32 %v3162_v18 }
 0xc1b   : > { %v7190_v25 = vpop.eup %5233 }
 0xc1c   : > { %v3176_v34 = vmul.f32 %v7190_v25, %v7066_v51  ;;  %v3323_v9 = vmul.f32 %v7190_v25, %v7190_v25 }
 0xc1d   : > { %v7192_v3 = vpop.eup %5235 }
 0xc1e   : > { %v3177_v29 = vmul.f32 %v7192_v3, %v7070_v37  ;;  %v3324_v23 = vmul.f32 %v7192_v3, %v7192_v3  ;;  %v3329_v42 = vmul.f32 %v3323_v9, %v7066_v51  ;;  %v5016_v51 = vld [vmem:[#allocation23 + $0x34] ss:$8 sps:$4 sm:$0xff]  }
 0xc20   : > { %v3182_v8 = vpack.c.bf16 %v3177_v29, %v3176_v34  ;;  %v3330_v34 = vmul.f32 %v3324_v23, %v7070_v37  ;;  %v5019_v37 = vld [vmem:[#allocation23 + $0x44] ss:$8 sps:$4 sm:$0xff]  }
 0xc22   : > { %4583 = vmatpush3.bf16.msra.mxu1 %v3182_v8 }
 0xc23   : > { %4594 = vmatprep.subr.bf16.mxu1 %v5845_v0 }
 0xc24   : > { %v3151_v28 = vpop.xlane.xlu0 %3150 }
 0xc25   : > { %v3163_v26 = vadd.f32 1.0, %v3151_v28  ;;  %4585 = vmatmul.mubr.msk.bf16.vlgmr.msra.gmra.mrb[56].mxu1 %vm1128_vm1, %v3173_v16 }
 0xc26   : > { %4596 = vmatprep.mubr.msk.bf16.mxu1 %vm5846_vm0, %v5845_v0  ;;  %v4983_v0 = vld [vmem:[#allocation25 + $0x4] ss:$8 sps:$4 sm:$0xff]  }
 0xc27   : > { %5237 = vrsqrt.f32 %v3163_v26  ;;  %v5005_v26 = vld [vmem:[#allocation23] ss:$8 sps:$4 sm:$0xff]  }
 0xc28   : > { %v3154_v32 = vpop.xlane.xlu0 %3153 }
 0xc29   : > { %v3164_v27 = vadd.f32 1.0, %v3154_v32 }
 0xc2b   : > { %5239 = vrsqrt.f32 %v3164_v27  ;;  %v5010_v27 = vld [vmem:[#allocation23 + $0x14] ss:$8 sps:$4 sm:$0xff]  }
 0xc31   : > { %v7202_v38 = vpop.eup %5237 }
 0xc32   : > { %v3157_v46 = vpop.xlane.xlu1 %3156  ;;  %v3178_v36 = vmul.f32 %v7202_v38, %v7089_v21 }
 0xc33   : > { %v3165_v11 = vadd.f32 1.0, %v3157_v46  ;;  %v5008_v46 = vld [vmem:[#allocation23 + $0x10] ss:$8 sps:$4 sm:$0xff]  }
 0xc34   : > { %v3160_v20 = vpop.xlane.xlu0 %3159 }
 0xc35   : > { %v7204_v31 = vpop.eup %5239  ;;  %5241 = vrsqrt.f32 %v3165_v11  ;;  %v3166_v43 = vadd.f32 1.0, %v3160_v20  ;;  %v5011_v11 = vld [vmem:[#allocation23 + $0x20] ss:$8 sps:$4 sm:$0xff]  }
 0xc36   : > { %v3179_v44 = vmul.f32 %v7204_v31, %v7093_v56  ;;  %v5017_v20 = vld [vmem:[#allocation23 + $0x40] ss:$8 sps:$4 sm:$0xff]  }
 0xc37   : > { %5243 = vrsqrt.f32 %v3166_v43  ;;  %v3325_v43 = vmul.f32 %v7202_v38, %v7202_v38 }
 0xc38   : > { %v3183_v58 = vpack.c.bf16 %v3179_v44, %v3178_v36  ;;  %v3326_v36 = vmul.f32 %v7204_v31, %v7204_v31  ;;  %v5022_v44 = vld [vmem:[#allocation23 + $0x54] ss:$8 sps:$4 sm:$0xff]  }
 0xc3a   : > { %4589 = vmatpush3.bf16.msra.mxu0 %v3183_v58 }
 0xc3b   : > { %3456 = vmatprep.subr.bf16.mxu0 %v4983_v0 }
 0xc3d   : > { %4591 = vmatmul.mubr.msk.bf16.vlgmr.msra.gmra.mrb[28].mxu0 %vm1128_vm1, %v3174_v60  ;;  %v4998_v60 = vld [vmem:[#allocation25 + $0x54] ss:$8 sps:$4 sm:$0xff]  }
 0xc3e   : > { %3457 = vmatpush1.bf16.msra.mxu0 %v4981_v50  ;;  %3488 = vmatprep.mubr.bf16.mxu0 %v5848_v39 }
 0xc3f   : > { %v7212_v49 = vpop.eup %5241  ;;  %3458 = vmatprep.subr.bf16.mxu0 %v4986_v45 }
 0xc40   : > { %v3180_v10 = vmul.f32 %v7212_v49, %v7112_v1 }
 0xc41   : > { %v7214_v16 = vpop.eup %5243 }
 0xc42   : > { %v3181_v48 = vmul.f32 %v7214_v16, %v7116_v61  ;;  %3459 = vmatpush1.bf16.msra.mxu0 %v4984_v12  ;;  %v5020_v12 = vld [vmem:[#allocation23 + $0x50] ss:$8 sps:$4 sm:$0xff]  }
 0xc43   : > { %3460 = vmatprep.subr.bf16.mxu0 %v4989_v13  ;;  %v3331_v13 = vmul.f32 %v3325_v43, %v7089_v21  ;;  %v3327_v21 = vmul.f32 %v7212_v49, %v7212_v49 }
 0xc44   : > { %v3184_v63 = vpack.c.bf16 %v3181_v48, %v3180_v10  ;;  %v3332_v48 = vmul.f32 %v3326_v36, %v7093_v56  ;;  %v3328_v56 = vmul.f32 %v7214_v16, %v7214_v16 }
 0xc46   : > { %4595 = vmatpush3.bf16.msra.mxu1 %v3184_v63  ;;  %3461 = vmatpush1.bf16.msra.mxu0 %v4987_v15 }
 0xc47   : > { %3462 = vmatprep.subr.bf16.mxu0 %v4992_v53  ;;  %v5025_v53 = vld [vmem:[#allocation23 + $0x64] ss:$8 sps:$4 sm:$0xff]  }
 0xc49   : > { %4597 = vmatmul.mubr.msk.bf16.vlgmr.msra.gmra.mrb[60].mxu1 %vm1128_vm1, %v3175_v41 }
 0xc4a   : > { %3463 = vmatpush1.bf16.msra.mxu0 %v4990_v19 }
 0xc4b   : > { %3464 = vmatprep.subr.bf16.mxu0 %v4995_v54  ;;  %v5023_v54 = vld [vmem:[#allocation23 + $0x60] ss:$8 sps:$4 sm:$0xff]  }
 0xc4e   : > { %3465 = vmatpush1.bf16.msra.mxu0 %v4993_v55 }
 0xc4f   : > { %3466 = vmatprep.subr.bf16.mxu0 %v4998_v60  ;;  %v5026_v60 = vld [vmem:[#allocation23 + $0x70] ss:$8 sps:$4 sm:$0xff]  }
 0xc52   : > { %3467 = vmatpush1.bf16.msra.mxu0 %v4996_v52 }
 0xc53   : > { %3468 = vmatprep.subr.bf16.mxu0 %v5001_v2 }
 0xc56   : > { %3469 = vmatpush1.bf16.msra.mxu0 %v4999_v33 }
 0xc57   : > { %3470 = vmatprep.subr.bf16.mxu0 %v5004_v17  ;;  %v3333_v17 = vmul.f32 %v3327_v21, %v7112_v1  ;;  %v3662_v1 = vld [vmem:[%s7591_s3] sm:$0xff] }
 0xc5a   : > { %3471 = vmatpush1.bf16.msra.mxu0 %v5002_v22 }
 0xc5b   : > { %3599 = vmatprep.subr.bf16.mxu0 %v5007_v35  ;;  %v3334_v35 = vmul.f32 %v3328_v56, %v7116_v61 }
 0xcf8   : > { %v3222_v41 = vpop.f32.mrb[56].mxu1 }
 0xcf9   : > { %v3317_v4 = vmul.f32 %v7190_v25, %v3222_v41  ;;  %v4586_v5 = vpop.f32.mrb[57].mxu1  ;;  %v5013_v25 = vld [vmem:[#allocation23 + $0x24] ss:$8 sps:$4 sm:$0xff]  }
 0xcfa   : > { %v3225_v7 = vpop.f32.mrb[58].mxu1 }
 0xcfb   : > { %v3318_v18 = vmul.f32 %v7192_v3, %v3225_v7  ;;  %v4587_v29 = vpop.f32.mrb[59].mxu1  ;;  %v3335_v8 = vadd.f32 %v3329_v42, %v3317_v4  ;;  %v5014_v3 = vld [vmem:[#allocation23 + $0x30] ss:$8 sps:$4 sm:$0xff]   ;;  %v3663_v42 = vld [vmem:[%s7592_s7 + $0x8] sm:$0xff] }
 0xcfc   : > { %v3665_v29 = vld [vmem:[%s7592_s7 + $0x18] sm:$0xff] }
 0xcfd   : > { %v3336_v28 = vadd.f32 %v3330_v34, %v3318_v18 }
 0xcff   : > { %v3341_v32 = vpack.c.bf16 %v3336_v28, %v3335_v8 }
 0xd01   : > { %3489 = vmatmul.mubr.bf16.vlgmr.msra.gmra.mrb[32].mxu0 %v3341_v32 }
 0xd02   : > { %3600 = vmatpush1.bf16.msra.mxu0 %v5005_v26  ;;  %3498 = vmatprep.mubr.bf16.mxu0 %v5848_v39 }
 0xd03   : > { %3601 = vmatprep.subr.bf16.mxu0 %v5010_v27 }
 0xd06   : > { %3602 = vmatpush1.bf16.msra.mxu0 %v5008_v46 }
 0xd07   : > { %3603 = vmatprep.subr.bf16.mxu0 %v5013_v25 }
 0xd0a   : > { %3604 = vmatpush1.bf16.msra.mxu0 %v5011_v11 }
 0xd0b   : > { %3605 = vmatprep.subr.bf16.mxu0 %v5016_v51 }
 0xd0e   : > { %3606 = vmatpush1.bf16.msra.mxu0 %v5014_v3 }
 0xd0f   : > { %3607 = vmatprep.subr.bf16.mxu0 %v5019_v37 }
 0xd10   : > { %v3266_v0 = vpop.f32.mrb[28].mxu0 }
 0xd11   : > { %v3319_v58 = vmul.f32 %v7202_v38, %v3266_v0  ;;  %v4592_v50 = vpop.f32.mrb[29].mxu0  ;;  %v5028_v38 = vld [vmem:[#allocation23 + $0x74] ss:$8 sps:$4 sm:$0xff]  }
 0xd12   : > { %v3269_v45 = vpop.f32.mrb[30].mxu0  ;;  %3608 = vmatpush1.bf16.msra.mxu0 %v5017_v20  ;;  %v5270_v0 = vld [vmem:[%s6444_s11 + $0x18] sm:$0xff]  ;;  %v5272_v50 = vld [vmem:[%s6444_s11 + $0x28] sm:$0xff] }
 0xd13   : > { %v3320_v10 = vmul.f32 %v7204_v31, %v3269_v45  ;;  %v4593_v15 = vpop.f32.mrb[31].mxu0  ;;  %3609 = vmatprep.subr.bf16.mxu0 %v5022_v44  ;;  %v3337_v63 = vadd.f32 %v3331_v13, %v3319_v58  ;;  %v5269_v44 = vld [vmem:[%s6444_s11 + $0x8] sm:$0xff]  ;;  %v5271_v58 = vld [vmem:[%s6444_s11] sm:$0xff]  ;;  %v5273_v45 = vld [vmem:[%s6444_s11 + $0x10] sm:$0xff] }
 0xd14   : > { %v7373_v13 = vld [vmem:[#allocation26] sm:$0xff] }
 0xd15   : > { %v3338_v19 = vadd.f32 %v3332_v48, %v3320_v10  ;;  %v3679_v48 = vld [vmem:[#allocation26 + $0x8] sm:$0xff] }
 0xd16   : > { %3610 = vmatpush1.bf16.msra.mxu0 %v5020_v12  ;;  %v5274_v12 = vld [vmem:[%s6444_s11 + $0x20] sm:$0xff]  ;;  %s7593_s11 = smul.u32 48, %s6438_s15 }
 0xd17   : > { %v3342_v55 = vpack.c.bf16 %v3338_v19, %v3337_v63  ;;  %3611 = vmatprep.subr.bf16.mxu0 %v5025_v53 }
 0xd19   : > { %3499 = vmatmul.mubr.bf16.gmra.mrb[36].mxu0 %v3342_v55 }
 0xd1a   : > { %3508 = vmatprep.mubr.bf16.mxu0 %v5848_v39  ;;  %3612 = vmatpush1.bf16.msra.mxu0 %v5023_v54 }
 0xd1b   : > { %3613 = vmatprep.subr.bf16.mxu0 %v5028_v38 }
 0xd1c   : > { %v3310_v31 = vpop.f32.mrb[60].mxu1 }
 0xd1d   : > { %v3321_v52 = vmul.f32 %v7212_v49, %v3310_v31  ;;  %v4598_v2 = vpop.f32.mrb[61].mxu1  ;;  %v3664_v49 = vld [vmem:[%s7592_s7 + $0x10] sm:$0xff] }
 0xd1e   : > { %v3313_v33 = vpop.f32.mrb[62].mxu1  ;;  %3614 = vmatpush1.bf16.msra.mxu0 %v5026_v60 }
 0xd1f   : > { %v3322_v22 = vmul.f32 %v7214_v16, %v3313_v33  ;;  %v4599_v9 = vpop.f32.mrb[63].mxu1  ;;  %v3339_v23 = vadd.f32 %v3333_v17, %v3321_v52 }
 0xd21   : > { %v3340_v41 = vadd.f32 %v3334_v35, %v3322_v22 }
 0xd23   : > { %v3343_v4 = vpack.c.bf16 %v3340_v41, %v3339_v23 }
 0xd25   : > { %3509 = vmatmul.mubr.bf16.gmra.mrb[40].mxu0 %v3343_v4 }
 0xd26   : > { %3631 = vmatprep.mubr.bf16.mxu0 %v5848_v39 }
 0xd2d   : > { %3632 = vmatmul.mubr.bf16.vlgmr.msra.gmra.mrb[32].mxu0 %v7074_v40 }
 0xd2e   : > { %3641 = vmatprep.mubr.bf16.mxu0 %v5848_v39 }
 0xd35   : > { %3642 = vmatmul.mubr.bf16.gmra.mrb[36].mxu0 %v7097_v30 }
 0xd36   : > { %3651 = vmatprep.mubr.bf16.mxu0 %v5848_v39 }
 0xd3d   : > { %3652 = vmatmul.mubr.bf16.gmra.mrb[40].mxu0 %v7120_v62 }
 0xe00   : > { %v3633_v61 = vpop.f32.mrb[32].mxu0 }
 0xe01   : > { %v7259_v16 = vmul.f32 %v3662_v1, %v3633_v61  ;;  %v3635_v40 = vpop.f32.mrb[33].mxu0 }
 0xe02   : > { %v3637_v5 = vpop.f32.mrb[34].mxu0  ;;  %v7279_v8 = vmul.f32 %v3663_v42, %v3635_v40 }
 0xe03   : > { %v7261_v7 = vmul.f32 %v3664_v49, %v3637_v5  ;;  %3692 = vrot.lane.b32.xlu1 %v7259_v16, %s5850_s14  ;;  %v3639_v39 = vpop.f32.mrb[35].mxu0  ;;  %v3680_v53 = vadd.f32 %v7373_v13, %v7259_v16 }
 0xe04   : > { %v7283_v28 = vmul.f32 %v3665_v29, %v3639_v39 }
 0xe05   : > { %3694 = vrot.lane.b32.xlu0 %v7261_v7, %s5850_s14  ;;  %v3681_v54 = vadd.f32 %v3679_v48, %v7261_v7 }
 0xe07   : > { %3716 = vrot.lane.b32.xlu1 %v7259_v16, %s5849_s26 }
 0xe08   : > { %v3643_v30 = vpop.f32.mrb[36].mxu0 }
 0xe09   : > { %3718 = vrot.lane.b32.xlu0 %v7261_v7, %s5849_s26  ;;  %v3645_v62 = vpop.f32.mrb[37].mxu0  ;;  %v7295_v25 = vmul.f32 %v3662_v1, %v3643_v30 }
 0xe0a   : > { %v3647_v18 = vpop.f32.mrb[38].mxu0  ;;  %v7313_v3 = vmul.f32 %v3663_v42, %v3645_v62 }
 0xe0b   : > { %3740 = vrot.lane.b32.xlu1 %v7259_v16, %s5851_s4  ;;  %v3649_v34 = vpop.f32.mrb[39].mxu0  ;;  %v7299_v11 = vmul.f32 %v3664_v49, %v3647_v18  ;;  %v3682_v30 = vadd.f32 %v7373_v13, %v7295_v25 }
 0xe0c   : > { %v7309_v51 = vmul.f32 %v3665_v29, %v3649_v34 }
 0xe0d   : > { %3742 = vrot.lane.b32.xlu0 %v7261_v7, %s5851_s4 }
 0xe0f   : > { %3776 = vrot.lane.b32.xlu1 %v7279_v8, %s5850_s14 }
 0xe10   : > { %v3653_v26 = vpop.f32.mrb[40].mxu0 }
 0xe11   : > { %3778 = vrot.lane.b32.xlu0 %v7283_v28, %s5850_s14  ;;  %v3655_v32 = vpop.f32.mrb[41].mxu0  ;;  %v7333_v20 = vmul.f32 %v3662_v1, %v3653_v26 }
 0xe12   : > { %v3657_v27 = vpop.f32.mrb[42].mxu0  ;;  %v7349_v36 = vmul.f32 %v3663_v42, %v3655_v32 }
 0xe13   : > { %3800 = vrot.lane.b32.xlu1 %v7279_v8, %s5849_s26  ;;  %v3659_v46 = vpop.f32.mrb[43].mxu0  ;;  %v7325_v37 = vmul.f32 %v3664_v49, %v3657_v27 }
 0xe14   : > { %v7341_v43 = vmul.f32 %v3665_v29, %v3659_v46 }
 0xe15   : > { %3802 = vrot.lane.b32.xlu0 %v7283_v28, %s5849_s26 }
 0xe17   : > { %3824 = vrot.lane.b32.xlu1 %v7279_v8, %s5851_s4 }
 0xe19   : > { %3826 = vrot.lane.b32.xlu0 %v7283_v28, %s5851_s4 }
 0xe1b   : > { %3696 = vrot.lane.b32.xlu1 %v7295_v25, %s5850_s14 }
 0xe1d   : > { %3722 = vrot.lane.b32.xlu0 %v7299_v11, %s5849_s26 }
 0xe1f   : > { %3720 = vrot.lane.b32.xlu1 %v7295_v25, %s5849_s26 }
 0xe21   : > { %3746 = vrot.lane.b32.xlu0 %v7299_v11, %s5851_s4 }
 0xe23   : > { %3744 = vrot.lane.b32.xlu1 %v7295_v25, %s5851_s4 }
 0xe25   : > { %3782 = vrot.lane.b32.xlu0 %v7309_v51, %s5850_s14 }
 0xe27   : > { %3780 = vrot.lane.b32.xlu1 %v7313_v3, %s5850_s14 }
 0xe29   : > { %3806 = vrot.lane.b32.xlu0 %v7309_v51, %s5849_s26 }
 0xe2b   : > { %3804 = vrot.lane.b32.xlu1 %v7313_v3, %s5849_s26 }
 0xe2d   : > { %3830 = vrot.lane.b32.xlu0 %v7309_v51, %s5851_s4 }
 0xe2f   : > { %3828 = vrot.lane.b32.xlu1 %v7313_v3, %s5851_s4 }
 0xe31   : > { %3702 = vrot.lane.b32.xlu0 %v7325_v37, %s5850_s14 }
 0xe33   : > { %3698 = vrot.lane.b32.xlu1 %v7299_v11, %s5850_s14 }
 0xe35   : > { %3726 = vrot.lane.b32.xlu0 %v7325_v37, %s5849_s26 }
 0xe37   : > { %3700 = vrot.lane.b32.xlu1 %v7333_v20, %s5850_s14 }
 0xe39   : > { %3750 = vrot.lane.b32.xlu0 %v7325_v37, %s5851_s4 }
 0xe3b   : > { %3724 = vrot.lane.b32.xlu1 %v7333_v20, %s5849_s26 }
 0xe3d   : > { %3786 = vrot.lane.b32.xlu0 %v7341_v43, %s5850_s14 }
 0xe3f   : > { %3748 = vrot.lane.b32.xlu1 %v7333_v20, %s5851_s4 }
 0xe41   : > { %3810 = vrot.lane.b32.xlu0 %v7341_v43, %s5849_s26 }
 0xe43   : > { %3784 = vrot.lane.b32.xlu1 %v7349_v36, %s5850_s14 }
 0xe45   : > { %3834 = vrot.lane.b32.xlu0 %v7341_v43, %s5851_s4 }
 0xe47   : > { %3808 = vrot.lane.b32.xlu1 %v7349_v36, %s5849_s26  ;;  %s918_s26 = scalar_lea.vmem [#allocation28], %s7593_s11 }
 0xe48   : > { %s3977_s27 = sshll.u32 %s918_s26, 4  ;;  %s7422_s27 = int_to_ptr.vmem [resolvable:$true] %s3977_s27 }
 0xe49   : > { %3862 = vrot.lane.b32.xlu0 %v5269_v44, %s5851_s4  ;;  %s5725_s11 = scalar_lea.vmem %s7422_s27, 768 }
 0xe4a   : > { %p5726_p3 = scmp.ne.s32.totalorder %s7422_s27, %s5725_s11 }
 0xe4b   : > { %3832 = vrot.lane.b32.xlu1 %v7349_v36, %s5851_s4 }
 0xe4c   : > { %p5727_p9 = pnand %p5726_p3, %p7595_p5 }
 0xe4d   : > { %3866 = vrot.lane.b32.xlu0 %v5270_v0, %s5851_s4 }
 0xe4e   : > { %p5728_p7 = pneg %p5727_p9 }
 0xe4f   : > { %3860 = vrot.lane.b32.xlu1 %v5271_v58, %s5851_s4 }
 0xe51   : > { %3870 = vrot.lane.b32.xlu0 %v5272_v50, %s5851_s4 }
 0xe53   : > { %3864 = vrot.lane.b32.xlu1 %v5273_v45, %s5851_s4 }
 0xe57   : > { %3868 = vrot.lane.b32.xlu1 %v5274_v12, %s5851_s4 }
 0xe75   : > { %v3693_v10 = vpop.permute.xlu1 %3692 }
 0xe76   : > { %v3710_v19 = vadd.f32 %v3693_v10, %v3680_v53 }
 0xe77   : > { %v3695_v15 = vpop.permute.xlu0 %3694 }
 0xe78   : > { %v3711_v38 = vadd.f32 %v3695_v15, %v3681_v54  ;;  %v3683_v15 = vadd.f32 %v3679_v48, %v7299_v11 }
 0xe79   : > { %v3717_v63 = vpop.permute.xlu1 %3716 }
 0xe7a   : > { %v3734_v60 = vadd.f32 %v3717_v63, %v3710_v19  ;;  %v3685_v63 = vadd.f32 %v3679_v48, %v7325_v37 }
 0xe7b   : > { %v3719_v55 = vpop.permute.xlu0 %3718 }
 0xe7c   : > { %v3735_v56 = vadd.f32 %v3719_v55, %v3711_v38 }
 0xe7d   : > { %v3741_v21 = vpop.permute.xlu1 %3740 }
 0xe7e   : > { %v3758_v31 = vadd.f32 %v3741_v21, %v3734_v60 }
 0xe7f   : > { %v3743_v52 = vpop.permute.xlu0 %3742 }
 0xe80   : > { %v3759_v2 = vadd.f32 %v3743_v52, %v3735_v56  ;;  %v3764_v17 = vadd.f32 %v3758_v31, %v7279_v8  ;;  %v3684_v52 = vadd.f32 %v7373_v13, %v7333_v20 }
 0xe81   : > { %v3777_v33 = vpop.permute.xlu1 %3776 }
 0xe82   : > { %v3765_v35 = vadd.f32 %v3759_v2, %v7283_v28  ;;  %v3794_v23 = vadd.f32 %v3777_v33, %v3764_v17 }
 0xe83   : > { %v3779_v22 = vpop.permute.xlu0 %3778 }
 0xe84   : > { %v3795_v4 = vadd.f32 %v3779_v22, %v3765_v35 }
 0xe85   : > { %v3801_v9 = vpop.permute.xlu1 %3800 }
 0xe86   : > { %v3818_v1 = vadd.f32 %v3801_v9, %v3794_v23 }
 0xe87   : > { %v3803_v41 = vpop.permute.xlu0 %3802 }
 0xe88   : > { %v3819_v49 = vadd.f32 %v3803_v41, %v3795_v4 }
 0xe89   : > { %v3825_v61 = vpop.permute.xlu1 %3824 }
 0xe8a   : > { %v3842_v16 = vadd.f32 %v3825_v61, %v3818_v1 }
 0xe8b   : > { %v3827_v40 = vpop.permute.xlu0 %3826 }
 0xe8c   : > { %5245 = vtanh.f32 %v3842_v16  ;;  %v3843_v5 = vadd.f32 %v3827_v40, %v3819_v49 }
 0xe8d   : > { %v3697_v7 = vpop.permute.xlu1 %3696 }
 0xe8e   : > { %5247 = vtanh.f32 %v3843_v5  ;;  %v3712_v42 = vadd.f32 %v3697_v7, %v3682_v30 }
 0xe8f   : > { %v3723_v39 = vpop.permute.xlu0 %3722 }
 0xe91   : > { %v3721_v62 = vpop.permute.xlu1 %3720 }
 0xe92   : > { %v3736_v34 = vadd.f32 %v3721_v62, %v3712_v42 }
 0xe93   : > { %v3747_v18 = vpop.permute.xlu0 %3746 }
 0xe95   : > { %v3745_v29 = vpop.permute.xlu1 %3744 }
 0xe96   : > { %v5246_v8 = vpop.eup %5245  ;;  %v3760_v28 = vadd.f32 %v3745_v29, %v3736_v34 }
 0xe97   : > { %v3783_v26 = vpop.permute.xlu0 %3782  ;;  %3896 = vrot.lane.b32.xlu1 %v5246_v8, %s5851_s4 }
 0xe98   : > { %v5248_v32 = vpop.eup %5247  ;;  %v3766_v46 = vadd.f32 %v3760_v28, %v7313_v3 }
 0xe99   : > { %v3781_v27 = vpop.permute.xlu1 %3780  ;;  %3898 = vrot.lane.b32.xlu0 %v5248_v32, %s5851_s4 }
 0xe9a   : > { %v3796_v58 = vadd.f32 %v3781_v27, %v3766_v46 }
 0xe9b   : > { %v3807_v44 = vpop.permute.xlu0 %3806 }
 0xe9d   : > { %v3805_v0 = vpop.permute.xlu1 %3804 }
 0xe9e   : > { %v3820_v50 = vadd.f32 %v3805_v0, %v3796_v58 }
 0xe9f   : > { %v3831_v25 = vpop.permute.xlu0 %3830 }
 0xea1   : > { %v3829_v45 = vpop.permute.xlu1 %3828 }
 0xea2   : > { %v3844_v12 = vadd.f32 %v3829_v45, %v3820_v50 }
 0xea3   : > { %v3703_v10 = vpop.permute.xlu0 %3702 }
 0xea4   : > { %5249 = vtanh.f32 %v3844_v12  ;;  %v3715_v55 = vadd.f32 %v3703_v10, %v3685_v63  ;;  %v3886_v12 = vsub.f32 1.0, %v7079_v6  ;;  %v3887_v63 = vsub.f32 1.0, %v7083_v24 }
 0xea5   : > { %v3699_v53 = vpop.permute.xlu1 %3698 }
 0xea6   : > { %v3713_v19 = vadd.f32 %v3699_v53, %v3683_v15 }
 0xea7   : > { %v3727_v54 = vpop.permute.xlu0 %3726 }
 0xea8   : > { %v3737_v38 = vadd.f32 %v3723_v39, %v3713_v19  ;;  %v3739_v21 = vadd.f32 %v3727_v54, %v3715_v55 }
 0xea9   : > { %v3701_v60 = vpop.permute.xlu1 %3700 }
 0xeaa   : > { %v3761_v3 = vadd.f32 %v3747_v18, %v3737_v38  ;;  %v3714_v22 = vadd.f32 %v3701_v60, %v3684_v52  ;;  %v3889_v38 = vsub.f32 1.0, %v7106_v47 }
 0xeab   : > { %v3751_v56 = vpop.permute.xlu0 %3750 }
 0xeac   : > { %v3767_v31 = vadd.f32 %v3761_v3, %v7309_v51  ;;  %v3763_v2 = vadd.f32 %v3751_v56, %v3739_v21  ;;  %v3888_v56 = vsub.f32 1.0, %v7102_v59 }
 0xead   : > { %v3725_v33 = vpop.permute.xlu1 %3724 }
 0xeae   : > { %v5250_v17 = vpop.eup %5249  ;;  %v3797_v11 = vadd.f32 %v3783_v26, %v3767_v31  ;;  %v3738_v35 = vadd.f32 %v3725_v33, %v3714_v22  ;;  %v3769_v9 = vadd.f32 %v3763_v2, %v7341_v43  ;;  %v3884_v26 = vsub.f32 1.0, %v7055_v57 }
 0xeaf   : > { %3900 = vrot.lane.b32.xlu1 %v5250_v17, %s5851_s4  ;;  %v3787_v37 = vpop.permute.xlu0 %3786 }
 0xeb0   : > { %v3821_v48 = vadd.f32 %v3807_v44, %v3797_v11  ;;  %v3799_v51 = vadd.f32 %v3787_v37, %v3769_v9  ;;  %v3885_v44 = vsub.f32 1.0, %v7060_v14 }
 0xeb1   : > { %v3749_v23 = vpop.permute.xlu1 %3748 }
 0xeb2   : > { %v3845_v41 = vadd.f32 %v3831_v25, %v3821_v48  ;;  %v3762_v4 = vadd.f32 %v3749_v23, %v3738_v35 }
 0xeb3   : > { %v3811_v1 = vpop.permute.xlu0 %3810 }
 0xeb4   : > { %5251 = vtanh.f32 %v3845_v41  ;;  %v3823_v20 = vadd.f32 %v3811_v1, %v3799_v51  ;;  %v3768_v13 = vadd.f32 %v3762_v4, %v7349_v36 }
 0xeb5   : > { %v3785_v61 = vpop.permute.xlu1 %3784 }
 0xeb6   : > { %v3798_v5 = vadd.f32 %v3785_v61, %v3768_v13 }
 0xeb7   : > { %v3835_v49 = vpop.permute.xlu0 %3834 }
 0xeb8   : > { %v3847_v16 = vadd.f32 %v3835_v49, %v3823_v20 }
 0xeb9   : > { %v3809_v40 = vpop.permute.xlu1 %3808 }
 0xeba   : > { %5253 = vtanh.f32 %v3847_v16  ;;  %v3822_v7 = vadd.f32 %v3809_v40, %v3798_v5 }
 0xebb   : > { %v3863_v36 = vpop.permute.xlu0 %3862 }
 0xebc   : > { %v3879_v58 = vmul.f32 %v7060_v14, %v3863_v36 }
 0xebd   : > { %v3833_v39 = vpop.permute.xlu1 %3832 }
 0xebe   : > { %v5252_v30 = vpop.eup %5251  ;;  %v3846_v62 = vadd.f32 %v3833_v39, %v3822_v7 }
 0xebf   : > { %3902 = vrot.lane.b32.xlu0 %v5252_v30, %s5851_s4  ;;  %v3867_v29 = vpop.permute.xlu0 %3866 }
 0xec0   : > { %5255 = vtanh.f32 %v3846_v62  ;;  %v3881_v14 = vmul.f32 %v7083_v24, %v3867_v29 }
 0xec1   : > { %v3861_v18 = vpop.permute.xlu1 %3860 }
 0xec2   : > { %v3878_v27 = vmul.f32 %v7055_v57, %v3861_v18 }
 0xec3   : > { %v3871_v28 = vpop.permute.xlu0 %3870 }
 0xec4   : > { %v5254_v43 = vpop.eup %5253  ;;  %v3883_v3 = vmul.f32 %v7106_v47, %v3871_v28 }
 0xec5   : > { %3906 = vrot.lane.b32.xlu0 %v5254_v43, %s5851_s4  ;;  %v3865_v34 = vpop.permute.xlu1 %3864 }
 0xec6   : > { %v3880_v15 = vmul.f32 %v7079_v6, %v3865_v34 }
 0xec9   : > { %v3869_v8 = vpop.permute.xlu1 %3868 }
 0xeca   : > { %v5256_v42 = vpop.eup %5255  ;;  %v3882_v52 = vmul.f32 %v7102_v59, %v3869_v8 }
 0xecb   : > { %3904 = vrot.lane.b32.xlu1 %v5256_v42, %s5851_s4  ;;  %s7594_s4 = sld [smem:[#allocation59_spill]] }
 0xf09   : > { %v3897_v32 = vpop.permute.xlu1 %3896 }
 0xf0a   : > { %v3914_v46 = vmul.f32 %v3897_v32, %v3884_v26 }
 0xf0b   : > { %v3899_v0 = vpop.permute.xlu0 %3898 }
 0xf0c   : > { %v3920_v25 = vadd.f32 %v3914_v46, %v3878_v27  ;;  %v3915_v50 = vmul.f32 %v3899_v0, %v3885_v44 }
 0xf0e   : > { %v3921_v45 = vadd.f32 %v3915_v50, %v3879_v58  ;;  %3932 = vrot.lane.b32.xlu1 %v3920_v25, %s5850_s14 }
 0xf10   : > { %3934 = vrot.lane.b32.xlu0 %v3921_v45, %s5850_s14 }
 0xf21   : > { %v3901_v10 = vpop.permute.xlu1 %3900 }
 0xf22   : > { %v3916_v53 = vmul.f32 %v3901_v10, %v3886_v12 }
 0xf24   : > { %v3922_v57 = vadd.f32 %v3916_v53, %v3880_v15 }
 0xf26   : > { %3936 = vrot.lane.b32.xlu1 %v3922_v57, %s5850_s14 }
 0xf31   : > { %v3903_v19 = vpop.permute.xlu0 %3902 }
 0xf32   : > { %v3917_v54 = vmul.f32 %v3903_v19, %v3887_v63 }
 0xf34   : > { %v3923_v55 = vadd.f32 %v3917_v54, %v3881_v14 }
 0xf36   : > { %3938 = vrot.lane.b32.xlu0 %v3923_v55, %s5850_s14 }
 0xf37   : > { %v3907_v60 = vpop.permute.xlu0 %3906 }
 0xf38   : > { %v3919_v6 = vmul.f32 %v3907_v60, %v3889_v38 }
 0xf3a   : > { %v3925_v21 = vadd.f32 %v3919_v6, %v3883_v3 }
 0xf3c   : > { %3942 = vrot.lane.b32.xlu0 %v3925_v21, %s5850_s14 }
 0xf3d   : > { %v3905_v31 = vpop.permute.xlu1 %3904 }
 0xf3e   : > { %v3918_v24 = vmul.f32 %v3905_v31, %v3888_v56 }
 0xf40   : > { %v3924_v2 = vadd.f32 %v3918_v24, %v3882_v52 }
 0xf42   : > { %3940 = vrot.lane.b32.xlu1 %v3924_v2, %s5850_s14  ;;  %s4425_s14 = smul.u32 768, %s7568_s9  ;;  %s5852_s9 = smov [#allocation28]  }
 0xf43   : > { %s5729_s7 = sshll.u32 %s5852_s9, 4  ;;  %s5730_s7 = int_to_ptr.vmem [resolvable:$false] %s5729_s7 }
 0xf44   : > { %s7427_s3 = scalar_lea.hbm %s7594_s4, %s4425_s14  ;;  %s5731_s8 = scalar_lea.vmem %s5730_s7, 1536 }
 0xf45   : > { %p5732_p10 = scmp.lt.s32.totalorder %s7422_s27, %s5730_s7  ;;  %p5733_p4 = scmp.lt.s32.totalorder %s5731_s8, %s5725_s11 }
 0xf47   : > { %p5734_p1 = por %p5733_p4, %p5732_p10 }
 0xf49   : > { %p5735_p13 = pnand %p5734_p1, %p5728_p7 }
 0xf80   : > { %v3933_v33 = vpop.permute.xlu1 %3932 }
 0xf81   : > { %v3950_v17 = vsel %vm2568_vm3, %v3933_v33, 0.0 }
 0xf82   : > { %3956 = vst [vmem:[%s918_s26] sm:$0xff] %v3950_v17  ;;  %v3935_v47 = vpop.permute.xlu0 %3934 }
 0xf83   : > { %v3951_v11 = vsel %vm2568_vm3, %v3935_v47, 0.0 }
 0xf84   : > { %3957 = vst [vmem:[%s918_s26 + $0x8] sm:$0xff] %v3951_v11 }
 0xf98   : > { %v3937_v22 = vpop.permute.xlu1 %3936 }
 0xf99   : > { %v3952_v37 = vsel %vm2568_vm3, %v3937_v22, 0.0 }
 0xf9a   : > { %3958 = vst [vmem:[%s918_s26 + $0x10] sm:$0xff] %v3952_v37 }
 0xfa8   : > { %v3939_v59 = vpop.permute.xlu0 %3938 }
 0xfa9   : > { %v3953_v48 = vsel %vm2568_vm3, %v3939_v59, 0.0 }
 0xfaa   : > { %3959 = vst [vmem:[%s918_s26 + $0x18] sm:$0xff] %v3953_v48 }
 0xfae   : > { %v3943_v35 = vpop.permute.xlu0 %3942 }
 0xfaf   : > { %v3955_v9 = vsel %vm2568_vm3, %v3943_v35, 0.0 }
 0xfb0   : > { %3961 = vst [vmem:[%s918_s26 + $0x28] sm:$0xff] %v3955_v9 }
 0xfb4   : > { %v3941_v23 = vpop.permute.xlu1 %3940 }
 0xfb5   : > { %v3954_v41 = vsel %vm2568_vm3, %v3941_v23, 0.0 }
 0xfb6   : > { %3960 = vst [vmem:[%s918_s26 + $0x20] sm:$0xff] %v3954_v41 }
 0xfb7   : > { %5738 = shalt.err (!%p5735_p13)
}
 0xfb8   : > { %s5739_s26 = scalar_lea.hbm %s7427_s3, 768  ;;  %s5743_s6 = scalar_lea.hbm %s7594_s4, 1536 }
 0xfb9   : > { %p5740_p0 = scmp.ne.s32.totalorder %s7427_s3, %s5739_s26  ;;  %p5744_p6 = scmp.lt.u32.totalorder %s7427_s3, %s7594_s4 }
 0xfba   : > { %p5745_p11 = scmp.lt.u32.totalorder %s5743_s6, %s5739_s26  ;;  %p5747_p3 = scmp.lt.u32.totalorder %s5739_s26, %s7427_s3 }
 0xfbb   : > { %p5741_p2 = pnand %p5740_p0, %p7595_p5 }
 0xfbc   : > { %p5746_p12 = por %p5745_p11, %p5744_p6 }
 0xfbd   : > { %p5742_p8 = pneg %p5741_p2 }
 0xfbe   : > { %p5748_p9 = por %p5747_p3, %p5746_p12 }
 0xfc0   : > { %p5749_p7 = pnand %p5748_p9, %p5742_p8 }
 0xfc2   : > { %5752 = shalt.err (!%p5749_p7)
}
 0xfc3   : > { %s5853_s8 = smov 128   ;;  %s5854_s11 = smov 8  }
 0xfc4   : > { %4700 = dma.vmem_to_hbm [thread:$0]  (%p7595_p5), %s7422_s27, 768, %s7427_s3, %s3963_s1, %s5853_s8, %s5853_s8, %s5854_s11  }
 0xfc5 PF: > { %s7596_s14 = sld [smem:[#allocation39_spill]]  ;;  %p7597_p10 = scmp.ne.s32.totalorder %s7563_s2, 0 }
 0xfc6   : > { %p7598_p4 = scmp.ge.s32.totalorder %s5823_s30, 2 }
 0xfc8   : > { %p4753_p1 = pnand %p7598_p4, %p7597_p10 }
 0xfcb   : > { %s3992_s10 = sand.u32 1, %s7596_s14  }
 0xfcc   : > { %s3993_s26 = scalar_lea.sflag [#allocation4], %s3992_s10 }
 0xfcd   : > { %5806 = dma.done.wait (!%p4753_p1), %s3993_s26, 768  }
 0xfce   : > { %5808 = vsyncadd (!%p4753_p1), %s3993_s26, 4294966528  ;;  %p43_p13 = scmp.ge.s32.totalorder %s6362_s5, 4   ;;  %s7599_s3 = smov %s5815_s28 }
 0xfcf   : > { %s7600_s28 = smov %s5819_s29  ;;  %s7601_s29 = smov %s6374_s24 }
 0xfd0   : > { %s7602_s30 = smov %s6362_s5  ;;  %45 = sbr.rel (!%p43_p13) target bundleno = 32 (0x20), region = 216 }
 0xfd7   :  { %3998 = vsyncpa [#allocation3], 1 }
 0xfd8   :  { %4000 = vsyncpa [#allocation3 + $0x1], 1 }
 0xfd9   :  { %4001 = vsyncpa [#allocation6], 1 }
 0xfda   :  { %4002 = vsyncpa [#allocation9], 1 }
 0xfdb   :  { %4003 = vsyncpa [#allocation12], 1 }
 0xfdc   :  { %4004 = vsyncpa [#allocation15], 1 }
 0xfdd   :  { %4005 = vsyncpa [#allocation18], 1 }
 0xfde   :  { %4006 = vsyncpa [#allocation21], 1 }
 0xfdf   :  { %4007 = vsyncpa [#allocation24], 1 }
 0xfe0   :  { %4008 = vsyncpa [#allocation27], 1 }
 0xfe1   :  { %4009 = vsyncpa [#allocation4], 1 }
 0xfe2   :  { %4011 = vsyncpa [#allocation4 + $0x1], 1 }

</bundles_post_ra>
